<compile_context>
chip_gen: v7x
topology: tpu7x:2x2x1
jax: 0.10.0
libtpu: 0.0.40
codegen_flags: <defaults>
</compile_context>

<pallas_src>
import functools
import math

import jax
import jax.numpy as jnp
from jax.experimental import pallas as pl
from jax.experimental.pallas import tpu as pltpu


# ----------------------------------------------------------------------------
# Fused decoder-layer kernel (one pallas_call per layer, grid over batch)
# ----------------------------------------------------------------------------
_WEIGHT_KEYS = (
    "self_wqkv", "self_bqkv", "self_wo", "self_bo",
    "enc_wq", "enc_bq", "enc_wkv", "enc_bkv", "enc_wo", "enc_bo",
    "ff_w1", "ff_b1", "ff_w2", "ff_b2",
    "ln1_g", "ln1_b", "ln2_g", "ln2_b", "ln3_g", "ln3_b",
)


def _decoder_layer_kernel(
    x_ref, mem_ref, tmask_ref, smask_ref,
    wqkv_s_ref, bqkv_s_ref, wo_s_ref, bo_s_ref,
    wq_e_ref, bq_e_ref, wkv_e_ref, bkv_e_ref, wo_e_ref, bo_e_ref,
    w1_ref, b1_ref, w2_ref, b2_ref,
    g1_ref, be1_ref, g2_ref, be2_ref, g3_ref, be3_ref,
    o_ref, a_ref=None, *, n_heads, eps, return_attn,
):
    H = wo_s_ref.shape[0]
    D = H // n_heads
    inv_scale = 1.0 / math.sqrt(D)

    x = x_ref[...]            # (L, H)   one batch element
    mem = mem_ref[...]        # (Ls, H)
    t_mask = tmask_ref[...]   # (L, L)   additive: 0 / -1e10
    s_mask = smask_ref[...]   # (L, Ls)  additive: 0 / -1e10

    def layer_norm(h, g, b):
        mean = jnp.mean(h, axis=-1, keepdims=True)
        var = jnp.mean((h - mean) ** 2, axis=-1, keepdims=True)
        return (h - mean) * jax.lax.rsqrt(var + eps) * g + b

    def mha_core(q, k, v, add_mask, wo, bo):
        # q: (Lq, H) already projected (bias included); k, v: (Lk, H).
        Lq = q.shape[0]
        acc = jnp.zeros((Lq, H), jnp.float32)
        probs = []
        for h in range(n_heads):
            sl = slice(h * D, (h + 1) * D)
            qh = q[:, sl] * inv_scale                      # fold 1/sqrt(D) into q
            kh = k[:, sl]
            vh = v[:, sl]
            e = jax.lax.dot_general(
                qh, kh, (((1,), (1,)), ((), ())),
                preferred_element_type=jnp.float32)        # (Lq, Lk)
            e = e + add_mask
            e = e - jnp.max(e, axis=-1, keepdims=True)
            p = jnp.exp(e)
            p = p * pl.reciprocal(jnp.sum(p, axis=-1, keepdims=True), approx=True)
            probs.append(p)
            ctx_h = jnp.dot(p, vh, preferred_element_type=jnp.float32)   # (Lq, D)
            # per-head slice of the output projection (== concat(ctx) @ wo)
            acc = acc + jnp.dot(ctx_h, wo[sl, :], preferred_element_type=jnp.float32)
        return acc + bo, probs

    # ---- self attention (fused QKV projection) + LN1 ----
    qkv = jnp.dot(x, wqkv_s_ref[...], preferred_element_type=jnp.float32) \
        + bqkv_s_ref[...]                                   # (L, 3H)
    sa, _ = mha_core(qkv[:, :H], qkv[:, H:2 * H], qkv[:, 2 * H:], t_mask,
                     wo_s_ref[...], bo_s_ref[...])
    x = layer_norm(x + sa, g1_ref[...], be1_ref[...])

    # ---- encoder attention (fused KV projection of memory) + LN2 ----
    q_e = jnp.dot(x, wq_e_ref[...], preferred_element_type=jnp.float32) + bq_e_ref[...]
    kv_e = jnp.dot(mem, wkv_e_ref[...], preferred_element_type=jnp.float32) + bkv_e_ref[...]
    ea, probs = mha_core(q_e, kv_e[:, :H], kv_e[:, H:], s_mask,
                         wo_e_ref[...], bo_e_ref[...])
    x = layer_norm(x + ea, g2_ref[...], be2_ref[...])

    # ---- feed-forward (Linear -> ReLU -> Linear) + LN3 ----
    hdn = jnp.maximum(
        jnp.dot(x, w1_ref[...], preferred_element_type=jnp.float32) + b1_ref[...], 0.0)
    ff = jnp.dot(hdn, w2_ref[...], preferred_element_type=jnp.float32) + b2_ref[...]
    x = layer_norm(x + ff, g3_ref[...], be3_ref[...])

    o_ref[...] = x
    if return_attn:
        for h in range(n_heads):
            a_ref[h, :, :] = probs[h]


def decoder_layer(x, memory, tgt_add, src_add, p, n_heads, return_attn):
    """x: (B, L, H), memory: (B, Ls, H), additive masks (B, L, L)/(B, L, Ls)."""
    B, L, H = x.shape
    Ls = memory.shape[1]

    weights = [p[k] for k in _WEIGHT_KEYS]        # all 2D f32 arrays
    in_specs = [
        pl.BlockSpec((None, L, H), lambda b: (b, 0, 0)),     # x
        pl.BlockSpec((None, Ls, H), lambda b: (b, 0, 0)),    # memory
        pl.BlockSpec((None, L, L), lambda b: (b, 0, 0)),     # tgt additive mask
        pl.BlockSpec((None, L, Ls), lambda b: (b, 0, 0)),    # src additive mask
    ] + [pl.BlockSpec(w.shape, lambda b: (0, 0)) for w in weights]

    if return_attn:
        out_shape = (
            jax.ShapeDtypeStruct((B, L, H), jnp.float32),
            jax.ShapeDtypeStruct((B, n_heads, L, Ls), jnp.float32),
        )
        out_specs = (
            pl.BlockSpec((None, L, H), lambda b: (b, 0, 0)),
            pl.BlockSpec((None, n_heads, L, Ls), lambda b: (b, 0, 0, 0)),
        )
    else:
        out_shape = jax.ShapeDtypeStruct((B, L, H), jnp.float32)
        out_specs = pl.BlockSpec((None, L, H), lambda b: (b, 0, 0))

    return pl.pallas_call(
        functools.partial(_decoder_layer_kernel, n_heads=n_heads, eps=1e-5,
                          return_attn=return_attn),
        out_shape=out_shape,
        grid=(B,),
        in_specs=in_specs,
        out_specs=out_specs,
        compiler_params=pltpu.CompilerParams(dimension_semantics=("parallel",)),
    )(x, memory, tgt_add, src_add, *weights)


# ----------------------------------------------------------------------------
# Tiled, lane-padded linear for the output projection (fc_out)
# ----------------------------------------------------------------------------
def _linear_kernel(x_ref, w_ref, b_ref, o_ref):
    o_ref[...] = (
        jnp.dot(x_ref[...], w_ref[...], preferred_element_type=jnp.float32)
        + b_ref[...]
    )


def linear_lane_padded(x, w, b, tm=8):
    """x: (M, K) @ w: (K, N) + b: (N,).  N is zero-padded to a multiple of 128
    inside the kernel path (unmasked lane-dense stores) and sliced afterward."""
    M, K = x.shape
    N = w.shape[1]
    n_pad = (-N) % 128
    if n_pad:
        w = jnp.pad(w, ((0, 0), (0, n_pad)))
        b = jnp.pad(b, ((0, n_pad),))
    Np = N + n_pad
    tn = 128 if Np % 128 == 0 else Np
    if M % tm != 0:
        tm = M
    out = pl.pallas_call(
        _linear_kernel,
        out_shape=jax.ShapeDtypeStruct((M, Np), jnp.float32),
        grid=(M // tm, Np // tn),
        in_specs=[
            pl.BlockSpec((tm, K), lambda i, j: (i, 0)),
            pl.BlockSpec((K, tn), lambda i, j: (0, j)),
            pl.BlockSpec((1, tn), lambda i, j: (0, j)),
        ],
        out_specs=pl.BlockSpec((tm, tn), lambda i, j: (i, j)),
        compiler_params=pltpu.CompilerParams(
            dimension_semantics=("parallel", "parallel")),
    )(x, w, b.reshape(1, Np))
    return out[:, :N]


# ----------------------------------------------------------------------------
# Full decoder forward
# ----------------------------------------------------------------------------
def decoder_forward(params, tgt, memory, tgt_mask, src_mask, n_heads):
    B, L = tgt.shape
    Ls = memory.shape[1]
    hid = params["tok_emb"].shape[1]
    scale = jnp.sqrt(jnp.float32(hid))

    # Embedding gathers stay as JAX glue (dropout = identity).
    tok_emb = jnp.take(params["tok_emb"], tgt, axis=0) * scale          # (B, L, H)
    pos_emb = jnp.take(params["pos_emb"], jnp.arange(L), axis=0)[None]  # (1, L, H)
    x = tok_emb + pos_emb

    # Additive f32 masks, computed once and reused across all layers.
    tgt_add = jnp.where(tgt_mask[:, 0] == 0, jnp.float32(-1e10), 0.0)   # (B, L, L)
    src_add = jnp.where(
        jnp.broadcast_to(src_mask[:, 0], (B, L, Ls)) == 0,
        jnp.float32(-1e10), 0.0)                                        # (B, L, Ls)

    attn = None
    n_layers = len(params["layers"])
    for li, lp in enumerate(params["layers"]):
        if li == n_layers - 1:   # only the returned probs are ever written to HBM
            x, attn = decoder_layer(x, memory, tgt_add, src_add, lp, n_heads,
                                    return_attn=True)
        else:
            x = decoder_layer(x, memory, tgt_add, src_add, lp, n_heads,
                              return_attn=False)

    out = linear_lane_padded(x.reshape(B * L, hid),
                             params["fc_out_w"], params["fc_out_b"])
    return out.reshape(B, L, -1), attn


# ----------------------------------------------------------------------------
# Deterministic parameter init (fused projection layouts)
# ----------------------------------------------------------------------------
def init_params(key, output_dim, hid_dim, n_layers, pf_dim, max_length=100):
    keys = iter(jax.random.split(key, 64))

    def w(shape, scale=0.02):
        return (scale * jax.random.normal(next(keys), shape)).astype(jnp.float32)

    def zeros(shape):
        return jnp.zeros(shape, jnp.float32)

    layers = []
    for _ in range(n_layers):
        layers.append({
            # self-attention: [wq | wk | wv] fused along the output dim
            "self_wqkv": w((hid_dim, 3 * hid_dim)), "self_bqkv": zeros((1, 3 * hid_dim)),
            "self_wo": w((hid_dim, hid_dim)), "self_bo": zeros((1, hid_dim)),
            # encoder-attention: q separate, [wk | wv] fused
            "enc_wq": w((hid_dim, hid_dim)), "enc_bq": zeros((1, hid_dim)),
            "enc_wkv": w((hid_dim, 2 * hid_dim)), "enc_bkv": zeros((1, 2 * hid_dim)),
            "enc_wo": w((hid_dim, hid_dim)), "enc_bo": zeros((1, hid_dim)),
            # feed-forward
            "ff_w1": w((hid_dim, pf_dim)), "ff_b1": zeros((1, pf_dim)),
            "ff_w2": w((pf_dim, hid_dim)), "ff_b2": zeros((1, hid_dim)),
            # layer norms
            "ln1_g": jnp.ones((1, hid_dim), jnp.float32), "ln1_b": zeros((1, hid_dim)),
            "ln2_g": jnp.ones((1, hid_dim), jnp.float32), "ln2_b": zeros((1, hid_dim)),
            "ln3_g": jnp.ones((1, hid_dim), jnp.float32), "ln3_b": zeros((1, hid_dim)),
        })

    return {
        "tok_emb": w((output_dim, hid_dim), scale=0.1),
        "pos_emb": w((max_length, hid_dim), scale=0.1),
        "layers": layers,
        "fc_out_w": w((hid_dim, output_dim)),
        "fc_out_b": jnp.zeros((output_dim,), jnp.float32),
    }


# ----------------------------------------------------------------------------
# Demo
# ----------------------------------------------------------------------------
if __name__ == "__main__":
    output_dim = 50   # vocab size
    hid_dim = 32
    n_layers = 2
    n_heads = 4
    pf_dim = 64
    batch = 2
    tgt_len = 8
    src_len = 8

    key = jax.random.PRNGKey(0)
    k_par, k_tgt, k_mem = jax.random.split(key, 3)

    params = init_params(k_par, output_dim, hid_dim, n_layers, pf_dim)

    tgt = jax.random.randint(k_tgt, (batch, tgt_len), 0, output_dim, dtype=jnp.int32)
    memory = jax.random.normal(k_mem, (batch, src_len, hid_dim), dtype=jnp.float32)

    # tgt_mask: causal (B, 1, L, L); src_mask: all-valid padding mask (B, 1, 1, Ls)
    causal = jnp.tril(jnp.ones((tgt_len, tgt_len), jnp.int32))
    tgt_mask = jnp.broadcast_to(causal[None, None, :, :], (batch, 1, tgt_len, tgt_len))
    src_mask = jnp.ones((batch, 1, 1, src_len), jnp.int32)

    fwd = jax.jit(functools.partial(decoder_forward, n_heads=n_heads))
    out, attn = fwd(params, tgt, memory, tgt_mask, src_mask)
    jax.block_until_ready((out, attn))

    assert out.shape == (batch, tgt_len, output_dim)
    assert attn.shape == (batch, n_heads, tgt_len, src_len)
    assert bool(jnp.all(jnp.isfinite(out)))
    assert bool(jnp.all(jnp.isfinite(attn)))
    print("KERNEL_OK")
</pallas_src>

<mosaic_0001>
module attributes {stable_mosaic.version = 11 : i64} {
  func.func @_linear_kernel(%arg0: i32, %arg1: i32, %arg2: memref<8x32xf32, #tpu.memory_space<vmem>>, %arg3: memref<32x128xf32, #tpu.memory_space<vmem>>, %arg4: memref<1x128xf32, #tpu.memory_space<vmem>>, %arg5: memref<8x128xf32, #tpu.memory_space<vmem>>) attributes {dimension_semantics = [#tpu.dimension_semantics<parallel>, #tpu.dimension_semantics<parallel>], iteration_bounds = array<i64: 2, 1>, scalar_prefetch = 0 : i64, scratch_operands = 0 : i64, tpu.core_type = #tpu.core_type<tc>, window_params = [{transform_indices = @transform_0, window_bounds = array<i64: 8, 32>}, {transform_indices = @transform_1, window_bounds = array<i64: 32, 128>}, {transform_indices = @transform_2, window_bounds = array<i64: 1, 128>}, {transform_indices = @transform_3, window_bounds = array<i64: 8, 128>}]} {
    %c0 = arith.constant 0 : index
    %c0_0 = arith.constant 0 : index
    %0 = vector.load %arg2[%c0, %c0_0] : memref<8x32xf32, #tpu.memory_space<vmem>>, vector<8x32xf32>
    %c0_1 = arith.constant 0 : index
    %c0_2 = arith.constant 0 : index
    %1 = vector.load %arg3[%c0_1, %c0_2] : memref<32x128xf32, #tpu.memory_space<vmem>>, vector<32x128xf32>
    %cst = arith.constant dense<0.000000e+00> : vector<8x128xf32>
    %2 = tpu.matmul %0, %1, %cst {dimension_numbers = #tpu.dot_dimension_numbers<[1], [0], [0], [1], [0, 0, 1, 1], [], []>} : vector<8x32xf32>, vector<32x128xf32>, vector<8x128xf32> -> vector<8x128xf32>
    %c0_3 = arith.constant 0 : index
    %c0_4 = arith.constant 0 : index
    %3 = vector.load %arg4[%c0_3, %c0_4] : memref<1x128xf32, #tpu.memory_space<vmem>>, vector<1x128xf32>
    %4 = vector.broadcast %3 : vector<1x128xf32> to vector<8x128xf32>
    %5 = arith.addf %2, %4 : vector<8x128xf32>
    %c0_5 = arith.constant 0 : index
    %c0_6 = arith.constant 0 : index
    %6 = vector.load %arg5[%c0_5, %c0_6] : memref<8x128xf32, #tpu.memory_space<vmem>>, vector<8x128xf32>
    tpu.vector_store %arg5[%c0_5, %c0_6], %5 {strides = array<i32>} : memref<8x128xf32, #tpu.memory_space<vmem>>, vector<8x128xf32>,
    return
  }
  func.func @transform_0(%arg0: i32, %arg1: i32) -> (i32, i32) {
    %c0_i32 = arith.constant 0 : i32
    %c0_i32_0 = arith.constant 0 : i32
    return %arg0, %c0_i32 : i32, i32
  }
  func.func @transform_1(%arg0: i32, %arg1: i32) -> (i32, i32) {
    %c0_i32 = arith.constant 0 : i32
    %c0_i32_0 = arith.constant 0 : i32
    return %c0_i32, %arg1 : i32, i32
  }
  func.func @transform_2(%arg0: i32, %arg1: i32) -> (i32, i32) {
    %c0_i32 = arith.constant 0 : i32
    %c0_i32_0 = arith.constant 0 : i32
    return %c0_i32, %arg1 : i32, i32
  }
  func.func @transform_3(%arg0: i32, %arg1: i32) -> (i32, i32) {
    %c0_i32 = arith.constant 0 : i32
    return %arg0, %arg1 : i32, i32
  }
}

module attributes {stable_mosaic.version = 11 : i64} {
  func.func @_decoder_layer_kernel(%arg0: i32, %arg1: memref<1x8x32xf32, #tpu.memory_space<vmem>>, %arg2: memref<1x8x32xf32, #tpu.memory_space<vmem>>, %arg3: memref<1x8x8xf32, #tpu.memory_space<vmem>>, %arg4: memref<1x8x8xf32, #tpu.memory_space<vmem>>, %arg5: memref<32x96xf32, #tpu.memory_space<vmem>>, %arg6: memref<1x96xf32, #tpu.memory_space<vmem>>, %arg7: memref<32x32xf32, #tpu.memory_space<vmem>>, %arg8: memref<1x32xf32, #tpu.memory_space<vmem>>, %arg9: memref<32x32xf32, #tpu.memory_space<vmem>>, %arg10: memref<1x32xf32, #tpu.memory_space<vmem>>, %arg11: memref<32x64xf32, #tpu.memory_space<vmem>>, %arg12: memref<1x64xf32, #tpu.memory_space<vmem>>, %arg13: memref<32x32xf32, #tpu.memory_space<vmem>>, %arg14: memref<1x32xf32, #tpu.memory_space<vmem>>, %arg15: memref<32x64xf32, #tpu.memory_space<vmem>>, %arg16: memref<1x64xf32, #tpu.memory_space<vmem>>, %arg17: memref<64x32xf32, #tpu.memory_space<vmem>>, %arg18: memref<1x32xf32, #tpu.memory_space<vmem>>, %arg19: memref<1x32xf32, #tpu.memory_space<vmem>>, %arg20: memref<1x32xf32, #tpu.memory_space<vmem>>, %arg21: memref<1x32xf32, #tpu.memory_space<vmem>>, %arg22: memref<1x32xf32, #tpu.memory_space<vmem>>, %arg23: memref<1x32xf32, #tpu.memory_space<vmem>>, %arg24: memref<1x32xf32, #tpu.memory_space<vmem>>, %arg25: memref<1x8x32xf32, #tpu.memory_space<vmem>>) attributes {dimension_semantics = [#tpu.dimension_semantics<parallel>], iteration_bounds = array<i64: 2>, scalar_prefetch = 0 : i64, scratch_operands = 0 : i64, tpu.core_type = #tpu.core_type<tc>, window_params = [{transform_indices = @transform_0, window_bounds = array<i64: 1, 8, 32>}, {transform_indices = @transform_1, window_bounds = array<i64: 1, 8, 32>}, {transform_indices = @transform_2, window_bounds = array<i64: 1, 8, 8>}, {transform_indices = @transform_3, window_bounds = array<i64: 1, 8, 8>}, {pipeline_mode = #tpu.pipeline_mode<synchronous>, transform_indices = @transform_4, window_bounds = array<i64: 32, 96>}, {pipeline_mode = #tpu.pipeline_mode<synchronous>, transform_indices = @transform_5, window_bounds = array<i64: 1, 96>}, {pipeline_mode = #tpu.pipeline_mode<synchronous>, transform_indices = @transform_6, window_bounds = array<i64: 32, 32>}, {pipeline_mode = #tpu.pipeline_mode<synchronous>, transform_indices = @transform_7, window_bounds = array<i64: 1, 32>}, {pipeline_mode = #tpu.pipeline_mode<synchronous>, transform_indices = @transform_8, window_bounds = array<i64: 32, 32>}, {pipeline_mode = #tpu.pipeline_mode<synchronous>, transform_indices = @transform_9, window_bounds = array<i64: 1, 32>}, {pipeline_mode = #tpu.pipeline_mode<synchronous>, transform_indices = @transform_10, window_bounds = array<i64: 32, 64>}, {pipeline_mode = #tpu.pipeline_mode<synchronous>, transform_indices = @transform_11, window_bounds = array<i64: 1, 64>}, {pipeline_mode = #tpu.pipeline_mode<synchronous>, transform_indices = @transform_12, window_bounds = array<i64: 32, 32>}, {pipeline_mode = #tpu.pipeline_mode<synchronous>, transform_indices = @transform_13, window_bounds = array<i64: 1, 32>}, {pipeline_mode = #tpu.pipeline_mode<synchronous>, transform_indices = @transform_14, window_bounds = array<i64: 32, 64>}, {pipeline_mode = #tpu.pipeline_mode<synchronous>, transform_indices = @transform_15, window_bounds = array<i64: 1, 64>}, {pipeline_mode = #tpu.pipeline_mode<synchronous>, transform_indices = @transform_16, window_bounds = array<i64: 64, 32>}, {pipeline_mode = #tpu.pipeline_mode<synchronous>, transform_indices = @transform_17, window_bounds = array<i64: 1, 32>}, {pipeline_mode = #tpu.pipeline_mode<synchronous>, transform_indices = @transform_18, window_bounds = array<i64: 1, 32>}, {pipeline_mode = #tpu.pipeline_mode<synchronous>, transform_indices = @transform_19, window_bounds = array<i64: 1, 32>}, {pipeline_mode = #tpu.pipeline_mode<synchronous>, transform_indices = @transform_20, window_bounds = array<i64: 1, 32>}, {pipeline_mode = #tpu.pipeline_mode<synchronous>, transform_indices = @transform_21, window_bounds = array<i64: 1, 32>}, {pipeline_mode = #tpu.pipeline_mode<synchronous>, transform_indices = @transform_22, window_bounds = array<i64: 1, 32>}, {pipeline_mode = #tpu.pipeline_mode<synchronous>, transform_indices = @transform_23, window_bounds = array<i64: 1, 32>}, {transform_indices = @transform_24, window_bounds = array<i64: 1, 8, 32>}]} {
    %c0 = arith.constant 0 : index
    %c0_0 = arith.constant 0 : index
    %c0_1 = arith.constant 0 : index
    %0 = vector.load %arg1[%c0, %c0_0, %c0_1] : memref<1x8x32xf32, #tpu.memory_space<vmem>>, vector<1x8x32xf32>
    %1 = vector.shape_cast %0 : vector<1x8x32xf32> to vector<8x32xf32>
    %c0_2 = arith.constant 0 : index
    %c0_3 = arith.constant 0 : index
    %c0_4 = arith.constant 0 : index
    %2 = vector.load %arg2[%c0_2, %c0_3, %c0_4] : memref<1x8x32xf32, #tpu.memory_space<vmem>>, vector<1x8x32xf32>
    %3 = vector.shape_cast %2 : vector<1x8x32xf32> to vector<8x32xf32>
    %c0_5 = arith.constant 0 : index
    %c0_6 = arith.constant 0 : index
    %c0_7 = arith.constant 0 : index
    %4 = vector.load %arg3[%c0_5, %c0_6, %c0_7] : memref<1x8x8xf32, #tpu.memory_space<vmem>>, vector<1x8x8xf32>
    %5 = vector.shape_cast %4 : vector<1x8x8xf32> to vector<8x8xf32>
    %c0_8 = arith.constant 0 : index
    %c0_9 = arith.constant 0 : index
    %c0_10 = arith.constant 0 : index
    %6 = vector.load %arg4[%c0_8, %c0_9, %c0_10] : memref<1x8x8xf32, #tpu.memory_space<vmem>>, vector<1x8x8xf32>
    %7 = vector.shape_cast %6 : vector<1x8x8xf32> to vector<8x8xf32>
    %c0_11 = arith.constant 0 : index
    %c0_12 = arith.constant 0 : index
    %8 = vector.load %arg5[%c0_11, %c0_12] : memref<32x96xf32, #tpu.memory_space<vmem>>, vector<32x96xf32>
    %cst = arith.constant dense<0.000000e+00> : vector<8x96xf32>
    %9 = tpu.matmul %1, %8, %cst {dimension_numbers = #tpu.dot_dimension_numbers<[1], [0], [0], [1], [0, 0, 1, 1], [], []>} : vector<8x32xf32>, vector<32x96xf32>, vector<8x96xf32> -> vector<8x96xf32>
    %c0_13 = arith.constant 0 : index
    %c0_14 = arith.constant 0 : index
    %10 = vector.load %arg6[%c0_13, %c0_14] : memref<1x96xf32, #tpu.memory_space<vmem>>, vector<1x96xf32>
    %11 = vector.broadcast %10 : vector<1x96xf32> to vector<8x96xf32>
    %12 = arith.addf %9, %11 : vector<8x96xf32>
    %13 = vector.extract_strided_slice %12 {offsets = [0, 0], sizes = [8, 32], strides = [1, 1]} : vector<8x96xf32> to vector<8x32xf32>
    %14 = vector.extract_strided_slice %12 {offsets = [0, 32], sizes = [8, 32], strides = [1, 1]} : vector<8x96xf32> to vector<8x32xf32>
    %15 = vector.extract_strided_slice %12 {offsets = [0, 64], sizes = [8, 32], strides = [1, 1]} : vector<8x96xf32> to vector<8x32xf32>
    %c0_15 = arith.constant 0 : index
    %c0_16 = arith.constant 0 : index
    %16 = vector.load %arg7[%c0_15, %c0_16] : memref<32x32xf32, #tpu.memory_space<vmem>>, vector<32x32xf32>
    %c0_17 = arith.constant 0 : index
    %c0_18 = arith.constant 0 : index
    %17 = vector.load %arg8[%c0_17, %c0_18] : memref<1x32xf32, #tpu.memory_space<vmem>>, vector<1x32xf32>
    %cst_19 = arith.constant 0.000000e+00 : f32
    %18 = vector.broadcast %cst_19 : f32 to vector<8x32xf32>
    %19 = vector.extract_strided_slice %13 {offsets = [0, 0], sizes = [8, 8], strides = [1, 1]} : vector<8x32xf32> to vector<8x8xf32>
    %cst_20 = arith.constant 0.353553385 : f32
    %20 = vector.broadcast %cst_20 : f32 to vector<8x8xf32>
    %21 = arith.mulf %19, %20 : vector<8x8xf32>
    %22 = vector.extract_strided_slice %14 {offsets = [0, 0], sizes = [8, 8], strides = [1, 1]} : vector<8x32xf32> to vector<8x8xf32>
    %23 = vector.extract_strided_slice %15 {offsets = [0, 0], sizes = [8, 8], strides = [1, 1]} : vector<8x32xf32> to vector<8x8xf32>
    %cst_21 = arith.constant dense<0.000000e+00> : vector<8x8xf32>
    %24 = tpu.matmul %21, %22, %cst_21 {dimension_numbers = #tpu.dot_dimension_numbers<[1], [1], [0], [0], [0, 0, 1, 0], [], []>} : vector<8x8xf32>, vector<8x8xf32>, vector<8x8xf32> -> vector<8x8xf32>
    %25 = arith.addf %24, %5 : vector<8x8xf32>
    %cst_22 = arith.constant dense<0xFF800000> : vector<8xf32>
    %26 = vector.multi_reduction <maximumf>, %25, %cst_22 [1] : vector<8x8xf32> to vector<8xf32>
    %27 = vector.shape_cast %26 : vector<8xf32> to vector<8x1xf32>
    %28 = vector.broadcast %27 : vector<8x1xf32> to vector<8x8xf32>
    %29 = arith.subf %25, %28 : vector<8x8xf32>
    %30 = math.exp %29 : vector<8x8xf32>
    %cst_23 = arith.constant dense<0.000000e+00> : vector<8xf32>
    %31 = vector.multi_reduction <add>, %30, %cst_23 [1] : vector<8x8xf32> to vector<8xf32>
    %32 = vector.shape_cast %31 : vector<8xf32> to vector<8x1xf32>
    %33 = tpu.reciprocal %32 {approx = true} : vector<8x1xf32> -> vector<8x1xf32>
    %34 = vector.broadcast %33 : vector<8x1xf32> to vector<8x8xf32>
    %35 = arith.mulf %30, %34 : vector<8x8xf32>
    %cst_24 = arith.constant dense<0.000000e+00> : vector<8x8xf32>
    %36 = tpu.matmul %35, %23, %cst_24 {dimension_numbers = #tpu.dot_dimension_numbers<[1], [0], [0], [1], [0, 0, 1, 1], [], []>} : vector<8x8xf32>, vector<8x8xf32>, vector<8x8xf32> -> vector<8x8xf32>
    %37 = vector.extract_strided_slice %16 {offsets = [0, 0], sizes = [8, 32], strides = [1, 1]} : vector<32x32xf32> to vector<8x32xf32>
    %cst_25 = arith.constant dense<0.000000e+00> : vector<8x32xf32>
    %38 = tpu.matmul %36, %37, %cst_25 {dimension_numbers = #tpu.dot_dimension_numbers<[1], [0], [0], [1], [0, 0, 1, 1], [], []>} : vector<8x8xf32>, vector<8x32xf32>, vector<8x32xf32> -> vector<8x32xf32>
    %39 = arith.addf %18, %38 : vector<8x32xf32>
    %40 = vector.extract_strided_slice %13 {offsets = [0, 8], sizes = [8, 8], strides = [1, 1]} : vector<8x32xf32> to vector<8x8xf32>
    %cst_26 = arith.constant 0.353553385 : f32
    %41 = vector.broadcast %cst_26 : f32 to vector<8x8xf32>
    %42 = arith.mulf %40, %41 : vector<8x8xf32>
    %43 = vector.extract_strided_slice %14 {offsets = [0, 8], sizes = [8, 8], strides = [1, 1]} : vector<8x32xf32> to vector<8x8xf32>
    %44 = vector.extract_strided_slice %15 {offsets = [0, 8], sizes = [8, 8], strides = [1, 1]} : vector<8x32xf32> to vector<8x8xf32>
    %cst_27 = arith.constant dense<0.000000e+00> : vector<8x8xf32>
    %45 = tpu.matmul %42, %43, %cst_27 {dimension_numbers = #tpu.dot_dimension_numbers<[1], [1], [0], [0], [0, 0, 1, 0], [], []>} : vector<8x8xf32>, vector<8x8xf32>, vector<8x8xf32> -> vector<8x8xf32>
    %46 = arith.addf %45, %5 : vector<8x8xf32>
    %cst_28 = arith.constant dense<0xFF800000> : vector<8xf32>
    %47 = vector.multi_reduction <maximumf>, %46, %cst_28 [1] : vector<8x8xf32> to vector<8xf32>
    %48 = vector.shape_cast %47 : vector<8xf32> to vector<8x1xf32>
    %49 = vector.broadcast %48 : vector<8x1xf32> to vector<8x8xf32>
    %50 = arith.subf %46, %49 : vector<8x8xf32>
    %51 = math.exp %50 : vector<8x8xf32>
    %cst_29 = arith.constant dense<0.000000e+00> : vector<8xf32>
    %52 = vector.multi_reduction <add>, %51, %cst_29 [1] : vector<8x8xf32> to vector<8xf32>
    %53 = vector.shape_cast %52 : vector<8xf32> to vector<8x1xf32>
    %54 = tpu.reciprocal %53 {approx = true} : vector<8x1xf32> -> vector<8x1xf32>
    %55 = vector.broadcast %54 : vector<8x1xf32> to vector<8x8xf32>
    %56 = arith.mulf %51, %55 : vector<8x8xf32>
    %cst_30 = arith.constant dense<0.000000e+00> : vector<8x8xf32>
    %57 = tpu.matmul %56, %44, %cst_30 {dimension_numbers = #tpu.dot_dimension_numbers<[1], [0], [0], [1], [0, 0, 1, 1], [], []>} : vector<8x8xf32>, vector<8x8xf32>, vector<8x8xf32> -> vector<8x8xf32>
    %58 = vector.extract_strided_slice %16 {offsets = [8, 0], sizes = [8, 32], strides = [1, 1]} : vector<32x32xf32> to vector<8x32xf32>
    %cst_31 = arith.constant dense<0.000000e+00> : vector<8x32xf32>
    %59 = tpu.matmul %57, %58, %cst_31 {dimension_numbers = #tpu.dot_dimension_numbers<[1], [0], [0], [1], [0, 0, 1, 1], [], []>} : vector<8x8xf32>, vector<8x32xf32>, vector<8x32xf32> -> vector<8x32xf32>
    %60 = arith.addf %39, %59 : vector<8x32xf32>
    %61 = vector.extract_strided_slice %13 {offsets = [0, 16], sizes = [8, 8], strides = [1, 1]} : vector<8x32xf32> to vector<8x8xf32>
    %cst_32 = arith.constant 0.353553385 : f32
    %62 = vector.broadcast %cst_32 : f32 to vector<8x8xf32>
    %63 = arith.mulf %61, %62 : vector<8x8xf32>
    %64 = vector.extract_strided_slice %14 {offsets = [0, 16], sizes = [8, 8], strides = [1, 1]} : vector<8x32xf32> to vector<8x8xf32>
    %65 = vector.extract_strided_slice %15 {offsets = [0, 16], sizes = [8, 8], strides = [1, 1]} : vector<8x32xf32> to vector<8x8xf32>
    %cst_33 = arith.constant dense<0.000000e+00> : vector<8x8xf32>
    %66 = tpu.matmul %63, %64, %cst_33 {dimension_numbers = #tpu.dot_dimension_numbers<[1], [1], [0], [0], [0, 0, 1, 0], [], []>} : vector<8x8xf32>, vector<8x8xf32>, vector<8x8xf32> -> vector<8x8xf32>
    %67 = arith.addf %66, %5 : vector<8x8xf32>
    %cst_34 = arith.constant dense<0xFF800000> : vector<8xf32>
    %68 = vector.multi_reduction <maximumf>, %67, %cst_34 [1] : vector<8x8xf32> to vector<8xf32>
    %69 = vector.shape_cast %68 : vector<8xf32> to vector<8x1xf32>
    %70 = vector.broadcast %69 : vector<8x1xf32> to vector<8x8xf32>
    %71 = arith.subf %67, %70 : vector<8x8xf32>
    %72 = math.exp %71 : vector<8x8xf32>
    %cst_35 = arith.constant dense<0.000000e+00> : vector<8xf32>
    %73 = vector.multi_reduction <add>, %72, %cst_35 [1] : vector<8x8xf32> to vector<8xf32>
    %74 = vector.shape_cast %73 : vector<8xf32> to vector<8x1xf32>
    %75 = tpu.reciprocal %74 {approx = true} : vector<8x1xf32> -> vector<8x1xf32>
    %76 = vector.broadcast %75 : vector<8x1xf32> to vector<8x8xf32>
    %77 = arith.mulf %72, %76 : vector<8x8xf32>
    %cst_36 = arith.constant dense<0.000000e+00> : vector<8x8xf32>
    %78 = tpu.matmul %77, %65, %cst_36 {dimension_numbers = #tpu.dot_dimension_numbers<[1], [0], [0], [1], [0, 0, 1, 1], [], []>} : vector<8x8xf32>, vector<8x8xf32>, vector<8x8xf32> -> vector<8x8xf32>
    %79 = vector.extract_strided_slice %16 {offsets = [16, 0], sizes = [8, 32], strides = [1, 1]} : vector<32x32xf32> to vector<8x32xf32>
    %cst_37 = arith.constant dense<0.000000e+00> : vector<8x32xf32>
    %80 = tpu.matmul %78, %79, %cst_37 {dimension_numbers = #tpu.dot_dimension_numbers<[1], [0], [0], [1], [0, 0, 1, 1], [], []>} : vector<8x8xf32>, vector<8x32xf32>, vector<8x32xf32> -> vector<8x32xf32>
    %81 = arith.addf %60, %80 : vector<8x32xf32>
    %82 = vector.extract_strided_slice %13 {offsets = [0, 24], sizes = [8, 8], strides = [1, 1]} : vector<8x32xf32> to vector<8x8xf32>
    %cst_38 = arith.constant 0.353553385 : f32
    %83 = vector.broadcast %cst_38 : f32 to vector<8x8xf32>
    %84 = arith.mulf %82, %83 : vector<8x8xf32>
    %85 = vector.extract_strided_slice %14 {offsets = [0, 24], sizes = [8, 8], strides = [1, 1]} : vector<8x32xf32> to vector<8x8xf32>
    %86 = vector.extract_strided_slice %15 {offsets = [0, 24], sizes = [8, 8], strides = [1, 1]} : vector<8x32xf32> to vector<8x8xf32>
    %cst_39 = arith.constant dense<0.000000e+00> : vector<8x8xf32>
    %87 = tpu.matmul %84, %85, %cst_39 {dimension_numbers = #tpu.dot_dimension_numbers<[1], [1], [0], [0], [0, 0, 1, 0], [], []>} : vector<8x8xf32>, vector<8x8xf32>, vector<8x8xf32> -> vector<8x8xf32>
    %88 = arith.addf %87, %5 : vector<8x8xf32>
    %cst_40 = arith.constant dense<0xFF800000> : vector<8xf32>
    %89 = vector.multi_reduction <maximumf>, %88, %cst_40 [1] : vector<8x8xf32> to vector<8xf32>
    %90 = vector.shape_cast %89 : vector<8xf32> to vector<8x1xf32>
    %91 = vector.broadcast %90 : vector<8x1xf32> to vector<8x8xf32>
    %92 = arith.subf %88, %91 : vector<8x8xf32>
    %93 = math.exp %92 : vector<8x8xf32>
    %cst_41 = arith.constant dense<0.000000e+00> : vector<8xf32>
    %94 = vector.multi_reduction <add>, %93, %cst_41 [1] : vector<8x8xf32> to vector<8xf32>
    %95 = vector.shape_cast %94 : vector<8xf32> to vector<8x1xf32>
    %96 = tpu.reciprocal %95 {approx = true} : vector<8x1xf32> -> vector<8x1xf32>
    %97 = vector.broadcast %96 : vector<8x1xf32> to vector<8x8xf32>
    %98 = arith.mulf %93, %97 : vector<8x8xf32>
    %cst_42 = arith.constant dense<0.000000e+00> : vector<8x8xf32>
    %99 = tpu.matmul %98, %86, %cst_42 {dimension_numbers = #tpu.dot_dimension_numbers<[1], [0], [0], [1], [0, 0, 1, 1], [], []>} : vector<8x8xf32>, vector<8x8xf32>, vector<8x8xf32> -> vector<8x8xf32>
    %100 = vector.extract_strided_slice %16 {offsets = [24, 0], sizes = [8, 32], strides = [1, 1]} : vector<32x32xf32> to vector<8x32xf32>
    %cst_43 = arith.constant dense<0.000000e+00> : vector<8x32xf32>
    %101 = tpu.matmul %99, %100, %cst_43 {dimension_numbers = #tpu.dot_dimension_numbers<[1], [0], [0], [1], [0, 0, 1, 1], [], []>} : vector<8x8xf32>, vector<8x32xf32>, vector<8x32xf32> -> vector<8x32xf32>
    %102 = arith.addf %81, %101 : vector<8x32xf32>
    %103 = vector.broadcast %17 : vector<1x32xf32> to vector<8x32xf32>
    %104 = arith.addf %102, %103 : vector<8x32xf32>
    %105 = arith.addf %1, %104 : vector<8x32xf32>
    %c0_44 = arith.constant 0 : index
    %c0_45 = arith.constant 0 : index
    %106 = vector.load %arg19[%c0_44, %c0_45] : memref<1x32xf32, #tpu.memory_space<vmem>>, vector<1x32xf32>
    %c0_46 = arith.constant 0 : index
    %c0_47 = arith.constant 0 : index
    %107 = vector.load %arg20[%c0_46, %c0_47] : memref<1x32xf32, #tpu.memory_space<vmem>>, vector<1x32xf32>
    %cst_48 = arith.constant dense<0.000000e+00> : vector<8xf32>
    %108 = vector.multi_reduction <add>, %105, %cst_48 [1] : vector<8x32xf32> to vector<8xf32>
    %109 = vector.shape_cast %108 : vector<8xf32> to vector<8x1xf32>
    %cst_49 = arith.constant 3.200000e+01 : f32
    %110 = vector.broadcast %cst_49 : f32 to vector<8x1xf32>
    %111 = arith.divf %109, %110 : vector<8x1xf32>
    %112 = vector.broadcast %111 : vector<8x1xf32> to vector<8x32xf32>
    %113 = arith.subf %105, %112 : vector<8x32xf32>
    %114 = arith.mulf %113, %113 : vector<8x32xf32>
    %cst_50 = arith.constant dense<0.000000e+00> : vector<8xf32>
    %115 = vector.multi_reduction <add>, %114, %cst_50 [1] : vector<8x32xf32> to vector<8xf32>
    %116 = vector.shape_cast %115 : vector<8xf32> to vector<8x1xf32>
    %cst_51 = arith.constant 3.200000e+01 : f32
    %117 = vector.broadcast %cst_51 : f32 to vector<8x1xf32>
    %118 = arith.divf %116, %117 : vector<8x1xf32>
    %119 = vector.broadcast %111 : vector<8x1xf32> to vector<8x32xf32>
    %120 = arith.subf %105, %119 : vector<8x32xf32>
    %cst_52 = arith.constant 9.99999974E-6 : f32
    %121 = vector.broadcast %cst_52 : f32 to vector<8x1xf32>
    %122 = arith.addf %118, %121 : vector<8x1xf32>
    %123 = math.rsqrt %122 : vector<8x1xf32>
    %124 = vector.broadcast %123 : vector<8x1xf32> to vector<8x32xf32>
    %125 = arith.mulf %120, %124 : vector<8x32xf32>
    %126 = vector.broadcast %106 : vector<1x32xf32> to vector<8x32xf32>
    %127 = arith.mulf %125, %126 : vector<8x32xf32>
    %128 = vector.broadcast %107 : vector<1x32xf32> to vector<8x32xf32>
    %129 = arith.addf %127, %128 : vector<8x32xf32>
    %c0_53 = arith.constant 0 : index
    %c0_54 = arith.constant 0 : index
    %130 = vector.load %arg9[%c0_53, %c0_54] : memref<32x32xf32, #tpu.memory_space<vmem>>, vector<32x32xf32>
    %cst_55 = arith.constant dense<0.000000e+00> : vector<8x32xf32>
    %131 = tpu.matmul %129, %130, %cst_55 {dimension_numbers = #tpu.dot_dimension_numbers<[1], [0], [0], [1], [0, 0, 1, 1], [], []>} : vector<8x32xf32>, vector<32x32xf32>, vector<8x32xf32> -> vector<8x32xf32>
    %c0_56 = arith.constant 0 : index
    %c0_57 = arith.constant 0 : index
    %132 = vector.load %arg10[%c0_56, %c0_57] : memref<1x32xf32, #tpu.memory_space<vmem>>, vector<1x32xf32>
    %133 = vector.broadcast %132 : vector<1x32xf32> to vector<8x32xf32>
    %134 = arith.addf %131, %133 : vector<8x32xf32>
    %c0_58 = arith.constant 0 : index
    %c0_59 = arith.constant 0 : index
    %135 = vector.load %arg11[%c0_58, %c0_59] : memref<32x64xf32, #tpu.memory_space<vmem>>, vector<32x64xf32>
    %cst_60 = arith.constant dense<0.000000e+00> : vector<8x64xf32>
    %136 = tpu.matmul %3, %135, %cst_60 {dimension_numbers = #tpu.dot_dimension_numbers<[1], [0], [0], [1], [0, 0, 1, 1], [], []>} : vector<8x32xf32>, vector<32x64xf32>, vector<8x64xf32> -> vector<8x64xf32>
    %c0_61 = arith.constant 0 : index
    %c0_62 = arith.constant 0 : index
    %137 = vector.load %arg12[%c0_61, %c0_62] : memref<1x64xf32, #tpu.memory_space<vmem>>, vector<1x64xf32>
    %138 = vector.broadcast %137 : vector<1x64xf32> to vector<8x64xf32>
    %139 = arith.addf %136, %138 : vector<8x64xf32>
    %140 = vector.extract_strided_slice %139 {offsets = [0, 0], sizes = [8, 32], strides = [1, 1]} : vector<8x64xf32> to vector<8x32xf32>
    %141 = vector.extract_strided_slice %139 {offsets = [0, 32], sizes = [8, 32], strides = [1, 1]} : vector<8x64xf32> to vector<8x32xf32>
    %c0_63 = arith.constant 0 : index
    %c0_64 = arith.constant 0 : index
    %142 = vector.load %arg13[%c0_63, %c0_64] : memref<32x32xf32, #tpu.memory_space<vmem>>, vector<32x32xf32>
    %c0_65 = arith.constant 0 : index
    %c0_66 = arith.constant 0 : index
    %143 = vector.load %arg14[%c0_65, %c0_66] : memref<1x32xf32, #tpu.memory_space<vmem>>, vector<1x32xf32>
    %cst_67 = arith.constant 0.000000e+00 : f32
    %144 = vector.broadcast %cst_67 : f32 to vector<8x32xf32>
    %145 = vector.extract_strided_slice %134 {offsets = [0, 0], sizes = [8, 8], strides = [1, 1]} : vector<8x32xf32> to vector<8x8xf32>
    %cst_68 = arith.constant 0.353553385 : f32
    %146 = vector.broadcast %cst_68 : f32 to vector<8x8xf32>
    %147 = arith.mulf %145, %146 : vector<8x8xf32>
    %148 = vector.extract_strided_slice %140 {offsets = [0, 0], sizes = [8, 8], strides = [1, 1]} : vector<8x32xf32> to vector<8x8xf32>
    %149 = vector.extract_strided_slice %141 {offsets = [0, 0], sizes = [8, 8], strides = [1, 1]} : vector<8x32xf32> to vector<8x8xf32>
    %cst_69 = arith.constant dense<0.000000e+00> : vector<8x8xf32>
    %150 = tpu.matmul %147, %148, %cst_69 {dimension_numbers = #tpu.dot_dimension_numbers<[1], [1], [0], [0], [0, 0, 1, 0], [], []>} : vector<8x8xf32>, vector<8x8xf32>, vector<8x8xf32> -> vector<8x8xf32>
    %151 = arith.addf %150, %7 : vector<8x8xf32>
    %cst_70 = arith.constant dense<0xFF800000> : vector<8xf32>
    %152 = vector.multi_reduction <maximumf>, %151, %cst_70 [1] : vector<8x8xf32> to vector<8xf32>
    %153 = vector.shape_cast %152 : vector<8xf32> to vector<8x1xf32>
    %154 = vector.broadcast %153 : vector<8x1xf32> to vector<8x8xf32>
    %155 = arith.subf %151, %154 : vector<8x8xf32>
    %156 = math.exp %155 : vector<8x8xf32>
    %cst_71 = arith.constant dense<0.000000e+00> : vector<8xf32>
    %157 = vector.multi_reduction <add>, %156, %cst_71 [1] : vector<8x8xf32> to vector<8xf32>
    %158 = vector.shape_cast %157 : vector<8xf32> to vector<8x1xf32>
    %159 = tpu.reciprocal %158 {approx = true} : vector<8x1xf32> -> vector<8x1xf32>
    %160 = vector.broadcast %159 : vector<8x1xf32> to vector<8x8xf32>
    %161 = arith.mulf %156, %160 : vector<8x8xf32>
    %cst_72 = arith.constant dense<0.000000e+00> : vector<8x8xf32>
    %162 = tpu.matmul %161, %149, %cst_72 {dimension_numbers = #tpu.dot_dimension_numbers<[1], [0], [0], [1], [0, 0, 1, 1], [], []>} : vector<8x8xf32>, vector<8x8xf32>, vector<8x8xf32> -> vector<8x8xf32>
    %163 = vector.extract_strided_slice %142 {offsets = [0, 0], sizes = [8, 32], strides = [1, 1]} : vector<32x32xf32> to vector<8x32xf32>
    %cst_73 = arith.constant dense<0.000000e+00> : vector<8x32xf32>
    %164 = tpu.matmul %162, %163, %cst_73 {dimension_numbers = #tpu.dot_dimension_numbers<[1], [0], [0], [1], [0, 0, 1, 1], [], []>} : vector<8x8xf32>, vector<8x32xf32>, vector<8x32xf32> -> vector<8x32xf32>
    %165 = arith.addf %144, %164 : vector<8x32xf32>
    %166 = vector.extract_strided_slice %134 {offsets = [0, 8], sizes = [8, 8], strides = [1, 1]} : vector<8x32xf32> to vector<8x8xf32>
    %cst_74 = arith.constant 0.353553385 : f32
    %167 = vector.broadcast %cst_74 : f32 to vector<8x8xf32>
    %168 = arith.mulf %166, %167 : vector<8x8xf32>
    %169 = vector.extract_strided_slice %140 {offsets = [0, 8], sizes = [8, 8], strides = [1, 1]} : vector<8x32xf32> to vector<8x8xf32>
    %170 = vector.extract_strided_slice %141 {offsets = [0, 8], sizes = [8, 8], strides = [1, 1]} : vector<8x32xf32> to vector<8x8xf32>
    %cst_75 = arith.constant dense<0.000000e+00> : vector<8x8xf32>
    %171 = tpu.matmul %168, %169, %cst_75 {dimension_numbers = #tpu.dot_dimension_numbers<[1], [1], [0], [0], [0, 0, 1, 0], [], []>} : vector<8x8xf32>, vector<8x8xf32>, vector<8x8xf32> -> vector<8x8xf32>
    %172 = arith.addf %171, %7 : vector<8x8xf32>
    %cst_76 = arith.constant dense<0xFF800000> : vector<8xf32>
    %173 = vector.multi_reduction <maximumf>, %172, %cst_76 [1] : vector<8x8xf32> to vector<8xf32>
    %174 = vector.shape_cast %173 : vector<8xf32> to vector<8x1xf32>
    %175 = vector.broadcast %174 : vector<8x1xf32> to vector<8x8xf32>
    %176 = arith.subf %172, %175 : vector<8x8xf32>
    %177 = math.exp %176 : vector<8x8xf32>
    %cst_77 = arith.constant dense<0.000000e+00> : vector<8xf32>
    %178 = vector.multi_reduction <add>, %177, %cst_77 [1] : vector<8x8xf32> to vector<8xf32>
    %179 = vector.shape_cast %178 : vector<8xf32> to vector<8x1xf32>
    %180 = tpu.reciprocal %179 {approx = true} : vector<8x1xf32> -> vector<8x1xf32>
    %181 = vector.broadcast %180 : vector<8x1xf32> to vector<8x8xf32>
    %182 = arith.mulf %177, %181 : vector<8x8xf32>
    %cst_78 = arith.constant dense<0.000000e+00> : vector<8x8xf32>
    %183 = tpu.matmul %182, %170, %cst_78 {dimension_numbers = #tpu.dot_dimension_numbers<[1], [0], [0], [1], [0, 0, 1, 1], [], []>} : vector<8x8xf32>, vector<8x8xf32>, vector<8x8xf32> -> vector<8x8xf32>
    %184 = vector.extract_strided_slice %142 {offsets = [8, 0], sizes = [8, 32], strides = [1, 1]} : vector<32x32xf32> to vector<8x32xf32>
    %cst_79 = arith.constant dense<0.000000e+00> : vector<8x32xf32>
    %185 = tpu.matmul %183, %184, %cst_79 {dimension_numbers = #tpu.dot_dimension_numbers<[1], [0], [0], [1], [0, 0, 1, 1], [], []>} : vector<8x8xf32>, vector<8x32xf32>, vector<8x32xf32> -> vector<8x32xf32>
    %186 = arith.addf %165, %185 : vector<8x32xf32>
    %187 = vector.extract_strided_slice %134 {offsets = [0, 16], sizes = [8, 8], strides = [1, 1]} : vector<8x32xf32> to vector<8x8xf32>
    %cst_80 = arith.constant 0.353553385 : f32
    %188 = vector.broadcast %cst_80 : f32 to vector<8x8xf32>
    %189 = arith.mulf %187, %188 : vector<8x8xf32>
    %190 = vector.extract_strided_slice %140 {offsets = [0, 16], sizes = [8, 8], strides = [1, 1]} : vector<8x32xf32> to vector<8x8xf32>
    %191 = vector.extract_strided_slice %141 {offsets = [0, 16], sizes = [8, 8], strides = [1, 1]} : vector<8x32xf32> to vector<8x8xf32>
    %cst_81 = arith.constant dense<0.000000e+00> : vector<8x8xf32>
    %192 = tpu.matmul %189, %190, %cst_81 {dimension_numbers = #tpu.dot_dimension_numbers<[1], [1], [0], [0], [0, 0, 1, 0], [], []>} : vector<8x8xf32>, vector<8x8xf32>, vector<8x8xf32> -> vector<8x8xf32>
    %193 = arith.addf %192, %7 : vector<8x8xf32>
    %cst_82 = arith.constant dense<0xFF800000> : vector<8xf32>
    %194 = vector.multi_reduction <maximumf>, %193, %cst_82 [1] : vector<8x8xf32> to vector<8xf32>
    %195 = vector.shape_cast %194 : vector<8xf32> to vector<8x1xf32>
    %196 = vector.broadcast %195 : vector<8x1xf32> to vector<8x8xf32>
    %197 = arith.subf %193, %196 : vector<8x8xf32>
    %198 = math.exp %197 : vector<8x8xf32>
    %cst_83 = arith.constant dense<0.000000e+00> : vector<8xf32>
    %199 = vector.multi_reduction <add>, %198, %cst_83 [1] : vector<8x8xf32> to vector<8xf32>
    %200 = vector.shape_cast %199 : vector<8xf32> to vector<8x1xf32>
    %201 = tpu.reciprocal %200 {approx = true} : vector<8x1xf32> -> vector<8x1xf32>
    %202 = vector.broadcast %201 : vector<8x1xf32> to vector<8x8xf32>
    %203 = arith.mulf %198, %202 : vector<8x8xf32>
    %cst_84 = arith.constant dense<0.000000e+00> : vector<8x8xf32>
    %204 = tpu.matmul %203, %191, %cst_84 {dimension_numbers = #tpu.dot_dimension_numbers<[1], [0], [0], [1], [0, 0, 1, 1], [], []>} : vector<8x8xf32>, vector<8x8xf32>, vector<8x8xf32> -> vector<8x8xf32>
    %205 = vector.extract_strided_slice %142 {offsets = [16, 0], sizes = [8, 32], strides = [1, 1]} : vector<32x32xf32> to vector<8x32xf32>
    %cst_85 = arith.constant dense<0.000000e+00> : vector<8x32xf32>
    %206 = tpu.matmul %204, %205, %cst_85 {dimension_numbers = #tpu.dot_dimension_numbers<[1], [0], [0], [1], [0, 0, 1, 1], [], []>} : vector<8x8xf32>, vector<8x32xf32>, vector<8x32xf32> -> vector<8x32xf32>
    %207 = arith.addf %186, %206 : vector<8x32xf32>
    %208 = vector.extract_strided_slice %134 {offsets = [0, 24], sizes = [8, 8], strides = [1, 1]} : vector<8x32xf32> to vector<8x8xf32>
    %cst_86 = arith.constant 0.353553385 : f32
    %209 = vector.broadcast %cst_86 : f32 to vector<8x8xf32>
    %210 = arith.mulf %208, %209 : vector<8x8xf32>
    %211 = vector.extract_strided_slice %140 {offsets = [0, 24], sizes = [8, 8], strides = [1, 1]} : vector<8x32xf32> to vector<8x8xf32>
    %212 = vector.extract_strided_slice %141 {offsets = [0, 24], sizes = [8, 8], strides = [1, 1]} : vector<8x32xf32> to vector<8x8xf32>
    %cst_87 = arith.constant dense<0.000000e+00> : vector<8x8xf32>
    %213 = tpu.matmul %210, %211, %cst_87 {dimension_numbers = #tpu.dot_dimension_numbers<[1], [1], [0], [0], [0, 0, 1, 0], [], []>} : vector<8x8xf32>, vector<8x8xf32>, vector<8x8xf32> -> vector<8x8xf32>
    %214 = arith.addf %213, %7 : vector<8x8xf32>
    %cst_88 = arith.constant dense<0xFF800000> : vector<8xf32>
    %215 = vector.multi_reduction <maximumf>, %214, %cst_88 [1] : vector<8x8xf32> to vector<8xf32>
    %216 = vector.shape_cast %215 : vector<8xf32> to vector<8x1xf32>
    %217 = vector.broadcast %216 : vector<8x1xf32> to vector<8x8xf32>
    %218 = arith.subf %214, %217 : vector<8x8xf32>
    %219 = math.exp %218 : vector<8x8xf32>
    %cst_89 = arith.constant dense<0.000000e+00> : vector<8xf32>
    %220 = vector.multi_reduction <add>, %219, %cst_89 [1] : vector<8x8xf32> to vector<8xf32>
    %221 = vector.shape_cast %220 : vector<8xf32> to vector<8x1xf32>
    %222 = tpu.reciprocal %221 {approx = true} : vector<8x1xf32> -> vector<8x1xf32>
    %223 = vector.broadcast %222 : vector<8x1xf32> to vector<8x8xf32>
    %224 = arith.mulf %219, %223 : vector<8x8xf32>
    %cst_90 = arith.constant dense<0.000000e+00> : vector<8x8xf32>
    %225 = tpu.matmul %224, %212, %cst_90 {dimension_numbers = #tpu.dot_dimension_numbers<[1], [0], [0], [1], [0, 0, 1, 1], [], []>} : vector<8x8xf32>, vector<8x8xf32>, vector<8x8xf32> -> vector<8x8xf32>
    %226 = vector.extract_strided_slice %142 {offsets = [24, 0], sizes = [8, 32], strides = [1, 1]} : vector<32x32xf32> to vector<8x32xf32>
    %cst_91 = arith.constant dense<0.000000e+00> : vector<8x32xf32>
    %227 = tpu.matmul %225, %226, %cst_91 {dimension_numbers = #tpu.dot_dimension_numbers<[1], [0], [0], [1], [0, 0, 1, 1], [], []>} : vector<8x8xf32>, vector<8x32xf32>, vector<8x32xf32> -> vector<8x32xf32>
    %228 = arith.addf %207, %227 : vector<8x32xf32>
    %229 = vector.broadcast %143 : vector<1x32xf32> to vector<8x32xf32>
    %230 = arith.addf %228, %229 : vector<8x32xf32>
    %231 = arith.addf %129, %230 : vector<8x32xf32>
    %c0_92 = arith.constant 0 : index
    %c0_93 = arith.constant 0 : index
    %232 = vector.load %arg21[%c0_92, %c0_93] : memref<1x32xf32, #tpu.memory_space<vmem>>, vector<1x32xf32>
    %c0_94 = arith.constant 0 : index
    %c0_95 = arith.constant 0 : index
    %233 = vector.load %arg22[%c0_94, %c0_95] : memref<1x32xf32, #tpu.memory_space<vmem>>, vector<1x32xf32>
    %cst_96 = arith.constant dense<0.000000e+00> : vector<8xf32>
    %234 = vector.multi_reduction <add>, %231, %cst_96 [1] : vector<8x32xf32> to vector<8xf32>
    %235 = vector.shape_cast %234 : vector<8xf32> to vector<8x1xf32>
    %cst_97 = arith.constant 3.200000e+01 : f32
    %236 = vector.broadcast %cst_97 : f32 to vector<8x1xf32>
    %237 = arith.divf %235, %236 : vector<8x1xf32>
    %238 = vector.broadcast %237 : vector<8x1xf32> to vector<8x32xf32>
    %239 = arith.subf %231, %238 : vector<8x32xf32>
    %240 = arith.mulf %239, %239 : vector<8x32xf32>
    %cst_98 = arith.constant dense<0.000000e+00> : vector<8xf32>
    %241 = vector.multi_reduction <add>, %240, %cst_98 [1] : vector<8x32xf32> to vector<8xf32>
    %242 = vector.shape_cast %241 : vector<8xf32> to vector<8x1xf32>
    %cst_99 = arith.constant 3.200000e+01 : f32
    %243 = vector.broadcast %cst_99 : f32 to vector<8x1xf32>
    %244 = arith.divf %242, %243 : vector<8x1xf32>
    %245 = vector.broadcast %237 : vector<8x1xf32> to vector<8x32xf32>
    %246 = arith.subf %231, %245 : vector<8x32xf32>
    %cst_100 = arith.constant 9.99999974E-6 : f32
    %247 = vector.broadcast %cst_100 : f32 to vector<8x1xf32>
    %248 = arith.addf %244, %247 : vector<8x1xf32>
    %249 = math.rsqrt %248 : vector<8x1xf32>
    %250 = vector.broadcast %249 : vector<8x1xf32> to vector<8x32xf32>
    %251 = arith.mulf %246, %250 : vector<8x32xf32>
    %252 = vector.broadcast %232 : vector<1x32xf32> to vector<8x32xf32>
    %253 = arith.mulf %251, %252 : vector<8x32xf32>
    %254 = vector.broadcast %233 : vector<1x32xf32> to vector<8x32xf32>
    %255 = arith.addf %253, %254 : vector<8x32xf32>
    %c0_101 = arith.constant 0 : index
    %c0_102 = arith.constant 0 : index
    %256 = vector.load %arg15[%c0_101, %c0_102] : memref<32x64xf32, #tpu.memory_space<vmem>>, vector<32x64xf32>
    %cst_103 = arith.constant dense<0.000000e+00> : vector<8x64xf32>
    %257 = tpu.matmul %255, %256, %cst_103 {dimension_numbers = #tpu.dot_dimension_numbers<[1], [0], [0], [1], [0, 0, 1, 1], [], []>} : vector<8x32xf32>, vector<32x64xf32>, vector<8x64xf32> -> vector<8x64xf32>
    %c0_104 = arith.constant 0 : index
    %c0_105 = arith.constant 0 : index
    %258 = vector.load %arg16[%c0_104, %c0_105] : memref<1x64xf32, #tpu.memory_space<vmem>>, vector<1x64xf32>
    %259 = vector.broadcast %258 : vector<1x64xf32> to vector<8x64xf32>
    %260 = arith.addf %257, %259 : vector<8x64xf32>
    %cst_106 = arith.constant 0.000000e+00 : f32
    %261 = vector.broadcast %cst_106 : f32 to vector<8x64xf32>
    %262 = arith.maximumf %260, %261 : vector<8x64xf32>
    %c0_107 = arith.constant 0 : index
    %c0_108 = arith.constant 0 : index
    %263 = vector.load %arg17[%c0_107, %c0_108] : memref<64x32xf32, #tpu.memory_space<vmem>>, vector<64x32xf32>
    %cst_109 = arith.constant dense<0.000000e+00> : vector<8x32xf32>
    %264 = tpu.matmul %262, %263, %cst_109 {dimension_numbers = #tpu.dot_dimension_numbers<[1], [0], [0], [1], [0, 0, 1, 1], [], []>} : vector<8x64xf32>, vector<64x32xf32>, vector<8x32xf32> -> vector<8x32xf32>
    %c0_110 = arith.constant 0 : index
    %c0_111 = arith.constant 0 : index
    %265 = vector.load %arg18[%c0_110, %c0_111] : memref<1x32xf32, #tpu.memory_space<vmem>>, vector<1x32xf32>
    %266 = vector.broadcast %265 : vector<1x32xf32> to vector<8x32xf32>
    %267 = arith.addf %264, %266 : vector<8x32xf32>
    %268 = arith.addf %255, %267 : vector<8x32xf32>
    %c0_112 = arith.constant 0 : index
    %c0_113 = arith.constant 0 : index
    %269 = vector.load %arg23[%c0_112, %c0_113] : memref<1x32xf32, #tpu.memory_space<vmem>>, vector<1x32xf32>
    %c0_114 = arith.constant 0 : index
    %c0_115 = arith.constant 0 : index
    %270 = vector.load %arg24[%c0_114, %c0_115] : memref<1x32xf32, #tpu.memory_space<vmem>>, vector<1x32xf32>
    %cst_116 = arith.constant dense<0.000000e+00> : vector<8xf32>
    %271 = vector.multi_reduction <add>, %268, %cst_116 [1] : vector<8x32xf32> to vector<8xf32>
    %272 = vector.shape_cast %271 : vector<8xf32> to vector<8x1xf32>
    %cst_117 = arith.constant 3.200000e+01 : f32
    %273 = vector.broadcast %cst_117 : f32 to vector<8x1xf32>
    %274 = arith.divf %272, %273 : vector<8x1xf32>
    %275 = vector.broadcast %274 : vector<8x1xf32> to vector<8x32xf32>
    %276 = arith.subf %268, %275 : vector<8x32xf32>
    %277 = arith.mulf %276, %276 : vector<8x32xf32>
    %cst_118 = arith.constant dense<0.000000e+00> : vector<8xf32>
    %278 = vector.multi_reduction <add>, %277, %cst_118 [1] : vector<8x32xf32> to vector<8xf32>
    %279 = vector.shape_cast %278 : vector<8xf32> to vector<8x1xf32>
    %cst_119 = arith.constant 3.200000e+01 : f32
    %280 = vector.broadcast %cst_119 : f32 to vector<8x1xf32>
    %281 = arith.divf %279, %280 : vector<8x1xf32>
    %282 = vector.broadcast %274 : vector<8x1xf32> to vector<8x32xf32>
    %283 = arith.subf %268, %282 : vector<8x32xf32>
    %cst_120 = arith.constant 9.99999974E-6 : f32
    %284 = vector.broadcast %cst_120 : f32 to vector<8x1xf32>
    %285 = arith.addf %281, %284 : vector<8x1xf32>
    %286 = math.rsqrt %285 : vector<8x1xf32>
    %287 = vector.broadcast %286 : vector<8x1xf32> to vector<8x32xf32>
    %288 = arith.mulf %283, %287 : vector<8x32xf32>
    %289 = vector.broadcast %269 : vector<1x32xf32> to vector<8x32xf32>
    %290 = arith.mulf %288, %289 : vector<8x32xf32>
    %291 = vector.broadcast %270 : vector<1x32xf32> to vector<8x32xf32>
    %292 = arith.addf %290, %291 : vector<8x32xf32>
    %c0_121 = arith.constant 0 : index
    %c0_122 = arith.constant 0 : index
    %c0_123 = arith.constant 0 : index
    %293 = vector.load %arg25[%c0_121, %c0_122, %c0_123] : memref<1x8x32xf32, #tpu.memory_space<vmem>>, vector<1x8x32xf32>
    %294 = vector.shape_cast %293 : vector<1x8x32xf32> to vector<8x32xf32>
    %295 = vector.shape_cast %292 : vector<8x32xf32> to vector<1x8x32xf32>
    tpu.vector_store %arg25[%c0_121, %c0_122, %c0_123], %295 {strides = array<i32>} : memref<1x8x32xf32, #tpu.memory_space<vmem>>, vector<1x8x32xf32>,
    return
  }
  func.func @transform_0(%arg0: i32) -> (i32, i32, i32) {
    %c0_i32 = arith.constant 0 : i32
    %c0_i32_0 = arith.constant 0 : i32
    %c0_i32_1 = arith.constant 0 : i32
    return %arg0, %c0_i32, %c0_i32_0 : i32, i32, i32
  }
  func.func @transform_1(%arg0: i32) -> (i32, i32, i32) {
    %c0_i32 = arith.constant 0 : i32
    %c0_i32_0 = arith.constant 0 : i32
    %c0_i32_1 = arith.constant 0 : i32
    return %arg0, %c0_i32, %c0_i32_0 : i32, i32, i32
  }
  func.func @transform_2(%arg0: i32) -> (i32, i32, i32) {
    %c0_i32 = arith.constant 0 : i32
    %c0_i32_0 = arith.constant 0 : i32
    %c0_i32_1 = arith.constant 0 : i32
    return %arg0, %c0_i32, %c0_i32_0 : i32, i32, i32
  }
  func.func @transform_3(%arg0: i32) -> (i32, i32, i32) {
    %c0_i32 = arith.constant 0 : i32
    %c0_i32_0 = arith.constant 0 : i32
    %c0_i32_1 = arith.constant 0 : i32
    return %arg0, %c0_i32, %c0_i32_0 : i32, i32, i32
  }
  func.func @transform_4(%arg0: i32) -> (i32, i32) {
    %c0_i32 = arith.constant 0 : i32
    %c0_i32_0 = arith.constant 0 : i32
    %c0_i32_1 = arith.constant 0 : i32
    return %c0_i32, %c0_i32_0 : i32, i32
  }
  func.func @transform_5(%arg0: i32) -> (i32, i32) {
    %c0_i32 = arith.constant 0 : i32
    %c0_i32_0 = arith.constant 0 : i32
    %c0_i32_1 = arith.constant 0 : i32
    return %c0_i32, %c0_i32_0 : i32, i32
  }
  func.func @transform_6(%arg0: i32) -> (i32, i32) {
    %c0_i32 = arith.constant 0 : i32
    %c0_i32_0 = arith.constant 0 : i32
    %c0_i32_1 = arith.constant 0 : i32
    return %c0_i32, %c0_i32_0 : i32, i32
  }
  func.func @transform_7(%arg0: i32) -> (i32, i32) {
    %c0_i32 = arith.constant 0 : i32
    %c0_i32_0 = arith.constant 0 : i32
    %c0_i32_1 = arith.constant 0 : i32
    return %c0_i32, %c0_i32_0 : i32, i32
  }
  func.func @transform_8(%arg0: i32) -> (i32, i32) {
    %c0_i32 = arith.constant 0 : i32
    %c0_i32_0 = arith.constant 0 : i32
    %c0_i32_1 = arith.constant 0 : i32
    return %c0_i32, %c0_i32_0 : i32, i32
  }
  func.func @transform_9(%arg0: i32) -> (i32, i32) {
    %c0_i32 = arith.constant 0 : i32
    %c0_i32_0 = arith.constant 0 : i32
    %c0_i32_1 = arith.constant 0 : i32
    return %c0_i32, %c0_i32_0 : i32, i32
  }
  func.func @transform_10(%arg0: i32) -> (i32, i32) {
    %c0_i32 = arith.constant 0 : i32
    %c0_i32_0 = arith.constant 0 : i32
    %c0_i32_1 = arith.constant 0 : i32
    return %c0_i32, %c0_i32_0 : i32, i32
  }
  func.func @transform_11(%arg0: i32) -> (i32, i32) {
    %c0_i32 = arith.constant 0 : i32
    %c0_i32_0 = arith.constant 0 : i32
    %c0_i32_1 = arith.constant 0 : i32
    return %c0_i32, %c0_i32_0 : i32, i32
  }
  func.func @transform_12(%arg0: i32) -> (i32, i32) {
    %c0_i32 = arith.constant 0 : i32
    %c0_i32_0 = arith.constant 0 : i32
    %c0_i32_1 = arith.constant 0 : i32
    return %c0_i32, %c0_i32_0 : i32, i32
  }
  func.func @transform_13(%arg0: i32) -> (i32, i32) {
    %c0_i32 = arith.constant 0 : i32
    %c0_i32_0 = arith.constant 0 : i32
    %c0_i32_1 = arith.constant 0 : i32
    return %c0_i32, %c0_i32_0 : i32, i32
  }
  func.func @transform_14(%arg0: i32) -> (i32, i32) {
    %c0_i32 = arith.constant 0 : i32
    %c0_i32_0 = arith.constant 0 : i32
    %c0_i32_1 = arith.constant 0 : i32
    return %c0_i32, %c0_i32_0 : i32, i32
  }
  func.func @transform_15(%arg0: i32) -> (i32, i32) {
    %c0_i32 = arith.constant 0 : i32
    %c0_i32_0 = arith.constant 0 : i32
    %c0_i32_1 = arith.constant 0 : i32
    return %c0_i32, %c0_i32_0 : i32, i32
  }
  func.func @transform_16(%arg0: i32) -> (i32, i32) {
    %c0_i32 = arith.constant 0 : i32
    %c0_i32_0 = arith.constant 0 : i32
    %c0_i32_1 = arith.constant 0 : i32
    return %c0_i32, %c0_i32_0 : i32, i32
  }
  func.func @transform_17(%arg0: i32) -> (i32, i32) {
    %c0_i32 = arith.constant 0 : i32
    %c0_i32_0 = arith.constant 0 : i32
    %c0_i32_1 = arith.constant 0 : i32
    return %c0_i32, %c0_i32_0 : i32, i32
  }
  func.func @transform_18(%arg0: i32) -> (i32, i32) {
    %c0_i32 = arith.constant 0 : i32
    %c0_i32_0 = arith.constant 0 : i32
    %c0_i32_1 = arith.constant 0 : i32
    return %c0_i32, %c0_i32_0 : i32, i32
  }
  func.func @transform_19(%arg0: i32) -> (i32, i32) {
    %c0_i32 = arith.constant 0 : i32
    %c0_i32_0 = arith.constant 0 : i32
    %c0_i32_1 = arith.constant 0 : i32
    return %c0_i32, %c0_i32_0 : i32, i32
  }
  func.func @transform_20(%arg0: i32) -> (i32, i32) {
    %c0_i32 = arith.constant 0 : i32
    %c0_i32_0 = arith.constant 0 : i32
    %c0_i32_1 = arith.constant 0 : i32
    return %c0_i32, %c0_i32_0 : i32, i32
  }
  func.func @transform_21(%arg0: i32) -> (i32, i32) {
    %c0_i32 = arith.constant 0 : i32
    %c0_i32_0 = arith.constant 0 : i32
    %c0_i32_1 = arith.constant 0 : i32
    return %c0_i32, %c0_i32_0 : i32, i32
  }
  func.func @transform_22(%arg0: i32) -> (i32, i32) {
    %c0_i32 = arith.constant 0 : i32
    %c0_i32_0 = arith.constant 0 : i32
    %c0_i32_1 = arith.constant 0 : i32
    return %c0_i32, %c0_i32_0 : i32, i32
  }
  func.func @transform_23(%arg0: i32) -> (i32, i32) {
    %c0_i32 = arith.constant 0 : i32
    %c0_i32_0 = arith.constant 0 : i32
    %c0_i32_1 = arith.constant 0 : i32
    return %c0_i32, %c0_i32_0 : i32, i32
  }
  func.func @transform_24(%arg0: i32) -> (i32, i32, i32) {
    %c0_i32 = arith.constant 0 : i32
    %c0_i32_0 = arith.constant 0 : i32
    %c0_i32_1 = arith.constant 0 : i32
    return %arg0, %c0_i32, %c0_i32_0 : i32, i32, i32
  }
}

module attributes {stable_mosaic.version = 11 : i64} {
  func.func @_decoder_layer_kernel(%arg0: i32, %arg1: memref<1x8x32xf32, #tpu.memory_space<vmem>>, %arg2: memref<1x8x32xf32, #tpu.memory_space<vmem>>, %arg3: memref<1x8x8xf32, #tpu.memory_space<vmem>>, %arg4: memref<1x8x8xf32, #tpu.memory_space<vmem>>, %arg5: memref<32x96xf32, #tpu.memory_space<vmem>>, %arg6: memref<1x96xf32, #tpu.memory_space<vmem>>, %arg7: memref<32x32xf32, #tpu.memory_space<vmem>>, %arg8: memref<1x32xf32, #tpu.memory_space<vmem>>, %arg9: memref<32x32xf32, #tpu.memory_space<vmem>>, %arg10: memref<1x32xf32, #tpu.memory_space<vmem>>, %arg11: memref<32x64xf32, #tpu.memory_space<vmem>>, %arg12: memref<1x64xf32, #tpu.memory_space<vmem>>, %arg13: memref<32x32xf32, #tpu.memory_space<vmem>>, %arg14: memref<1x32xf32, #tpu.memory_space<vmem>>, %arg15: memref<32x64xf32, #tpu.memory_space<vmem>>, %arg16: memref<1x64xf32, #tpu.memory_space<vmem>>, %arg17: memref<64x32xf32, #tpu.memory_space<vmem>>, %arg18: memref<1x32xf32, #tpu.memory_space<vmem>>, %arg19: memref<1x32xf32, #tpu.memory_space<vmem>>, %arg20: memref<1x32xf32, #tpu.memory_space<vmem>>, %arg21: memref<1x32xf32, #tpu.memory_space<vmem>>, %arg22: memref<1x32xf32, #tpu.memory_space<vmem>>, %arg23: memref<1x32xf32, #tpu.memory_space<vmem>>, %arg24: memref<1x32xf32, #tpu.memory_space<vmem>>, %arg25: memref<1x8x32xf32, #tpu.memory_space<vmem>>, %arg26: memref<1x4x8x8xf32, #tpu.memory_space<vmem>>) attributes {dimension_semantics = [#tpu.dimension_semantics<parallel>], iteration_bounds = array<i64: 2>, scalar_prefetch = 0 : i64, scratch_operands = 0 : i64, tpu.core_type = #tpu.core_type<tc>, window_params = [{transform_indices = @transform_0, window_bounds = array<i64: 1, 8, 32>}, {transform_indices = @transform_1, window_bounds = array<i64: 1, 8, 32>}, {transform_indices = @transform_2, window_bounds = array<i64: 1, 8, 8>}, {transform_indices = @transform_3, window_bounds = array<i64: 1, 8, 8>}, {pipeline_mode = #tpu.pipeline_mode<synchronous>, transform_indices = @transform_4, window_bounds = array<i64: 32, 96>}, {pipeline_mode = #tpu.pipeline_mode<synchronous>, transform_indices = @transform_5, window_bounds = array<i64: 1, 96>}, {pipeline_mode = #tpu.pipeline_mode<synchronous>, transform_indices = @transform_6, window_bounds = array<i64: 32, 32>}, {pipeline_mode = #tpu.pipeline_mode<synchronous>, transform_indices = @transform_7, window_bounds = array<i64: 1, 32>}, {pipeline_mode = #tpu.pipeline_mode<synchronous>, transform_indices = @transform_8, window_bounds = array<i64: 32, 32>}, {pipeline_mode = #tpu.pipeline_mode<synchronous>, transform_indices = @transform_9, window_bounds = array<i64: 1, 32>}, {pipeline_mode = #tpu.pipeline_mode<synchronous>, transform_indices = @transform_10, window_bounds = array<i64: 32, 64>}, {pipeline_mode = #tpu.pipeline_mode<synchronous>, transform_indices = @transform_11, window_bounds = array<i64: 1, 64>}, {pipeline_mode = #tpu.pipeline_mode<synchronous>, transform_indices = @transform_12, window_bounds = array<i64: 32, 32>}, {pipeline_mode = #tpu.pipeline_mode<synchronous>, transform_indices = @transform_13, window_bounds = array<i64: 1, 32>}, {pipeline_mode = #tpu.pipeline_mode<synchronous>, transform_indices = @transform_14, window_bounds = array<i64: 32, 64>}, {pipeline_mode = #tpu.pipeline_mode<synchronous>, transform_indices = @transform_15, window_bounds = array<i64: 1, 64>}, {pipeline_mode = #tpu.pipeline_mode<synchronous>, transform_indices = @transform_16, window_bounds = array<i64: 64, 32>}, {pipeline_mode = #tpu.pipeline_mode<synchronous>, transform_indices = @transform_17, window_bounds = array<i64: 1, 32>}, {pipeline_mode = #tpu.pipeline_mode<synchronous>, transform_indices = @transform_18, window_bounds = array<i64: 1, 32>}, {pipeline_mode = #tpu.pipeline_mode<synchronous>, transform_indices = @transform_19, window_bounds = array<i64: 1, 32>}, {pipeline_mode = #tpu.pipeline_mode<synchronous>, transform_indices = @transform_20, window_bounds = array<i64: 1, 32>}, {pipeline_mode = #tpu.pipeline_mode<synchronous>, transform_indices = @transform_21, window_bounds = array<i64: 1, 32>}, {pipeline_mode = #tpu.pipeline_mode<synchronous>, transform_indices = @transform_22, window_bounds = array<i64: 1, 32>}, {pipeline_mode = #tpu.pipeline_mode<synchronous>, transform_indices = @transform_23, window_bounds = array<i64: 1, 32>}, {transform_indices = @transform_24, window_bounds = array<i64: 1, 8, 32>}, {transform_indices = @transform_25, window_bounds = array<i64: 1, 4, 8, 8>}]} {
    %c0 = arith.constant 0 : index
    %c0_0 = arith.constant 0 : index
    %c0_1 = arith.constant 0 : index
    %0 = vector.load %arg1[%c0, %c0_0, %c0_1] : memref<1x8x32xf32, #tpu.memory_space<vmem>>, vector<1x8x32xf32>
    %1 = vector.shape_cast %0 : vector<1x8x32xf32> to vector<8x32xf32>
    %c0_2 = arith.constant 0 : index
    %c0_3 = arith.constant 0 : index
    %c0_4 = arith.constant 0 : index
    %2 = vector.load %arg2[%c0_2, %c0_3, %c0_4] : memref<1x8x32xf32, #tpu.memory_space<vmem>>, vector<1x8x32xf32>
    %3 = vector.shape_cast %2 : vector<1x8x32xf32> to vector<8x32xf32>
    %c0_5 = arith.constant 0 : index
    %c0_6 = arith.constant 0 : index
    %c0_7 = arith.constant 0 : index
    %4 = vector.load %arg3[%c0_5, %c0_6, %c0_7] : memref<1x8x8xf32, #tpu.memory_space<vmem>>, vector<1x8x8xf32>
    %5 = vector.shape_cast %4 : vector<1x8x8xf32> to vector<8x8xf32>
    %c0_8 = arith.constant 0 : index
    %c0_9 = arith.constant 0 : index
    %c0_10 = arith.constant 0 : index
    %6 = vector.load %arg4[%c0_8, %c0_9, %c0_10] : memref<1x8x8xf32, #tpu.memory_space<vmem>>, vector<1x8x8xf32>
    %7 = vector.shape_cast %6 : vector<1x8x8xf32> to vector<8x8xf32>
    %c0_11 = arith.constant 0 : index
    %c0_12 = arith.constant 0 : index
    %8 = vector.load %arg5[%c0_11, %c0_12] : memref<32x96xf32, #tpu.memory_space<vmem>>, vector<32x96xf32>
    %cst = arith.constant dense<0.000000e+00> : vector<8x96xf32>
    %9 = tpu.matmul %1, %8, %cst {dimension_numbers = #tpu.dot_dimension_numbers<[1], [0], [0], [1], [0, 0, 1, 1], [], []>} : vector<8x32xf32>, vector<32x96xf32>, vector<8x96xf32> -> vector<8x96xf32>
    %c0_13 = arith.constant 0 : index
    %c0_14 = arith.constant 0 : index
    %10 = vector.load %arg6[%c0_13, %c0_14] : memref<1x96xf32, #tpu.memory_space<vmem>>, vector<1x96xf32>
    %11 = vector.broadcast %10 : vector<1x96xf32> to vector<8x96xf32>
    %12 = arith.addf %9, %11 : vector<8x96xf32>
    %13 = vector.extract_strided_slice %12 {offsets = [0, 0], sizes = [8, 32], strides = [1, 1]} : vector<8x96xf32> to vector<8x32xf32>
    %14 = vector.extract_strided_slice %12 {offsets = [0, 32], sizes = [8, 32], strides = [1, 1]} : vector<8x96xf32> to vector<8x32xf32>
    %15 = vector.extract_strided_slice %12 {offsets = [0, 64], sizes = [8, 32], strides = [1, 1]} : vector<8x96xf32> to vector<8x32xf32>
    %c0_15 = arith.constant 0 : index
    %c0_16 = arith.constant 0 : index
    %16 = vector.load %arg7[%c0_15, %c0_16] : memref<32x32xf32, #tpu.memory_space<vmem>>, vector<32x32xf32>
    %c0_17 = arith.constant 0 : index
    %c0_18 = arith.constant 0 : index
    %17 = vector.load %arg8[%c0_17, %c0_18] : memref<1x32xf32, #tpu.memory_space<vmem>>, vector<1x32xf32>
    %cst_19 = arith.constant 0.000000e+00 : f32
    %18 = vector.broadcast %cst_19 : f32 to vector<8x32xf32>
    %19 = vector.extract_strided_slice %13 {offsets = [0, 0], sizes = [8, 8], strides = [1, 1]} : vector<8x32xf32> to vector<8x8xf32>
    %cst_20 = arith.constant 0.353553385 : f32
    %20 = vector.broadcast %cst_20 : f32 to vector<8x8xf32>
    %21 = arith.mulf %19, %20 : vector<8x8xf32>
    %22 = vector.extract_strided_slice %14 {offsets = [0, 0], sizes = [8, 8], strides = [1, 1]} : vector<8x32xf32> to vector<8x8xf32>
    %23 = vector.extract_strided_slice %15 {offsets = [0, 0], sizes = [8, 8], strides = [1, 1]} : vector<8x32xf32> to vector<8x8xf32>
    %cst_21 = arith.constant dense<0.000000e+00> : vector<8x8xf32>
    %24 = tpu.matmul %21, %22, %cst_21 {dimension_numbers = #tpu.dot_dimension_numbers<[1], [1], [0], [0], [0, 0, 1, 0], [], []>} : vector<8x8xf32>, vector<8x8xf32>, vector<8x8xf32> -> vector<8x8xf32>
    %25 = arith.addf %24, %5 : vector<8x8xf32>
    %cst_22 = arith.constant dense<0xFF800000> : vector<8xf32>
    %26 = vector.multi_reduction <maximumf>, %25, %cst_22 [1] : vector<8x8xf32> to vector<8xf32>
    %27 = vector.shape_cast %26 : vector<8xf32> to vector<8x1xf32>
    %28 = vector.broadcast %27 : vector<8x1xf32> to vector<8x8xf32>
    %29 = arith.subf %25, %28 : vector<8x8xf32>
    %30 = math.exp %29 : vector<8x8xf32>
    %cst_23 = arith.constant dense<0.000000e+00> : vector<8xf32>
    %31 = vector.multi_reduction <add>, %30, %cst_23 [1] : vector<8x8xf32> to vector<8xf32>
    %32 = vector.shape_cast %31 : vector<8xf32> to vector<8x1xf32>
    %33 = tpu.reciprocal %32 {approx = true} : vector<8x1xf32> -> vector<8x1xf32>
    %34 = vector.broadcast %33 : vector<8x1xf32> to vector<8x8xf32>
    %35 = arith.mulf %30, %34 : vector<8x8xf32>
    %cst_24 = arith.constant dense<0.000000e+00> : vector<8x8xf32>
    %36 = tpu.matmul %35, %23, %cst_24 {dimension_numbers = #tpu.dot_dimension_numbers<[1], [0], [0], [1], [0, 0, 1, 1], [], []>} : vector<8x8xf32>, vector<8x8xf32>, vector<8x8xf32> -> vector<8x8xf32>
    %37 = vector.extract_strided_slice %16 {offsets = [0, 0], sizes = [8, 32], strides = [1, 1]} : vector<32x32xf32> to vector<8x32xf32>
    %cst_25 = arith.constant dense<0.000000e+00> : vector<8x32xf32>
    %38 = tpu.matmul %36, %37, %cst_25 {dimension_numbers = #tpu.dot_dimension_numbers<[1], [0], [0], [1], [0, 0, 1, 1], [], []>} : vector<8x8xf32>, vector<8x32xf32>, vector<8x32xf32> -> vector<8x32xf32>
    %39 = arith.addf %18, %38 : vector<8x32xf32>
    %40 = vector.extract_strided_slice %13 {offsets = [0, 8], sizes = [8, 8], strides = [1, 1]} : vector<8x32xf32> to vector<8x8xf32>
    %cst_26 = arith.constant 0.353553385 : f32
    %41 = vector.broadcast %cst_26 : f32 to vector<8x8xf32>
    %42 = arith.mulf %40, %41 : vector<8x8xf32>
    %43 = vector.extract_strided_slice %14 {offsets = [0, 8], sizes = [8, 8], strides = [1, 1]} : vector<8x32xf32> to vector<8x8xf32>
    %44 = vector.extract_strided_slice %15 {offsets = [0, 8], sizes = [8, 8], strides = [1, 1]} : vector<8x32xf32> to vector<8x8xf32>
    %cst_27 = arith.constant dense<0.000000e+00> : vector<8x8xf32>
    %45 = tpu.matmul %42, %43, %cst_27 {dimension_numbers = #tpu.dot_dimension_numbers<[1], [1], [0], [0], [0, 0, 1, 0], [], []>} : vector<8x8xf32>, vector<8x8xf32>, vector<8x8xf32> -> vector<8x8xf32>
    %46 = arith.addf %45, %5 : vector<8x8xf32>
    %cst_28 = arith.constant dense<0xFF800000> : vector<8xf32>
    %47 = vector.multi_reduction <maximumf>, %46, %cst_28 [1] : vector<8x8xf32> to vector<8xf32>
    %48 = vector.shape_cast %47 : vector<8xf32> to vector<8x1xf32>
    %49 = vector.broadcast %48 : vector<8x1xf32> to vector<8x8xf32>
    %50 = arith.subf %46, %49 : vector<8x8xf32>
    %51 = math.exp %50 : vector<8x8xf32>
    %cst_29 = arith.constant dense<0.000000e+00> : vector<8xf32>
    %52 = vector.multi_reduction <add>, %51, %cst_29 [1] : vector<8x8xf32> to vector<8xf32>
    %53 = vector.shape_cast %52 : vector<8xf32> to vector<8x1xf32>
    %54 = tpu.reciprocal %53 {approx = true} : vector<8x1xf32> -> vector<8x1xf32>
    %55 = vector.broadcast %54 : vector<8x1xf32> to vector<8x8xf32>
    %56 = arith.mulf %51, %55 : vector<8x8xf32>
    %cst_30 = arith.constant dense<0.000000e+00> : vector<8x8xf32>
    %57 = tpu.matmul %56, %44, %cst_30 {dimension_numbers = #tpu.dot_dimension_numbers<[1], [0], [0], [1], [0, 0, 1, 1], [], []>} : vector<8x8xf32>, vector<8x8xf32>, vector<8x8xf32> -> vector<8x8xf32>
    %58 = vector.extract_strided_slice %16 {offsets = [8, 0], sizes = [8, 32], strides = [1, 1]} : vector<32x32xf32> to vector<8x32xf32>
    %cst_31 = arith.constant dense<0.000000e+00> : vector<8x32xf32>
    %59 = tpu.matmul %57, %58, %cst_31 {dimension_numbers = #tpu.dot_dimension_numbers<[1], [0], [0], [1], [0, 0, 1, 1], [], []>} : vector<8x8xf32>, vector<8x32xf32>, vector<8x32xf32> -> vector<8x32xf32>
    %60 = arith.addf %39, %59 : vector<8x32xf32>
    %61 = vector.extract_strided_slice %13 {offsets = [0, 16], sizes = [8, 8], strides = [1, 1]} : vector<8x32xf32> to vector<8x8xf32>
    %cst_32 = arith.constant 0.353553385 : f32
    %62 = vector.broadcast %cst_32 : f32 to vector<8x8xf32>
    %63 = arith.mulf %61, %62 : vector<8x8xf32>
    %64 = vector.extract_strided_slice %14 {offsets = [0, 16], sizes = [8, 8], strides = [1, 1]} : vector<8x32xf32> to vector<8x8xf32>
    %65 = vector.extract_strided_slice %15 {offsets = [0, 16], sizes = [8, 8], strides = [1, 1]} : vector<8x32xf32> to vector<8x8xf32>
    %cst_33 = arith.constant dense<0.000000e+00> : vector<8x8xf32>
    %66 = tpu.matmul %63, %64, %cst_33 {dimension_numbers = #tpu.dot_dimension_numbers<[1], [1], [0], [0], [0, 0, 1, 0], [], []>} : vector<8x8xf32>, vector<8x8xf32>, vector<8x8xf32> -> vector<8x8xf32>
    %67 = arith.addf %66, %5 : vector<8x8xf32>
    %cst_34 = arith.constant dense<0xFF800000> : vector<8xf32>
    %68 = vector.multi_reduction <maximumf>, %67, %cst_34 [1] : vector<8x8xf32> to vector<8xf32>
    %69 = vector.shape_cast %68 : vector<8xf32> to vector<8x1xf32>
    %70 = vector.broadcast %69 : vector<8x1xf32> to vector<8x8xf32>
    %71 = arith.subf %67, %70 : vector<8x8xf32>
    %72 = math.exp %71 : vector<8x8xf32>
    %cst_35 = arith.constant dense<0.000000e+00> : vector<8xf32>
    %73 = vector.multi_reduction <add>, %72, %cst_35 [1] : vector<8x8xf32> to vector<8xf32>
    %74 = vector.shape_cast %73 : vector<8xf32> to vector<8x1xf32>
    %75 = tpu.reciprocal %74 {approx = true} : vector<8x1xf32> -> vector<8x1xf32>
    %76 = vector.broadcast %75 : vector<8x1xf32> to vector<8x8xf32>
    %77 = arith.mulf %72, %76 : vector<8x8xf32>
    %cst_36 = arith.constant dense<0.000000e+00> : vector<8x8xf32>
    %78 = tpu.matmul %77, %65, %cst_36 {dimension_numbers = #tpu.dot_dimension_numbers<[1], [0], [0], [1], [0, 0, 1, 1], [], []>} : vector<8x8xf32>, vector<8x8xf32>, vector<8x8xf32> -> vector<8x8xf32>
    %79 = vector.extract_strided_slice %16 {offsets = [16, 0], sizes = [8, 32], strides = [1, 1]} : vector<32x32xf32> to vector<8x32xf32>
    %cst_37 = arith.constant dense<0.000000e+00> : vector<8x32xf32>
    %80 = tpu.matmul %78, %79, %cst_37 {dimension_numbers = #tpu.dot_dimension_numbers<[1], [0], [0], [1], [0, 0, 1, 1], [], []>} : vector<8x8xf32>, vector<8x32xf32>, vector<8x32xf32> -> vector<8x32xf32>
    %81 = arith.addf %60, %80 : vector<8x32xf32>
    %82 = vector.extract_strided_slice %13 {offsets = [0, 24], sizes = [8, 8], strides = [1, 1]} : vector<8x32xf32> to vector<8x8xf32>
    %cst_38 = arith.constant 0.353553385 : f32
    %83 = vector.broadcast %cst_38 : f32 to vector<8x8xf32>
    %84 = arith.mulf %82, %83 : vector<8x8xf32>
    %85 = vector.extract_strided_slice %14 {offsets = [0, 24], sizes = [8, 8], strides = [1, 1]} : vector<8x32xf32> to vector<8x8xf32>
    %86 = vector.extract_strided_slice %15 {offsets = [0, 24], sizes = [8, 8], strides = [1, 1]} : vector<8x32xf32> to vector<8x8xf32>
    %cst_39 = arith.constant dense<0.000000e+00> : vector<8x8xf32>
    %87 = tpu.matmul %84, %85, %cst_39 {dimension_numbers = #tpu.dot_dimension_numbers<[1], [1], [0], [0], [0, 0, 1, 0], [], []>} : vector<8x8xf32>, vector<8x8xf32>, vector<8x8xf32> -> vector<8x8xf32>
    %88 = arith.addf %87, %5 : vector<8x8xf32>
    %cst_40 = arith.constant dense<0xFF800000> : vector<8xf32>
    %89 = vector.multi_reduction <maximumf>, %88, %cst_40 [1] : vector<8x8xf32> to vector<8xf32>
    %90 = vector.shape_cast %89 : vector<8xf32> to vector<8x1xf32>
    %91 = vector.broadcast %90 : vector<8x1xf32> to vector<8x8xf32>
    %92 = arith.subf %88, %91 : vector<8x8xf32>
    %93 = math.exp %92 : vector<8x8xf32>
    %cst_41 = arith.constant dense<0.000000e+00> : vector<8xf32>
    %94 = vector.multi_reduction <add>, %93, %cst_41 [1] : vector<8x8xf32> to vector<8xf32>
    %95 = vector.shape_cast %94 : vector<8xf32> to vector<8x1xf32>
    %96 = tpu.reciprocal %95 {approx = true} : vector<8x1xf32> -> vector<8x1xf32>
    %97 = vector.broadcast %96 : vector<8x1xf32> to vector<8x8xf32>
    %98 = arith.mulf %93, %97 : vector<8x8xf32>
    %cst_42 = arith.constant dense<0.000000e+00> : vector<8x8xf32>
    %99 = tpu.matmul %98, %86, %cst_42 {dimension_numbers = #tpu.dot_dimension_numbers<[1], [0], [0], [1], [0, 0, 1, 1], [], []>} : vector<8x8xf32>, vector<8x8xf32>, vector<8x8xf32> -> vector<8x8xf32>
    %100 = vector.extract_strided_slice %16 {offsets = [24, 0], sizes = [8, 32], strides = [1, 1]} : vector<32x32xf32> to vector<8x32xf32>
    %cst_43 = arith.constant dense<0.000000e+00> : vector<8x32xf32>
    %101 = tpu.matmul %99, %100, %cst_43 {dimension_numbers = #tpu.dot_dimension_numbers<[1], [0], [0], [1], [0, 0, 1, 1], [], []>} : vector<8x8xf32>, vector<8x32xf32>, vector<8x32xf32> -> vector<8x32xf32>
    %102 = arith.addf %81, %101 : vector<8x32xf32>
    %103 = vector.broadcast %17 : vector<1x32xf32> to vector<8x32xf32>
    %104 = arith.addf %102, %103 : vector<8x32xf32>
    %105 = arith.addf %1, %104 : vector<8x32xf32>
    %c0_44 = arith.constant 0 : index
    %c0_45 = arith.constant 0 : index
    %106 = vector.load %arg19[%c0_44, %c0_45] : memref<1x32xf32, #tpu.memory_space<vmem>>, vector<1x32xf32>
    %c0_46 = arith.constant 0 : index
    %c0_47 = arith.constant 0 : index
    %107 = vector.load %arg20[%c0_46, %c0_47] : memref<1x32xf32, #tpu.memory_space<vmem>>, vector<1x32xf32>
    %cst_48 = arith.constant dense<0.000000e+00> : vector<8xf32>
    %108 = vector.multi_reduction <add>, %105, %cst_48 [1] : vector<8x32xf32> to vector<8xf32>
    %109 = vector.shape_cast %108 : vector<8xf32> to vector<8x1xf32>
    %cst_49 = arith.constant 3.200000e+01 : f32
    %110 = vector.broadcast %cst_49 : f32 to vector<8x1xf32>
    %111 = arith.divf %109, %110 : vector<8x1xf32>
    %112 = vector.broadcast %111 : vector<8x1xf32> to vector<8x32xf32>
    %113 = arith.subf %105, %112 : vector<8x32xf32>
    %114 = arith.mulf %113, %113 : vector<8x32xf32>
    %cst_50 = arith.constant dense<0.000000e+00> : vector<8xf32>
    %115 = vector.multi_reduction <add>, %114, %cst_50 [1] : vector<8x32xf32> to vector<8xf32>
    %116 = vector.shape_cast %115 : vector<8xf32> to vector<8x1xf32>
    %cst_51 = arith.constant 3.200000e+01 : f32
    %117 = vector.broadcast %cst_51 : f32 to vector<8x1xf32>
    %118 = arith.divf %116, %117 : vector<8x1xf32>
    %119 = vector.broadcast %111 : vector<8x1xf32> to vector<8x32xf32>
    %120 = arith.subf %105, %119 : vector<8x32xf32>
    %cst_52 = arith.constant 9.99999974E-6 : f32
    %121 = vector.broadcast %cst_52 : f32 to vector<8x1xf32>
    %122 = arith.addf %118, %121 : vector<8x1xf32>
    %123 = math.rsqrt %122 : vector<8x1xf32>
    %124 = vector.broadcast %123 : vector<8x1xf32> to vector<8x32xf32>
    %125 = arith.mulf %120, %124 : vector<8x32xf32>
    %126 = vector.broadcast %106 : vector<1x32xf32> to vector<8x32xf32>
    %127 = arith.mulf %125, %126 : vector<8x32xf32>
    %128 = vector.broadcast %107 : vector<1x32xf32> to vector<8x32xf32>
    %129 = arith.addf %127, %128 : vector<8x32xf32>
    %c0_53 = arith.constant 0 : index
    %c0_54 = arith.constant 0 : index
    %130 = vector.load %arg9[%c0_53, %c0_54] : memref<32x32xf32, #tpu.memory_space<vmem>>, vector<32x32xf32>
    %cst_55 = arith.constant dense<0.000000e+00> : vector<8x32xf32>
    %131 = tpu.matmul %129, %130, %cst_55 {dimension_numbers = #tpu.dot_dimension_numbers<[1], [0], [0], [1], [0, 0, 1, 1], [], []>} : vector<8x32xf32>, vector<32x32xf32>, vector<8x32xf32> -> vector<8x32xf32>
    %c0_56 = arith.constant 0 : index
    %c0_57 = arith.constant 0 : index
    %132 = vector.load %arg10[%c0_56, %c0_57] : memref<1x32xf32, #tpu.memory_space<vmem>>, vector<1x32xf32>
    %133 = vector.broadcast %132 : vector<1x32xf32> to vector<8x32xf32>
    %134 = arith.addf %131, %133 : vector<8x32xf32>
    %c0_58 = arith.constant 0 : index
    %c0_59 = arith.constant 0 : index
    %135 = vector.load %arg11[%c0_58, %c0_59] : memref<32x64xf32, #tpu.memory_space<vmem>>, vector<32x64xf32>
    %cst_60 = arith.constant dense<0.000000e+00> : vector<8x64xf32>
    %136 = tpu.matmul %3, %135, %cst_60 {dimension_numbers = #tpu.dot_dimension_numbers<[1], [0], [0], [1], [0, 0, 1, 1], [], []>} : vector<8x32xf32>, vector<32x64xf32>, vector<8x64xf32> -> vector<8x64xf32>
    %c0_61 = arith.constant 0 : index
    %c0_62 = arith.constant 0 : index
    %137 = vector.load %arg12[%c0_61, %c0_62] : memref<1x64xf32, #tpu.memory_space<vmem>>, vector<1x64xf32>
    %138 = vector.broadcast %137 : vector<1x64xf32> to vector<8x64xf32>
    %139 = arith.addf %136, %138 : vector<8x64xf32>
    %140 = vector.extract_strided_slice %139 {offsets = [0, 0], sizes = [8, 32], strides = [1, 1]} : vector<8x64xf32> to vector<8x32xf32>
    %141 = vector.extract_strided_slice %139 {offsets = [0, 32], sizes = [8, 32], strides = [1, 1]} : vector<8x64xf32> to vector<8x32xf32>
    %c0_63 = arith.constant 0 : index
    %c0_64 = arith.constant 0 : index
    %142 = vector.load %arg13[%c0_63, %c0_64] : memref<32x32xf32, #tpu.memory_space<vmem>>, vector<32x32xf32>
    %c0_65 = arith.constant 0 : index
    %c0_66 = arith.constant 0 : index
    %143 = vector.load %arg14[%c0_65, %c0_66] : memref<1x32xf32, #tpu.memory_space<vmem>>, vector<1x32xf32>
    %cst_67 = arith.constant 0.000000e+00 : f32
    %144 = vector.broadcast %cst_67 : f32 to vector<8x32xf32>
    %145 = vector.extract_strided_slice %134 {offsets = [0, 0], sizes = [8, 8], strides = [1, 1]} : vector<8x32xf32> to vector<8x8xf32>
    %cst_68 = arith.constant 0.353553385 : f32
    %146 = vector.broadcast %cst_68 : f32 to vector<8x8xf32>
    %147 = arith.mulf %145, %146 : vector<8x8xf32>
    %148 = vector.extract_strided_slice %140 {offsets = [0, 0], sizes = [8, 8], strides = [1, 1]} : vector<8x32xf32> to vector<8x8xf32>
    %149 = vector.extract_strided_slice %141 {offsets = [0, 0], sizes = [8, 8], strides = [1, 1]} : vector<8x32xf32> to vector<8x8xf32>
    %cst_69 = arith.constant dense<0.000000e+00> : vector<8x8xf32>
    %150 = tpu.matmul %147, %148, %cst_69 {dimension_numbers = #tpu.dot_dimension_numbers<[1], [1], [0], [0], [0, 0, 1, 0], [], []>} : vector<8x8xf32>, vector<8x8xf32>, vector<8x8xf32> -> vector<8x8xf32>
    %151 = arith.addf %150, %7 : vector<8x8xf32>
    %cst_70 = arith.constant dense<0xFF800000> : vector<8xf32>
    %152 = vector.multi_reduction <maximumf>, %151, %cst_70 [1] : vector<8x8xf32> to vector<8xf32>
    %153 = vector.shape_cast %152 : vector<8xf32> to vector<8x1xf32>
    %154 = vector.broadcast %153 : vector<8x1xf32> to vector<8x8xf32>
    %155 = arith.subf %151, %154 : vector<8x8xf32>
    %156 = math.exp %155 : vector<8x8xf32>
    %cst_71 = arith.constant dense<0.000000e+00> : vector<8xf32>
    %157 = vector.multi_reduction <add>, %156, %cst_71 [1] : vector<8x8xf32> to vector<8xf32>
    %158 = vector.shape_cast %157 : vector<8xf32> to vector<8x1xf32>
    %159 = tpu.reciprocal %158 {approx = true} : vector<8x1xf32> -> vector<8x1xf32>
    %160 = vector.broadcast %159 : vector<8x1xf32> to vector<8x8xf32>
    %161 = arith.mulf %156, %160 : vector<8x8xf32>
    %cst_72 = arith.constant dense<0.000000e+00> : vector<8x8xf32>
    %162 = tpu.matmul %161, %149, %cst_72 {dimension_numbers = #tpu.dot_dimension_numbers<[1], [0], [0], [1], [0, 0, 1, 1], [], []>} : vector<8x8xf32>, vector<8x8xf32>, vector<8x8xf32> -> vector<8x8xf32>
    %163 = vector.extract_strided_slice %142 {offsets = [0, 0], sizes = [8, 32], strides = [1, 1]} : vector<32x32xf32> to vector<8x32xf32>
    %cst_73 = arith.constant dense<0.000000e+00> : vector<8x32xf32>
    %164 = tpu.matmul %162, %163, %cst_73 {dimension_numbers = #tpu.dot_dimension_numbers<[1], [0], [0], [1], [0, 0, 1, 1], [], []>} : vector<8x8xf32>, vector<8x32xf32>, vector<8x32xf32> -> vector<8x32xf32>
    %165 = arith.addf %144, %164 : vector<8x32xf32>
    %166 = vector.extract_strided_slice %134 {offsets = [0, 8], sizes = [8, 8], strides = [1, 1]} : vector<8x32xf32> to vector<8x8xf32>
    %cst_74 = arith.constant 0.353553385 : f32
    %167 = vector.broadcast %cst_74 : f32 to vector<8x8xf32>
    %168 = arith.mulf %166, %167 : vector<8x8xf32>
    %169 = vector.extract_strided_slice %140 {offsets = [0, 8], sizes = [8, 8], strides = [1, 1]} : vector<8x32xf32> to vector<8x8xf32>
    %170 = vector.extract_strided_slice %141 {offsets = [0, 8], sizes = [8, 8], strides = [1, 1]} : vector<8x32xf32> to vector<8x8xf32>
    %cst_75 = arith.constant dense<0.000000e+00> : vector<8x8xf32>
    %171 = tpu.matmul %168, %169, %cst_75 {dimension_numbers = #tpu.dot_dimension_numbers<[1], [1], [0], [0], [0, 0, 1, 0], [], []>} : vector<8x8xf32>, vector<8x8xf32>, vector<8x8xf32> -> vector<8x8xf32>
    %172 = arith.addf %171, %7 : vector<8x8xf32>
    %cst_76 = arith.constant dense<0xFF800000> : vector<8xf32>
    %173 = vector.multi_reduction <maximumf>, %172, %cst_76 [1] : vector<8x8xf32> to vector<8xf32>
    %174 = vector.shape_cast %173 : vector<8xf32> to vector<8x1xf32>
    %175 = vector.broadcast %174 : vector<8x1xf32> to vector<8x8xf32>
    %176 = arith.subf %172, %175 : vector<8x8xf32>
    %177 = math.exp %176 : vector<8x8xf32>
    %cst_77 = arith.constant dense<0.000000e+00> : vector<8xf32>
    %178 = vector.multi_reduction <add>, %177, %cst_77 [1] : vector<8x8xf32> to vector<8xf32>
    %179 = vector.shape_cast %178 : vector<8xf32> to vector<8x1xf32>
    %180 = tpu.reciprocal %179 {approx = true} : vector<8x1xf32> -> vector<8x1xf32>
    %181 = vector.broadcast %180 : vector<8x1xf32> to vector<8x8xf32>
    %182 = arith.mulf %177, %181 : vector<8x8xf32>
    %cst_78 = arith.constant dense<0.000000e+00> : vector<8x8xf32>
    %183 = tpu.matmul %182, %170, %cst_78 {dimension_numbers = #tpu.dot_dimension_numbers<[1], [0], [0], [1], [0, 0, 1, 1], [], []>} : vector<8x8xf32>, vector<8x8xf32>, vector<8x8xf32> -> vector<8x8xf32>
    %184 = vector.extract_strided_slice %142 {offsets = [8, 0], sizes = [8, 32], strides = [1, 1]} : vector<32x32xf32> to vector<8x32xf32>
    %cst_79 = arith.constant dense<0.000000e+00> : vector<8x32xf32>
    %185 = tpu.matmul %183, %184, %cst_79 {dimension_numbers = #tpu.dot_dimension_numbers<[1], [0], [0], [1], [0, 0, 1, 1], [], []>} : vector<8x8xf32>, vector<8x32xf32>, vector<8x32xf32> -> vector<8x32xf32>
    %186 = arith.addf %165, %185 : vector<8x32xf32>
    %187 = vector.extract_strided_slice %134 {offsets = [0, 16], sizes = [8, 8], strides = [1, 1]} : vector<8x32xf32> to vector<8x8xf32>
    %cst_80 = arith.constant 0.353553385 : f32
    %188 = vector.broadcast %cst_80 : f32 to vector<8x8xf32>
    %189 = arith.mulf %187, %188 : vector<8x8xf32>
    %190 = vector.extract_strided_slice %140 {offsets = [0, 16], sizes = [8, 8], strides = [1, 1]} : vector<8x32xf32> to vector<8x8xf32>
    %191 = vector.extract_strided_slice %141 {offsets = [0, 16], sizes = [8, 8], strides = [1, 1]} : vector<8x32xf32> to vector<8x8xf32>
    %cst_81 = arith.constant dense<0.000000e+00> : vector<8x8xf32>
    %192 = tpu.matmul %189, %190, %cst_81 {dimension_numbers = #tpu.dot_dimension_numbers<[1], [1], [0], [0], [0, 0, 1, 0], [], []>} : vector<8x8xf32>, vector<8x8xf32>, vector<8x8xf32> -> vector<8x8xf32>
    %193 = arith.addf %192, %7 : vector<8x8xf32>
    %cst_82 = arith.constant dense<0xFF800000> : vector<8xf32>
    %194 = vector.multi_reduction <maximumf>, %193, %cst_82 [1] : vector<8x8xf32> to vector<8xf32>
    %195 = vector.shape_cast %194 : vector<8xf32> to vector<8x1xf32>
    %196 = vector.broadcast %195 : vector<8x1xf32> to vector<8x8xf32>
    %197 = arith.subf %193, %196 : vector<8x8xf32>
    %198 = math.exp %197 : vector<8x8xf32>
    %cst_83 = arith.constant dense<0.000000e+00> : vector<8xf32>
    %199 = vector.multi_reduction <add>, %198, %cst_83 [1] : vector<8x8xf32> to vector<8xf32>
    %200 = vector.shape_cast %199 : vector<8xf32> to vector<8x1xf32>
    %201 = tpu.reciprocal %200 {approx = true} : vector<8x1xf32> -> vector<8x1xf32>
    %202 = vector.broadcast %201 : vector<8x1xf32> to vector<8x8xf32>
    %203 = arith.mulf %198, %202 : vector<8x8xf32>
    %cst_84 = arith.constant dense<0.000000e+00> : vector<8x8xf32>
    %204 = tpu.matmul %203, %191, %cst_84 {dimension_numbers = #tpu.dot_dimension_numbers<[1], [0], [0], [1], [0, 0, 1, 1], [], []>} : vector<8x8xf32>, vector<8x8xf32>, vector<8x8xf32> -> vector<8x8xf32>
    %205 = vector.extract_strided_slice %142 {offsets = [16, 0], sizes = [8, 32], strides = [1, 1]} : vector<32x32xf32> to vector<8x32xf32>
    %cst_85 = arith.constant dense<0.000000e+00> : vector<8x32xf32>
    %206 = tpu.matmul %204, %205, %cst_85 {dimension_numbers = #tpu.dot_dimension_numbers<[1], [0], [0], [1], [0, 0, 1, 1], [], []>} : vector<8x8xf32>, vector<8x32xf32>, vector<8x32xf32> -> vector<8x32xf32>
    %207 = arith.addf %186, %206 : vector<8x32xf32>
    %208 = vector.extract_strided_slice %134 {offsets = [0, 24], sizes = [8, 8], strides = [1, 1]} : vector<8x32xf32> to vector<8x8xf32>
    %cst_86 = arith.constant 0.353553385 : f32
    %209 = vector.broadcast %cst_86 : f32 to vector<8x8xf32>
    %210 = arith.mulf %208, %209 : vector<8x8xf32>
    %211 = vector.extract_strided_slice %140 {offsets = [0, 24], sizes = [8, 8], strides = [1, 1]} : vector<8x32xf32> to vector<8x8xf32>
    %212 = vector.extract_strided_slice %141 {offsets = [0, 24], sizes = [8, 8], strides = [1, 1]} : vector<8x32xf32> to vector<8x8xf32>
    %cst_87 = arith.constant dense<0.000000e+00> : vector<8x8xf32>
    %213 = tpu.matmul %210, %211, %cst_87 {dimension_numbers = #tpu.dot_dimension_numbers<[1], [1], [0], [0], [0, 0, 1, 0], [], []>} : vector<8x8xf32>, vector<8x8xf32>, vector<8x8xf32> -> vector<8x8xf32>
    %214 = arith.addf %213, %7 : vector<8x8xf32>
    %cst_88 = arith.constant dense<0xFF800000> : vector<8xf32>
    %215 = vector.multi_reduction <maximumf>, %214, %cst_88 [1] : vector<8x8xf32> to vector<8xf32>
    %216 = vector.shape_cast %215 : vector<8xf32> to vector<8x1xf32>
    %217 = vector.broadcast %216 : vector<8x1xf32> to vector<8x8xf32>
    %218 = arith.subf %214, %217 : vector<8x8xf32>
    %219 = math.exp %218 : vector<8x8xf32>
    %cst_89 = arith.constant dense<0.000000e+00> : vector<8xf32>
    %220 = vector.multi_reduction <add>, %219, %cst_89 [1] : vector<8x8xf32> to vector<8xf32>
    %221 = vector.shape_cast %220 : vector<8xf32> to vector<8x1xf32>
    %222 = tpu.reciprocal %221 {approx = true} : vector<8x1xf32> -> vector<8x1xf32>
    %223 = vector.broadcast %222 : vector<8x1xf32> to vector<8x8xf32>
    %224 = arith.mulf %219, %223 : vector<8x8xf32>
    %cst_90 = arith.constant dense<0.000000e+00> : vector<8x8xf32>
    %225 = tpu.matmul %224, %212, %cst_90 {dimension_numbers = #tpu.dot_dimension_numbers<[1], [0], [0], [1], [0, 0, 1, 1], [], []>} : vector<8x8xf32>, vector<8x8xf32>, vector<8x8xf32> -> vector<8x8xf32>
    %226 = vector.extract_strided_slice %142 {offsets = [24, 0], sizes = [8, 32], strides = [1, 1]} : vector<32x32xf32> to vector<8x32xf32>
    %cst_91 = arith.constant dense<0.000000e+00> : vector<8x32xf32>
    %227 = tpu.matmul %225, %226, %cst_91 {dimension_numbers = #tpu.dot_dimension_numbers<[1], [0], [0], [1], [0, 0, 1, 1], [], []>} : vector<8x8xf32>, vector<8x32xf32>, vector<8x32xf32> -> vector<8x32xf32>
    %228 = arith.addf %207, %227 : vector<8x32xf32>
    %229 = vector.broadcast %143 : vector<1x32xf32> to vector<8x32xf32>
    %230 = arith.addf %228, %229 : vector<8x32xf32>
    %231 = arith.addf %129, %230 : vector<8x32xf32>
    %c0_92 = arith.constant 0 : index
    %c0_93 = arith.constant 0 : index
    %232 = vector.load %arg21[%c0_92, %c0_93] : memref<1x32xf32, #tpu.memory_space<vmem>>, vector<1x32xf32>
    %c0_94 = arith.constant 0 : index
    %c0_95 = arith.constant 0 : index
    %233 = vector.load %arg22[%c0_94, %c0_95] : memref<1x32xf32, #tpu.memory_space<vmem>>, vector<1x32xf32>
    %cst_96 = arith.constant dense<0.000000e+00> : vector<8xf32>
    %234 = vector.multi_reduction <add>, %231, %cst_96 [1] : vector<8x32xf32> to vector<8xf32>
    %235 = vector.shape_cast %234 : vector<8xf32> to vector<8x1xf32>
    %cst_97 = arith.constant 3.200000e+01 : f32
    %236 = vector.broadcast %cst_97 : f32 to vector<8x1xf32>
    %237 = arith.divf %235, %236 : vector<8x1xf32>
    %238 = vector.broadcast %237 : vector<8x1xf32> to vector<8x32xf32>
    %239 = arith.subf %231, %238 : vector<8x32xf32>
    %240 = arith.mulf %239, %239 : vector<8x32xf32>
    %cst_98 = arith.constant dense<0.000000e+00> : vector<8xf32>
    %241 = vector.multi_reduction <add>, %240, %cst_98 [1] : vector<8x32xf32> to vector<8xf32>
    %242 = vector.shape_cast %241 : vector<8xf32> to vector<8x1xf32>
    %cst_99 = arith.constant 3.200000e+01 : f32
    %243 = vector.broadcast %cst_99 : f32 to vector<8x1xf32>
    %244 = arith.divf %242, %243 : vector<8x1xf32>
    %245 = vector.broadcast %237 : vector<8x1xf32> to vector<8x32xf32>
    %246 = arith.subf %231, %245 : vector<8x32xf32>
    %cst_100 = arith.constant 9.99999974E-6 : f32
    %247 = vector.broadcast %cst_100 : f32 to vector<8x1xf32>
    %248 = arith.addf %244, %247 : vector<8x1xf32>
    %249 = math.rsqrt %248 : vector<8x1xf32>
    %250 = vector.broadcast %249 : vector<8x1xf32> to vector<8x32xf32>
    %251 = arith.mulf %246, %250 : vector<8x32xf32>
    %252 = vector.broadcast %232 : vector<1x32xf32> to vector<8x32xf32>
    %253 = arith.mulf %251, %252 : vector<8x32xf32>
    %254 = vector.broadcast %233 : vector<1x32xf32> to vector<8x32xf32>
    %255 = arith.addf %253, %254 : vector<8x32xf32>
    %c0_101 = arith.constant 0 : index
    %c0_102 = arith.constant 0 : index
    %256 = vector.load %arg15[%c0_101, %c0_102] : memref<32x64xf32, #tpu.memory_space<vmem>>, vector<32x64xf32>
    %cst_103 = arith.constant dense<0.000000e+00> : vector<8x64xf32>
    %257 = tpu.matmul %255, %256, %cst_103 {dimension_numbers = #tpu.dot_dimension_numbers<[1], [0], [0], [1], [0, 0, 1, 1], [], []>} : vector<8x32xf32>, vector<32x64xf32>, vector<8x64xf32> -> vector<8x64xf32>
    %c0_104 = arith.constant 0 : index
    %c0_105 = arith.constant 0 : index
    %258 = vector.load %arg16[%c0_104, %c0_105] : memref<1x64xf32, #tpu.memory_space<vmem>>, vector<1x64xf32>
    %259 = vector.broadcast %258 : vector<1x64xf32> to vector<8x64xf32>
    %260 = arith.addf %257, %259 : vector<8x64xf32>
    %cst_106 = arith.constant 0.000000e+00 : f32
    %261 = vector.broadcast %cst_106 : f32 to vector<8x64xf32>
    %262 = arith.maximumf %260, %261 : vector<8x64xf32>
    %c0_107 = arith.constant 0 : index
    %c0_108 = arith.constant 0 : index
    %263 = vector.load %arg17[%c0_107, %c0_108] : memref<64x32xf32, #tpu.memory_space<vmem>>, vector<64x32xf32>
    %cst_109 = arith.constant dense<0.000000e+00> : vector<8x32xf32>
    %264 = tpu.matmul %262, %263, %cst_109 {dimension_numbers = #tpu.dot_dimension_numbers<[1], [0], [0], [1], [0, 0, 1, 1], [], []>} : vector<8x64xf32>, vector<64x32xf32>, vector<8x32xf32> -> vector<8x32xf32>
    %c0_110 = arith.constant 0 : index
    %c0_111 = arith.constant 0 : index
    %265 = vector.load %arg18[%c0_110, %c0_111] : memref<1x32xf32, #tpu.memory_space<vmem>>, vector<1x32xf32>
    %266 = vector.broadcast %265 : vector<1x32xf32> to vector<8x32xf32>
    %267 = arith.addf %264, %266 : vector<8x32xf32>
    %268 = arith.addf %255, %267 : vector<8x32xf32>
    %c0_112 = arith.constant 0 : index
    %c0_113 = arith.constant 0 : index
    %269 = vector.load %arg23[%c0_112, %c0_113] : memref<1x32xf32, #tpu.memory_space<vmem>>, vector<1x32xf32>
    %c0_114 = arith.constant 0 : index
    %c0_115 = arith.constant 0 : index
    %270 = vector.load %arg24[%c0_114, %c0_115] : memref<1x32xf32, #tpu.memory_space<vmem>>, vector<1x32xf32>
    %cst_116 = arith.constant dense<0.000000e+00> : vector<8xf32>
    %271 = vector.multi_reduction <add>, %268, %cst_116 [1] : vector<8x32xf32> to vector<8xf32>
    %272 = vector.shape_cast %271 : vector<8xf32> to vector<8x1xf32>
    %cst_117 = arith.constant 3.200000e+01 : f32
    %273 = vector.broadcast %cst_117 : f32 to vector<8x1xf32>
    %274 = arith.divf %272, %273 : vector<8x1xf32>
    %275 = vector.broadcast %274 : vector<8x1xf32> to vector<8x32xf32>
    %276 = arith.subf %268, %275 : vector<8x32xf32>
    %277 = arith.mulf %276, %276 : vector<8x32xf32>
    %cst_118 = arith.constant dense<0.000000e+00> : vector<8xf32>
    %278 = vector.multi_reduction <add>, %277, %cst_118 [1] : vector<8x32xf32> to vector<8xf32>
    %279 = vector.shape_cast %278 : vector<8xf32> to vector<8x1xf32>
    %cst_119 = arith.constant 3.200000e+01 : f32
    %280 = vector.broadcast %cst_119 : f32 to vector<8x1xf32>
    %281 = arith.divf %279, %280 : vector<8x1xf32>
    %282 = vector.broadcast %274 : vector<8x1xf32> to vector<8x32xf32>
    %283 = arith.subf %268, %282 : vector<8x32xf32>
    %cst_120 = arith.constant 9.99999974E-6 : f32
    %284 = vector.broadcast %cst_120 : f32 to vector<8x1xf32>
    %285 = arith.addf %281, %284 : vector<8x1xf32>
    %286 = math.rsqrt %285 : vector<8x1xf32>
    %287 = vector.broadcast %286 : vector<8x1xf32> to vector<8x32xf32>
    %288 = arith.mulf %283, %287 : vector<8x32xf32>
    %289 = vector.broadcast %269 : vector<1x32xf32> to vector<8x32xf32>
    %290 = arith.mulf %288, %289 : vector<8x32xf32>
    %291 = vector.broadcast %270 : vector<1x32xf32> to vector<8x32xf32>
    %292 = arith.addf %290, %291 : vector<8x32xf32>
    %c0_121 = arith.constant 0 : index
    %c0_122 = arith.constant 0 : index
    %c0_123 = arith.constant 0 : index
    %293 = vector.load %arg25[%c0_121, %c0_122, %c0_123] : memref<1x8x32xf32, #tpu.memory_space<vmem>>, vector<1x8x32xf32>
    %294 = vector.shape_cast %293 : vector<1x8x32xf32> to vector<8x32xf32>
    %295 = vector.shape_cast %292 : vector<8x32xf32> to vector<1x8x32xf32>
    tpu.vector_store %arg25[%c0_121, %c0_122, %c0_123], %295 {strides = array<i32>} : memref<1x8x32xf32, #tpu.memory_space<vmem>>, vector<1x8x32xf32>,
    %c0_124 = arith.constant 0 : index
    %c0_125 = arith.constant 0 : index
    %c0_126 = arith.constant 0 : index
    %c0_127 = arith.constant 0 : index
    %296 = vector.load %arg26[%c0_124, %c0_125, %c0_126, %c0_127] : memref<1x4x8x8xf32, #tpu.memory_space<vmem>>, vector<1x1x8x8xf32>
    %297 = vector.shape_cast %296 : vector<1x1x8x8xf32> to vector<8x8xf32>
    %298 = vector.shape_cast %161 : vector<8x8xf32> to vector<1x1x8x8xf32>
    tpu.vector_store %arg26[%c0_124, %c0_125, %c0_126, %c0_127], %298 {strides = array<i32>} : memref<1x4x8x8xf32, #tpu.memory_space<vmem>>, vector<1x1x8x8xf32>,
    %c0_128 = arith.constant 0 : index
    %c1 = arith.constant 1 : index
    %c0_129 = arith.constant 0 : index
    %c0_130 = arith.constant 0 : index
    %299 = vector.load %arg26[%c0_128, %c1, %c0_129, %c0_130] : memref<1x4x8x8xf32, #tpu.memory_space<vmem>>, vector<1x1x8x8xf32>
    %300 = vector.shape_cast %299 : vector<1x1x8x8xf32> to vector<8x8xf32>
    %301 = vector.shape_cast %182 : vector<8x8xf32> to vector<1x1x8x8xf32>
    tpu.vector_store %arg26[%c0_128, %c1, %c0_129, %c0_130], %301 {strides = array<i32>} : memref<1x4x8x8xf32, #tpu.memory_space<vmem>>, vector<1x1x8x8xf32>,
    %c0_131 = arith.constant 0 : index
    %c2 = arith.constant 2 : index
    %c0_132 = arith.constant 0 : index
    %c0_133 = arith.constant 0 : index
    %302 = vector.load %arg26[%c0_131, %c2, %c0_132, %c0_133] : memref<1x4x8x8xf32, #tpu.memory_space<vmem>>, vector<1x1x8x8xf32>
    %303 = vector.shape_cast %302 : vector<1x1x8x8xf32> to vector<8x8xf32>
    %304 = vector.shape_cast %203 : vector<8x8xf32> to vector<1x1x8x8xf32>
    tpu.vector_store %arg26[%c0_131, %c2, %c0_132, %c0_133], %304 {strides = array<i32>} : memref<1x4x8x8xf32, #tpu.memory_space<vmem>>, vector<1x1x8x8xf32>,
    %c0_134 = arith.constant 0 : index
    %c3 = arith.constant 3 : index
    %c0_135 = arith.constant 0 : index
    %c0_136 = arith.constant 0 : index
    %305 = vector.load %arg26[%c0_134, %c3, %c0_135, %c0_136] : memref<1x4x8x8xf32, #tpu.memory_space<vmem>>, vector<1x1x8x8xf32>
    %306 = vector.shape_cast %305 : vector<1x1x8x8xf32> to vector<8x8xf32>
    %307 = vector.shape_cast %224 : vector<8x8xf32> to vector<1x1x8x8xf32>
    tpu.vector_store %arg26[%c0_134, %c3, %c0_135, %c0_136], %307 {strides = array<i32>} : memref<1x4x8x8xf32, #tpu.memory_space<vmem>>, vector<1x1x8x8xf32>,
    return
  }
  func.func @transform_0(%arg0: i32) -> (i32, i32, i32) {
    %c0_i32 = arith.constant 0 : i32
    %c0_i32_0 = arith.constant 0 : i32
    %c0_i32_1 = arith.constant 0 : i32
    return %arg0, %c0_i32, %c0_i32_0 : i32, i32, i32
  }
  func.func @transform_1(%arg0: i32) -> (i32, i32, i32) {
    %c0_i32 = arith.constant 0 : i32
    %c0_i32_0 = arith.constant 0 : i32
    %c0_i32_1 = arith.constant 0 : i32
    return %arg0, %c0_i32, %c0_i32_0 : i32, i32, i32
  }
  func.func @transform_2(%arg0: i32) -> (i32, i32, i32) {
    %c0_i32 = arith.constant 0 : i32
    %c0_i32_0 = arith.constant 0 : i32
    %c0_i32_1 = arith.constant 0 : i32
    return %arg0, %c0_i32, %c0_i32_0 : i32, i32, i32
  }
  func.func @transform_3(%arg0: i32) -> (i32, i32, i32) {
    %c0_i32 = arith.constant 0 : i32
    %c0_i32_0 = arith.constant 0 : i32
    %c0_i32_1 = arith.constant 0 : i32
    return %arg0, %c0_i32, %c0_i32_0 : i32, i32, i32
  }
  func.func @transform_4(%arg0: i32) -> (i32, i32) {
    %c0_i32 = arith.constant 0 : i32
    %c0_i32_0 = arith.constant 0 : i32
    %c0_i32_1 = arith.constant 0 : i32
    return %c0_i32, %c0_i32_0 : i32, i32
  }
  func.func @transform_5(%arg0: i32) -> (i32, i32) {
    %c0_i32 = arith.constant 0 : i32
    %c0_i32_0 = arith.constant 0 : i32
    %c0_i32_1 = arith.constant 0 : i32
    return %c0_i32, %c0_i32_0 : i32, i32
  }
  func.func @transform_6(%arg0: i32) -> (i32, i32) {
    %c0_i32 = arith.constant 0 : i32
    %c0_i32_0 = arith.constant 0 : i32
    %c0_i32_1 = arith.constant 0 : i32
    return %c0_i32, %c0_i32_0 : i32, i32
  }
  func.func @transform_7(%arg0: i32) -> (i32, i32) {
    %c0_i32 = arith.constant 0 : i32
    %c0_i32_0 = arith.constant 0 : i32
    %c0_i32_1 = arith.constant 0 : i32
    return %c0_i32, %c0_i32_0 : i32, i32
  }
  func.func @transform_8(%arg0: i32) -> (i32, i32) {
    %c0_i32 = arith.constant 0 : i32
    %c0_i32_0 = arith.constant 0 : i32
    %c0_i32_1 = arith.constant 0 : i32
    return %c0_i32, %c0_i32_0 : i32, i32
  }
  func.func @transform_9(%arg0: i32) -> (i32, i32) {
    %c0_i32 = arith.constant 0 : i32
    %c0_i32_0 = arith.constant 0 : i32
    %c0_i32_1 = arith.constant 0 : i32
    return %c0_i32, %c0_i32_0 : i32, i32
  }
  func.func @transform_10(%arg0: i32) -> (i32, i32) {
    %c0_i32 = arith.constant 0 : i32
    %c0_i32_0 = arith.constant 0 : i32
    %c0_i32_1 = arith.constant 0 : i32
    return %c0_i32, %c0_i32_0 : i32, i32
  }
  func.func @transform_11(%arg0: i32) -> (i32, i32) {
    %c0_i32 = arith.constant 0 : i32
    %c0_i32_0 = arith.constant 0 : i32
    %c0_i32_1 = arith.constant 0 : i32
    return %c0_i32, %c0_i32_0 : i32, i32
  }
  func.func @transform_12(%arg0: i32) -> (i32, i32) {
    %c0_i32 = arith.constant 0 : i32
    %c0_i32_0 = arith.constant 0 : i32
    %c0_i32_1 = arith.constant 0 : i32
    return %c0_i32, %c0_i32_0 : i32, i32
  }
  func.func @transform_13(%arg0: i32) -> (i32, i32) {
    %c0_i32 = arith.constant 0 : i32
    %c0_i32_0 = arith.constant 0 : i32
    %c0_i32_1 = arith.constant 0 : i32
    return %c0_i32, %c0_i32_0 : i32, i32
  }
  func.func @transform_14(%arg0: i32) -> (i32, i32) {
    %c0_i32 = arith.constant 0 : i32
    %c0_i32_0 = arith.constant 0 : i32
    %c0_i32_1 = arith.constant 0 : i32
    return %c0_i32, %c0_i32_0 : i32, i32
  }
  func.func @transform_15(%arg0: i32) -> (i32, i32) {
    %c0_i32 = arith.constant 0 : i32
    %c0_i32_0 = arith.constant 0 : i32
    %c0_i32_1 = arith.constant 0 : i32
    return %c0_i32, %c0_i32_0 : i32, i32
  }
  func.func @transform_16(%arg0: i32) -> (i32, i32) {
    %c0_i32 = arith.constant 0 : i32
    %c0_i32_0 = arith.constant 0 : i32
    %c0_i32_1 = arith.constant 0 : i32
    return %c0_i32, %c0_i32_0 : i32, i32
  }
  func.func @transform_17(%arg0: i32) -> (i32, i32) {
    %c0_i32 = arith.constant 0 : i32
    %c0_i32_0 = arith.constant 0 : i32
    %c0_i32_1 = arith.constant 0 : i32
    return %c0_i32, %c0_i32_0 : i32, i32
  }
  func.func @transform_18(%arg0: i32) -> (i32, i32) {
    %c0_i32 = arith.constant 0 : i32
    %c0_i32_0 = arith.constant 0 : i32
    %c0_i32_1 = arith.constant 0 : i32
    return %c0_i32, %c0_i32_0 : i32, i32
  }
  func.func @transform_19(%arg0: i32) -> (i32, i32) {
    %c0_i32 = arith.constant 0 : i32
    %c0_i32_0 = arith.constant 0 : i32
    %c0_i32_1 = arith.constant 0 : i32
    return %c0_i32, %c0_i32_0 : i32, i32
  }
  func.func @transform_20(%arg0: i32) -> (i32, i32) {
    %c0_i32 = arith.constant 0 : i32
    %c0_i32_0 = arith.constant 0 : i32
    %c0_i32_1 = arith.constant 0 : i32
    return %c0_i32, %c0_i32_0 : i32, i32
  }
  func.func @transform_21(%arg0: i32) -> (i32, i32) {
    %c0_i32 = arith.constant 0 : i32
    %c0_i32_0 = arith.constant 0 : i32
    %c0_i32_1 = arith.constant 0 : i32
    return %c0_i32, %c0_i32_0 : i32, i32
  }
  func.func @transform_22(%arg0: i32) -> (i32, i32) {
    %c0_i32 = arith.constant 0 : i32
    %c0_i32_0 = arith.constant 0 : i32
    %c0_i32_1 = arith.constant 0 : i32
    return %c0_i32, %c0_i32_0 : i32, i32
  }
  func.func @transform_23(%arg0: i32) -> (i32, i32) {
    %c0_i32 = arith.constant 0 : i32
    %c0_i32_0 = arith.constant 0 : i32
    %c0_i32_1 = arith.constant 0 : i32
    return %c0_i32, %c0_i32_0 : i32, i32
  }
  func.func @transform_24(%arg0: i32) -> (i32, i32, i32) {
    %c0_i32 = arith.constant 0 : i32
    %c0_i32_0 = arith.constant 0 : i32
    %c0_i32_1 = arith.constant 0 : i32
    return %arg0, %c0_i32, %c0_i32_0 : i32, i32, i32
  }
  func.func @transform_25(%arg0: i32) -> (i32, i32, i32, i32) {
    %c0_i32 = arith.constant 0 : i32
    %c0_i32_0 = arith.constant 0 : i32
    %c0_i32_1 = arith.constant 0 : i32
    %c0_i32_2 = arith.constant 0 : i32
    return %arg0, %c0_i32, %c0_i32_0, %c0_i32_1 : i32, i32, i32, i32
  }
}

</mosaic_0001>

<bundles_post_ra>
// kernel: decoder_forward.5
= control target key start
LH: loop header
LB: loop body
LE: loop exit
PB: predicated region body
PF: predicated region fallthrough
CT: control target
= control target key end

     0   :  { %s512_s12 = smov 0   ;;  %s514_s13 = smov 0   ;;  %s560_s0 = inlined_call_operand.vmem [shape: f32[16,32], index: 0, kind: input, shape index: {}]   ;;  %s561_s1 = inlined_call_operand.vmem [shape: f32[32,128], index: 1, kind: input, shape index: {}]   ;;  %s562_s2 = inlined_call_operand.vmem [shape: f32[1,128], index: 2, kind: input, shape index: {}]   ;;  %s563_s3 = inlined_call_operand.vmem [shape: f32[16,128], index: 3, kind: output, shape index: {}]  }
   0x1   :  { %s516_s14 = smov 0  }
   0x2 LB: > { %s25_s15 = sadd.s32 1, %s483_s13  ;;  %p409_p0 = scmp.ge.s32.totalorder %s487_s14, 1  ;;  %s487_s14 = sphi %s516_s14, %s13_s14   ;;  %s483_s13 = sphi %s514_s13, %s565_s13   ;;  %s479_s12 = sphi %s512_s12, %s564_s12  }
   0x3   : > { %p27_p1 = scmp.ge.s32.totalorder %s25_s15, 2  ;;  %p167_p2 = scmp.lt.s32.totalorder %s487_s14, 3 }
   0x5   : > { %s567_s15 = smov (%p27_p1, %s25_s15), 0  ;;  %p168_p3 = pnand %p409_p0, %p167_p2 }
   0x6   : > { %v218_v0 = vld [vmem:[%s561_s1] sm:$0xff] (!%p168_p3)  ;;  %v219_v1 = vld [vmem:[%s561_s1 + $0x8] sm:$0xff] (!%p168_p3)  ;;  %v220_v2 = vld [vmem:[%s561_s1 + $0x10] sm:$0xff] (!%p168_p3)  ;;  %v489_v3 = vmov (!%p168_p3), 0.0|0.0   ;;  %vm490_vm0 = vmmov (!%p168_p3), 0   ;;  %v491_v6 = vmov (!%p168_p3), 0.0  }
   0x7   : > { %171 = sbr.rel (%p168_p3) target bundleno = 233 (0xe9), region = 32  ;;  %432 = vmatprep.subr.bf16.mxu0 (!%p168_p3), %v489_v3  ;;  %v433_v4 = vpack.c.bf16 (!%p168_p3), %v219_v1, %v218_v0  ;;  %v221_v5 = vld [vmem:[%s561_s1 + $0x18] sm:$0xff] (!%p168_p3)  ;;  %429 = vmatprep.mubr.msk.f32.mxu0 (!%p168_p3), %vm490_vm0, %v491_v6  ;;  %p199_p4 = scmp.lt.s32.totalorder (!%p168_p3), %s479_s12, 1  ;;  %vm229_vm1 = vcmask (!%p168_p3), 261120   ;;  %v412_v9 = vld [vmem:[%s562_s2] ss:$0 sm:$0xff] (!%p168_p3) }
   0x8   : > { %v436_v7 = vpack.c.bf16 (!%p168_p3), %v221_v5, %v220_v2 }
   0x9   : > { %434 = vmatpush3.bf16.msra.mxu0 (!%p168_p3), %v433_v4 }
   0xa   : > { %435 = vmatprep.subr.bf16.mxu0 (!%p168_p3), %v489_v3 }
   0xd   : > { %437 = vmatpush3.bf16.msra.mxu0 (!%p168_p3), %v436_v7 }
   0xe   : > { %s569_s12 = smov (!%p199_p4, %s479_s12), 1 }
   0xf   : > { %s410_s24 = sshll.u32 %s569_s12, 3 }
  0x10   : > { %s202_s27 = scalar_lea.vmem %s560_s0, %s410_s24  ;;  %s216_s5 = scalar_lea.vmem %s563_s3, %s410_s24 }
  0x11   : > { %v217_v8 = vld [vmem:[%s202_s27] sm:$0xff] }
  0x12   : > { %430 = vmatmul.mubr.msk.f32.vlgmr.msra.gmra.mrb[0].mxu0 %vm229_vm1, %v217_v8 }
  0xe5   : > { %v299_v10 = vpop.f32.mrb[0].mxu0 }
  0xe6   : > { %v300_v11 = vadd.f32 %v412_v9, %v299_v10  ;;  %v431_v12 = vpop.f32.mrb[1].mxu0 }
  0xe8   : > { %303 = vst [vmem:[%s216_s5] sm:$0xff] %v300_v11 }
  0xe9 PF: > { %s13_s14 = sadd.s32 1, %s487_s14   ;;  %s564_s12 = smov %s483_s13 }
  0xea   : > { %p10_p5 = scmp.ge.s32.totalorder %s13_s14, 4   ;;  %s565_s13 = smov %s567_s15 }
  0xec   :  { %12 = sbr.rel (!%p10_p5) target bundleno = 2 (0x2), region = 68 }

// kernel: decoder_forward.4
= control target key start
LH: loop header
LB: loop body
LE: loop exit
PB: predicated region body
PF: predicated region fallthrough
CT: control target
= control target key end

     0   :  { %s4801_s0 = inlined_call_operand.vmem [shape: f32[2,8,32], index: 0, kind: input, shape index: {}]   ;;  %s4802_s1 = inlined_call_operand.vmem [shape: f32[2,8,32], index: 1, kind: input, shape index: {}]   ;;  %s4803_s2 = inlined_call_operand.vmem [shape: f32[2,8,8], index: 2, kind: input, shape index: {}]   ;;  %s4804_s3 = inlined_call_operand.vmem [shape: f32[2,8,8], index: 3, kind: input, shape index: {}]   ;;  %s4805_s4 = inlined_call_operand.vmem [shape: f32[32,96], index: 4, kind: input, shape index: {}]   ;;  %s4806_s5 = inlined_call_operand.vmem [shape: f32[1,96], index: 5, kind: input, shape index: {}]   ;;  %s4807_s6 = inlined_call_operand.vmem [shape: f32[32,32], index: 6, kind: input, shape index: {}]   ;;  %s4808_s7 = inlined_call_operand.vmem [shape: f32[1,32], index: 7, kind: input, shape index: {}]   ;;  %s4809_s8 = inlined_call_operand.vmem [shape: f32[32,32], index: 8, kind: input, shape index: {}]   ;;  %s4810_s9 = inlined_call_operand.vmem [shape: f32[1,32], index: 9, kind: input, shape index: {}]   ;;  %s4811_s10 = inlined_call_operand.vmem [shape: f32[32,64], index: 10, kind: input, shape index: {}]   ;;  %s4812_s11 = inlined_call_operand.vmem [shape: f32[1,64], index: 11, kind: input, shape index: {}]   ;;  %s4813_s12 = inlined_call_operand.vmem [shape: f32[32,32], index: 12, kind: input, shape index: {}]   ;;  %s4814_s13 = inlined_call_operand.vmem [shape: f32[1,32], index: 13, kind: input, shape index: {}]   ;;  %s4815_s14 = inlined_call_operand.vmem [shape: f32[32,64], index: 14, kind: input, shape index: {}]   ;;  %s4816_s15 = inlined_call_operand.vmem [shape: f32[1,64], index: 15, kind: input, shape index: {}]   ;;  %s4817_s16 = inlined_call_operand.vmem [shape: f32[64,32], index: 16, kind: input, shape index: {}]   ;;  %s4818_s17 = inlined_call_operand.vmem [shape: f32[1,32], index: 17, kind: input, shape index: {}]   ;;  %s4819_s18 = inlined_call_operand.vmem [shape: f32[1,32], index: 18, kind: input, shape index: {}]   ;;  %s4820_s19 = inlined_call_operand.vmem [shape: f32[1,32], index: 19, kind: input, shape index: {}]   ;;  %s4821_s20 = inlined_call_operand.vmem [shape: f32[1,32], index: 20, kind: input, shape index: {}]   ;;  %s4822_s21 = inlined_call_operand.vmem [shape: f32[1,32], index: 21, kind: input, shape index: {}]   ;;  %s4823_s22 = inlined_call_operand.hbm [shape: f32[1,32], index: 22, kind: input, shape index: {}]   ;;  %s4824_s23 = inlined_call_operand.hbm [shape: f32[1,32], index: 23, kind: input, shape index: {}]   ;;  %s4825_s24 = inlined_call_operand.vmem [shape: f32[2,8,32], index: 24, kind: output, shape index: {0}]   ;;  %s4826_s25 = inlined_call_operand.hbm [shape: f32[2,4,8,8], index: 25, kind: output, shape index: {1}]  }
   0x1   :  { %4850 = sst [smem:[#allocation17_spill]] %s4801_s0 }
   0x2   :  { %4851 = sst [smem:[#allocation18_spill]] %s4802_s1 }
   0x3   :  { %4852 = sst [smem:[#allocation19_spill]] %s4803_s2 }
   0x4   :  { %4853 = sst [smem:[#allocation20_spill]] %s4804_s3 }
   0x5   :  { %4854 = sst [smem:[#allocation21_spill]] %s4805_s4 }
   0x6   :  { %4855 = sst [smem:[#allocation22_spill]] %s4806_s5 }
   0x7   :  { %4856 = sst [smem:[#allocation23_spill]] %s4807_s6 }
   0x8   :  { %4857 = sst [smem:[#allocation24_spill]] %s4808_s7 }
   0x9   :  { %4858 = sst [smem:[#allocation25_spill]] %s4809_s8 }
   0xa   :  { %4859 = sst [smem:[#allocation26_spill]] %s4810_s9 }
   0xb   :  { %4860 = sst [smem:[#allocation27_spill]] %s4823_s22 }
   0xc   :  { %4861 = sst [smem:[#allocation28_spill]] %s4824_s23 }
   0xd   :  { %4862 = sst [smem:[#allocation29_spill]] %s4825_s24 }
   0xe   :  { %31 = vsyncpa [#allocation3], 0 }
   0xf   :  { %32 = vsyncpa [#allocation6], 0 }
  0x10   :  { %33 = vsyncpa [#allocation4], 0 }
  0x11   :  { %35 = vsyncpa [#allocation4 + $0x1], 0  ;;  %s4236_s29 = smov 0   ;;  %s4238_s2 = smov 0  }
  0x12   :  { %s4240_s6 = smov 0   ;;  %s4242_s30 = smov 0  }
  0x13 LB: > { %4863 = sst [smem:[#allocation11_spill]] %s4073_s29  ;;  %s4257_s7 = sadd.s32 4294967295, %s4085_s30   ;;  %s4085_s30 = sphi %s4242_s30, %s4904_s30   ;;  %s4081_s6 = sphi %s4240_s6, %s4906_s6   ;;  %s4077_s2 = sphi %s4238_s2, %s4908_s2   ;;  %s4073_s29 = sphi %s4236_s29, %s4907_s29  }
  0x14   : > { %4864 = sst [smem:[#allocation12_spill]] %s4081_s6  ;;  %s3476_s3 = sadd.s32 4294967294, %s4085_s30  }
  0x15   : > { %4865 = sst [smem:[#allocation13_spill]] %s4085_s30  ;;  %s4261_s26 = sadd.s32 1, %s4085_s30  }
  0x16   : > { %4866 = sst [smem:[#allocation14_spill]] %s4261_s26  ;;  %s598_s1 = sadd.s32 1, %s4081_s6 }
  0x17   : > { %s595_s8 = ssub.s32 %s4085_s30, %s4261_s26  ;;  %p608_p0 = scmp.ne.s32.totalorder %s4081_s6, %s4077_s2 }
  0x18   : > { %p596_p1 = scmp.eq.s32.totalorder %s595_s8, 0  ;;  %p609_p2 = scmp.eq.s32.totalorder %s4257_s7, 1 }
  0x19   : > { %p614_p3 = scmp.ne.s32.totalorder %s4077_s2, %s4073_s29  ;;  %p615_p4 = scmp.eq.s32.totalorder %s3476_s3, 1 }
  0x1a   : > { %s4272_s27 = scalar_select %p596_p1, %s4081_s6, %s598_s1  }
  0x1b   : > { %p4274_p5 = por %p609_p2, %p608_p0  ;;  %p4278_p6 = por %p615_p4, %p614_p3 }
  0x1c   : > { %4867 = sst [smem:[#allocation15_spill]] %s4272_s27  ;;  %p3477_p7 = scmp.ge.s32.totalorder %s4085_s30, 1 }
  0x1d   : > { %s4868_s4 = scalar_select %p4274_p5, 1, 0 }
  0x1e   : > { %s4869_s28 = scalar_select %p4278_p6, 1, 0 }
  0x1f   : > { %p622_p8 = scmp.lt.s32.totalorder %s4085_s30, 3  ;;  %p4836_p9 = scmp.eq.s32.totalorder %s4257_s7, 0 }
  0x20   : > { %4870 = sst [smem:[#allocation16_spill]] %s4869_s28  ;;  %s4087_s5 = smov [#allocation2]  }
  0x21   : > { %p4285_p10 = pnand %p3477_p7, %p622_p8  ;;  %s689_s0 = sshll.u32 %s4087_s5, 4  ;;  %s690_s0 = int_to_ptr.vmem [resolvable:$true] %s689_s0 }
  0x22   : > { %s4088_s3 = smov [#allocation5]   ;;  %s4873_s22 = sld [smem:[#allocation27_spill]] }
  0x23   : > { %s4871_s9 = scalar_select %p4285_p10, 1, 0 }
  0x24   : > { %p3855_p11 = pneg %p4285_p10  ;;  %s700_s1 = sshll.u32 %s4088_s3, 4  ;;  %s4297_s1 = int_to_ptr.vmem [resolvable:$true] %s700_s1 }
  0x26   : > { %p4293_p12 = pnand %p4836_p9, %p3855_p11 }
  0x28   : > { %s3959_s26 = scalar_lea.hbm %s4873_s22, 16  ;;  %p3961_p0 = pneg %p4293_p12 }
  0x29   : > { %p3960_p13 = scmp.ne.s32.totalorder %s4873_s22, %s3959_s26  ;;  %p3966_p3 = scmp.lt.u32.totalorder %s3959_s26, %s4873_s22 }
  0x2b   : > { %p3962_p1 = pnand %p3961_p0, %p3960_p13 }
  0x2d   : > { %p3963_p2 = pneg %p3962_p1 }
  0x2f   : > { %p3968_p4 = pnand %p3966_p3, %p3963_p2 }
  0x31   : > { %3971 = shalt.err (!%p3968_p4)
}
  0x32   : > { %s3972_s30 = scalar_lea.vmem %s690_s0, 16  ;;  %s3979_s6 = scalar_lea.vmem %s690_s0, 32 }
  0x33   : > { %p3973_p7 = scmp.ne.s32.totalorder %s690_s0, %s3972_s30  ;;  %p3980_p9 = scmp.lt.s32.totalorder %s690_s0, %s690_s0 }
  0x34   : > { %p3981_p6 = scmp.lt.s32.totalorder %s3979_s6, %s3972_s30 }
  0x35   : > { %p3975_p8 = pnand %p3973_p7, %p3961_p0 }
  0x36   : > { %p3982_p5 = por %p3981_p6, %p3980_p9 }
  0x37   : > { %p3976_p11 = pneg %p3975_p8 }
  0x39   : > { %p3983_p10 = pnand %p3982_p5, %p3976_p11 }
  0x3b   : > { %3986 = shalt.err (!%p3983_p10)
}
  0x3c   : > { %3858 = dma.hbm_to_vmem [thread:$0]  (!%p4293_p12), %s4873_s22, 16, %s690_s0, [#allocation3]  }
  0x3d   : > { %s4874_s23 = sld [smem:[#allocation28_spill]] }
  0x43   : > { %s3987_s5 = scalar_lea.hbm %s4874_s23, 16 }
  0x44   : > { %p3988_p13 = scmp.ne.s32.totalorder %s4874_s23, %s3987_s5  ;;  %p3994_p9 = scmp.lt.u32.totalorder %s3987_s5, %s4874_s23 }
  0x46   : > { %p3990_p6 = pnand %p3988_p13, %p3961_p0 }
  0x48   : > { %p3991_p5 = pneg %p3990_p6 }
  0x4a   : > { %p3996_p10 = pnand %p3994_p9, %p3991_p5 }
  0x4c   : > { %3999 = shalt.err (!%p3996_p10)
}
  0x4d   : > { %s4000_s0 = scalar_lea.vmem %s4297_s1, 16  ;;  %s4007_s24 = scalar_lea.vmem %s4297_s1, 32 }
  0x4e   : > { %p4001_p1 = scmp.ne.s32.totalorder %s4297_s1, %s4000_s0  ;;  %p4008_p4 = scmp.lt.s32.totalorder %s4297_s1, %s4297_s1 }
  0x4f   : > { %p4009_p7 = scmp.lt.s32.totalorder %s4007_s24, %s4000_s0 }
  0x50   : > { %p4003_p2 = pnand %p4001_p1, %p3961_p0 }
  0x51   : > { %p4010_p8 = por %p4009_p7, %p4008_p4 }
  0x52   : > { %p4004_p3 = pneg %p4003_p2 }
  0x54   : > { %p4011_p11 = pnand %p4010_p8, %p4004_p3 }
  0x56   : > { %4014 = shalt.err (!%p4011_p11)
}
  0x57   : > { %3861 = dma.hbm_to_vmem [thread:$0]  (!%p4293_p12), %s4874_s23, 16, %s4297_s1, [#allocation6]  }
  0x58   : > { %p4875_p13 = scmp.ne.s32.totalorder %s4871_s9, 0 }
  0x59   : > { %p4876_p0 = scmp.eq.s32.totalorder (!%p4875_p13), %s4257_s7, 0 }
  0x5a   : > { %741 = sbr.rel (%p4875_p13) target bundleno = 6624 (0x19e0), region = 116 }
  0x61   : > { %4060 = dma.done.wait (%p4876_p0), [#allocation3], 16   ;;  %p4877_p6 = pmov %p4876_p0 }
  0x62   : > { %p4878_p5 = pmov %p4876_p0 }
  0x63   : > { %4062 = vsyncadd (%p4877_p6), [#allocation3], 4294967280 }
  0x64   : > { %4064 = dma.done.wait (%p4878_p5), [#allocation6], 16   ;;  %p4879_p9 = pmov %p4876_p0 }
  0x65   : > { %p828_p10 = scmp.lt.s32.totalorder %s4257_s7, 1  ;;  %v4089_v0 = vmov 0.0|0.0   ;;  %vm4090_vm0 = vmmov 0   ;;  %v4091_v1 = vmov 0.0   ;;  %s4880_s26 = sld [smem:[#allocation21_spill]]  ;;  %vm863_vm1 = vcmask 261120  }
  0x66   : > { %4066 = vsyncadd (%p4879_p9), [#allocation6], 4294967280  ;;  %3809 = vmatprep.subr.bf16.mxu0 %v4089_v0  ;;  %3634 = vmatprep.mubr.msk.f32.mxu0 %vm4090_vm0, %v4091_v1  ;;  %s4881_s1 = sld [smem:[#allocation17_spill]]  ;;  %s4882_s5 = sld [smem:[#allocation22_spill]]  ;;  %vm946_vm2 = vcmask 64512   ;;  %vm3199_vm3 = vcmask 523264  }
  0x67   : > { %3642 = vmatprep.subr.mxu1 %v4091_v1  ;;  %3644 = vmatprep.mubr.msk.f32.mxu1 %vm4090_vm0, %v4091_v1  ;;  %s829_s9 = scalar_select %p828_p10, %s4257_s7, 1 }
  0x68   : > { %s4843_s3 = smov 96   ;;  %s4847_s30 = smov 120  }
  0x69   : > { %s4377_s24 = sshll.u32 %s829_s9, 3  ;;  %s4846_s6 = smov 88  }
  0x6a   : > { %s4883_s29 = sld [smem:[#allocation19_spill]]  ;;  %s4096_s9 = smov 64  }
  0x6b   : > { %v852_v2 = vld [vmem:[%s4880_s26] sm:$0xff]  ;;  %v853_v3 = vld [vmem:[%s4880_s26 + $0x8] sm:$0xff]  ;;  %v854_v4 = vld [vmem:[%s4880_s26 + $0x10] sm:$0xff]  ;;  %s4840_s28 = smov 80   ;;  %s4839_s0 = smov 72  }
  0x6c   : > { %v3810_v5 = vpack.c.bf16 %v853_v3, %v852_v2  ;;  %v855_v6 = vld [vmem:[%s4880_s26 + $0x18] sm:$0xff]  ;;  %s831_s8 = scalar_lea.vmem %s4881_s1, %s4377_s24  ;;  %v3490_v9 = vld [vmem:[%s4882_s5] ss:$0 sm:$0xff]  ;;  %s4844_s5 = smov 112  }
  0x6d   : > { %v3813_v7 = vpack.c.bf16 %v855_v6, %v854_v4  ;;  %v4384_v8 = vld [vmem:[%s831_s8] sm:$0xff]  ;;  %s4095_s8 = smov 56   ;;  %s4841_s27 = smov 104  }
  0x6e   : > { %3811 = vmatpush3.bf16.msra.mxu0 %v3810_v5  ;;  %s4888_s22 = sld [smem:[#allocation18_spill]]  ;;  %p4898_p1 = scmp.ne.s32.totalorder %s4868_s4, 0 }
  0x6f   : > { %3812 = vmatprep.subr.bf16.mxu0 %v4089_v0 }
  0x70   : > { %s839_s1 = scalar_lea.vmem %s4883_s29, %s4377_s24  ;;  %s4884_s29 = sld [smem:[#allocation23_spill]] }
  0x71   : > { %v4420_v17 = vld [vmem:[%s839_s1] sm:$0xff] }
  0x72   : > { %3814 = vmatpush3.bf16.msra.mxu0 %v3813_v7 }
  0x73   : > { %3637 = vmatprep.subr.mxu0 %v4091_v1 }
  0x74   : > { %s835_s23 = scalar_lea.vmem %s4888_s22, %s4377_s24  ;;  %s4891_s22 = sld [smem:[#allocation20_spill]] }
  0x75   : > { %3635 = vmatmul.mubr.msk.f32.vlgmr.msra.gmra.mrb[0].mxu0 %vm863_vm1, %v4384_v8 }
  0x76   : > { %3639 = vmatprep.mubr.msk.f32.mxu0 %vm4090_vm0, %v4091_v1  ;;  %s4885_s1 = smov %s4884_s29  ;;  %v938_v36 = vld [vmem:[%s4884_s29 + $0x8] sm:$0xff]  ;;  %s4101_s29 = smov 48  }
  0x77   : > { %v937_v45 = vld [vmem:[%s4885_s1] sm:$0xff] }
 0x148   : > { %v933_v10 = vpop.f32.mrb[0].mxu0 }
 0x149   : > { %v4394_v11 = vadd.f32 %v3490_v9, %v933_v10  ;;  %v3636_v12 = vpop.f32.mrb[1].mxu0 }
 0x14a   : > { %v939_v12 = vld [vmem:[%s4885_s1 + $0x10] sm:$0xff] }
 0x14b   : > { %944 = vrot.lane.b32.xlu0 %v4394_v11, %s4843_s3  ;;  %v4399_v13 = vmul.f32 0.35355338, %v4394_v11  ;;  %s4887_s3 = sld [smem:[#allocation25_spill]] }
 0x14d   : > { %1109 = vrot.lane.b32.xlu1 %v4399_v13, %s4847_s30  ;;  %s843_s30 = scalar_lea.vmem %s4891_s22, %s4377_s24  ;;  %s4895_s22 = smov 104  }
 0x14f   : > { %1111 = vrot.lane.b32.xlu0 %v4394_v11, %s4846_s6  ;;  %s4890_s6 = sld [smem:[#allocation26_spill]] }
 0x1bd   : > { %v945_v14 = vpop.permute.xlu0 %944 }
 0x1be   : > { %3638 = vmatpush3.xpose.msk.msra.mxu0 %vm946_vm2, %v945_v14 }
 0x1bf   : > { %3647 = vmatprep.subr.mxu0 %v4091_v1  ;;  %v1110_v16 = vpop.permute.xlu1 %1109 }
 0x1c1   : > { %v1112_v15 = vpop.permute.xlu0 %1111  ;;  %3640 = vmatmul.mubr.msk.f32.vlgmr.msra.gmra.mrb[2].mxu0 %vm946_vm2, %v4399_v13 }
 0x1c2   : > { %3648 = vmatpush3.xpose.msk.msra.mxu0 %vm946_vm2, %v1112_v15  ;;  %3649 = vmatprep.mubr.msk.f32.mxu0 %vm4090_vm0, %v4091_v1 }
 0x1c3   : > { %3657 = vmatprep.subr.mxu0 %v4091_v1 }
 0x1c5   : > { %3650 = vmatmul.mubr.msk.f32.vlgmr.msra.gmra.mrb[4].mxu0 %vm946_vm2, %v1110_v16 }
 0x1c6   : > { %3659 = vmatprep.mubr.msk.f32.mxu0 %vm4090_vm0, %v4091_v1  ;;  %3658 = vmatpush3.msra.mxu0 %v938_v36 }
 0x1c7   : > { %3667 = vmatprep.subr.mxu0 %v4091_v1 }
 0x294   : > { %v1018_v18 = vpop.f32.mrb[2].mxu0 }
 0x295   : > { %v1019_v19 = vadd.f32 %v1018_v18, %v4420_v17  ;;  %v3641_v20 = vpop.f32.mrb[3].mxu0 }
 0x297   : > { %v1022_v21 = vsel %vm946_vm2, %v1019_v19, -inf }
 0x298   : > { %1023 = vmax.xlane.f32.xlu1 %v1022_v21  ;;  %v1183_v22 = vpop.f32.mrb[4].mxu0 }
 0x299   : > { %v1184_v23 = vadd.f32 %v1183_v22, %v4420_v17  ;;  %v3651_v24 = vpop.f32.mrb[5].mxu0 }
 0x29b   : > { %v1187_v25 = vsel %vm946_vm2, %v1184_v23, -inf }
 0x29c   : > { %1188 = vmax.xlane.f32.xlu0 %v1187_v25 }
 0x325   : > { %v1024_v26 = vpop.xlane.xlu1 %1023 }
 0x326   : > { %v1025_v27 = vsub.f32 %v1019_v19, %v1024_v26 }
 0x328   : > { %v1026_v28 = vmul.f32 1.442695, %v1025_v27 }
 0x329   : > { %v1189_v29 = vpop.xlane.xlu0 %1188 }
 0x32a   : > { %3921 = vpow2.f32 %v1026_v28  ;;  %v1190_v30 = vsub.f32 %v1184_v23, %v1189_v29 }
 0x32c   : > { %v1191_v31 = vmul.f32 1.442695, %v1190_v30 }
 0x32e   : > { %3923 = vpow2.f32 %v1191_v31 }
 0x334   : > { %v3922_v32 = vpop.eup %3921 }
 0x335   : > { %v1028_v33 = vsel %vm946_vm2, %v3922_v32, 0.0 }
 0x336   : > { %1029 = vadd.xlane.f32.xlu0 %v1028_v33 }
 0x338   : > { %v3924_v34 = vpop.eup %3923 }
 0x339   : > { %v1193_v35 = vsel %vm946_vm2, %v3924_v34, 0.0 }
 0x33a   : > { %1194 = vadd.xlane.f32.xlu1 %v1193_v35 }
 0x34b   : > { %1198 = vrot.lane.b32.xlu1 %v4394_v11, %s4095_s8  ;;  %s4889_s8 = smov 120  }
 0x34c   : > { %1033 = vrot.lane.b32.xlu0 %v4394_v11, %s4096_s9  ;;  %s4886_s9 = sld [smem:[#allocation24_spill]] }
 0x34f   : > { %1422 = vrot.lane.b32.xlu1 %v4394_v11, %s4840_s28 }
 0x350   : > { %1420 = vrot.lane.b32.xlu0 %v4399_v13, %s4844_s5 }
 0x352   : > { %v3508_v33 = vld [vmem:[%s4886_s9] ss:$0 sm:$0xff] }
 0x3c3   : > { %v1030_v37 = vpop.xlane.xlu0 %1029 }
 0x3c4   : > { %3925 = vrcp.f32 %v1030_v37 }
 0x3c7   : > { %v1195_v38 = vpop.xlane.xlu1 %1194  ;;  %v1034_v39 = vpop.permute.xlu0 %1033 }
 0x3c8   : > { %3927 = vrcp.f32 %v1195_v38  ;;  %3643 = vmatpush3.msra.mxu1 %v1034_v39 }
 0x3c9   : > { %3652 = vmatprep.subr.mxu1 %v4091_v1 }
 0x3cb   : > { %v1199_v42 = vpop.permute.xlu1 %1198  ;;  %v1421_v51 = vpop.permute.xlu0 %1420 }
 0x3ce   : > { %v3926_v40 = vpop.eup %3925 }
 0x3cf   : > { %v1032_v41 = vmul.f32 %v3926_v40, %v3922_v32  ;;  %v1423_v49 = vpop.permute.xlu1 %1422 }
 0x3d1   : > { %3645 = vmatmul.mubr.msk.f32.vlgmr.msra.gmra.mrb[0].mxu1 %vm946_vm2, %v1032_v41 }
 0x3d2   : > { %v3928_v43 = vpop.eup %3927  ;;  %3653 = vmatpush3.msra.mxu1 %v1199_v42  ;;  %3654 = vmatprep.mubr.msk.f32.mxu1 %vm4090_vm0, %v4091_v1 }
 0x3d3   : > { %v1197_v44 = vmul.f32 %v3928_v43, %v3924_v34  ;;  %3662 = vmatprep.subr.mxu1 %v4091_v1 }
 0x3d5   : > { %3655 = vmatmul.mubr.msk.f32.vlgmr.msra.gmra.mrb[2].mxu1 %vm946_vm2, %v1197_v44 }
 0x3d6   : > { %3664 = vmatprep.mubr.msk.f32.mxu1 %vm4090_vm0, %v4091_v1  ;;  %3663 = vmatpush3.msra.mxu1 %v937_v45  ;;  %v2020_v45 = vld [vmem:[%s4811_s10] sm:$0xff] }
 0x3d7   : > { %3672 = vmatprep.subr.mxu1 %v4091_v1 }
 0x4a4   : > { %v1105_v46 = vpop.f32.mrb[0].mxu1 }
 0x4a5   : > { %v3646_v47 = vpop.f32.mrb[1].mxu1  ;;  %3665 = vmatmul.mubr.msk.f32.vlgmr.msra.gmra.mrb[4].mxu1 %vm946_vm2, %v1105_v46  ;;  %v2021_v46 = vld [vmem:[%s4811_s10 + $0x8] sm:$0xff] }
 0x4a6   : > { %3674 = vmatprep.mubr.msk.f32.mxu1 %vm4090_vm0, %v4091_v1  ;;  %v1936_v47 = vld [vmem:[%s4887_s3] sm:$0xff] }
 0x4a8   : > { %v1270_v48 = vpop.f32.mrb[2].mxu1 }
 0x4a9   : > { %v3656_v50 = vpop.f32.mrb[3].mxu1  ;;  %3660 = vmatmul.mubr.msk.f32.vlgmr.msra.gmra.mrb[6].mxu0 %vm946_vm2, %v1270_v48  ;;  %v1937_v48 = vld [vmem:[%s4887_s3 + $0x8] sm:$0xff] }
 0x4aa   : > { %3668 = vmatpush3.xpose.msk.msra.mxu0 %vm946_vm2, %v1423_v49  ;;  %3669 = vmatprep.mubr.msk.f32.mxu0 %vm4090_vm0, %v4091_v1  ;;  %v3816_v49 = vpack.c.bf16 %v1937_v48, %v1936_v47  ;;  %v2022_v50 = vld [vmem:[%s4811_s10 + $0x10] sm:$0xff] }
 0x4ab   : > { %3677 = vmatprep.subr.mxu0 %v4091_v1 }
 0x4ad   : > { %3670 = vmatmul.mubr.msk.f32.vlgmr.msra.gmra.mrb[8].mxu0 %vm946_vm2, %v1421_v51  ;;  %v2023_v51 = vld [vmem:[%s4811_s10 + $0x18] sm:$0xff] }
 0x4ae   : > { %3679 = vmatprep.mubr.msk.f32.mxu0 %vm4090_vm0, %v4091_v1  ;;  %3678 = vmatpush3.msra.mxu0 %v939_v12 }
 0x4af   : > { %3687 = vmatprep.subr.mxu0 %v4091_v1 }
 0x578   : > { %v1416_v52 = vpop.f32.mrb[4].mxu1 }
 0x579   : > { %v3666_v53 = vpop.f32.mrb[5].mxu1 }
 0x57a   : > { %v1938_v53 = vld [vmem:[%s4887_s3 + $0x10] sm:$0xff] }
 0x57c   : > { %v1343_v54 = vpop.f32.mrb[6].mxu0 }
 0x57d   : > { %v4461_v55 = vadd.f32 %v1416_v52, %v1343_v54  ;;  %v3661_v56 = vpop.f32.mrb[7].mxu0  ;;  %v3825_v52 = vpack.c.bf16 %v2023_v51, %v2022_v50  ;;  %v1939_v54 = vld [vmem:[%s4887_s3 + $0x18] sm:$0xff] }
 0x57e   : > { %v849_v56 = vld [vmem:[%s835_s23] sm:$0xff]  ;;  %s4892_s23 = smov 88  }
 0x580   : > { %v1494_v57 = vpop.f32.mrb[8].mxu0 }
 0x581   : > { %v1495_v58 = vadd.f32 %v1494_v57, %v4420_v17  ;;  %v3671_v59 = vpop.f32.mrb[9].mxu0 }
 0x583   : > { %v1498_v60 = vsel %vm946_vm2, %v1495_v58, -inf }
 0x584   : > { %1499 = vmax.xlane.f32.xlu1 %v1498_v60 }
 0x595   : > { %1661 = vrot.lane.b32.xlu1 %v4394_v11, %s4839_s0  ;;  %s4894_s0 = smov 96  }
 0x599   : > { %1659 = vrot.lane.b32.xlu1 %v4399_v13, %s4841_s27 }
 0x611   : > { %v1500_v61 = vpop.xlane.xlu1 %1499 }
 0x612   : > { %v1501_v62 = vsub.f32 %v1495_v58, %v1500_v61  ;;  %v3509_v61 = vld [vmem:[%s4819_s18] ss:$0 sm:$0xff] }
 0x614   : > { %v1502_v63 = vmul.f32 1.442695, %v1501_v62 }
 0x615   : > { %v1662_v7 = vpop.permute.xlu1 %1661 }
 0x616   : > { %3929 = vpow2.f32 %v1502_v63  ;;  %v3510_v63 = vld [vmem:[%s4820_s19] ss:$0 sm:$0xff] }
 0x619   : > { %v1660_v10 = vpop.permute.xlu1 %1659 }
 0x620   : > { %v3930_v2 = vpop.eup %3929 }
 0x621   : > { %v1504_v3 = vsel %vm946_vm2, %v3930_v2, 0.0 }
 0x622   : > { %1505 = vadd.xlane.f32.xlu0 %v1504_v3 }
 0x638   : > { %1509 = vrot.lane.b32.xlu0 %v4394_v11, %s4101_s29  ;;  %s4102_s29 = smov 40  }
 0x6af   : > { %v1506_v4 = vpop.xlane.xlu0 %1505 }
 0x6b0   : > { %3931 = vrcp.f32 %v1506_v4  ;;  %v3513_v4 = vld [vmem:[%s4812_s11] ss:$0 sm:$0xff] }
 0x6b3   : > { %v1510_v5 = vpop.permute.xlu0 %1509 }
 0x6b4   : > { %3673 = vmatpush3.msra.mxu1 %v1510_v5 }
 0x6b5   : > { %3682 = vmatprep.subr.mxu1 %v4091_v1 }
 0x6ba   : > { %v3932_v6 = vpop.eup %3931 }
 0x6bb   : > { %v1508_v9 = vmul.f32 %v3932_v6, %v3930_v2 }
 0x6bd   : > { %3675 = vmatmul.mubr.msk.f32.vlgmr.msra.gmra.mrb[6].mxu1 %vm946_vm2, %v1508_v9  ;;  %v3511_v9 = vld [vmem:[%s4890_s6] ss:$0 sm:$0xff] }
 0x6be   : > { %3683 = vmatpush3.xpose.msk.msra.mxu1 %vm946_vm2, %v1662_v7  ;;  %3684 = vmatprep.mubr.msk.f32.mxu1 %vm4090_vm0, %v4091_v1 }
 0x6bf   : > { %3692 = vmatprep.subr.mxu1 %v4091_v1 }
 0x6c1   : > { %3685 = vmatmul.mubr.msk.f32.vlgmr.msra.gmra.mrb[8].mxu1 %vm946_vm2, %v1660_v10 }
 0x6c2   : > { %3694 = vmatprep.mubr.msk.f32.mxu1 %vm4090_vm0, %v4091_v1 }
 0x790   : > { %v1581_v13 = vpop.f32.mrb[6].mxu1 }
 0x791   : > { %v3676_v14 = vpop.f32.mrb[7].mxu1  ;;  %3680 = vmatmul.mubr.msk.f32.vlgmr.msra.gmra.mrb[10].mxu0 %vm946_vm2, %v1581_v13 }
 0x792   : > { %3689 = vmatprep.mubr.msk.f32.mxu0 %vm4090_vm0, %v4091_v1 }
 0x794   : > { %v1733_v15 = vpop.f32.mrb[8].mxu1 }
 0x795   : > { %v1734_v16 = vadd.f32 %v1733_v15, %v4420_v17  ;;  %v3686_v18 = vpop.f32.mrb[9].mxu1  ;;  %v940_v17 = vld [vmem:[%s4885_s1 + $0x18] sm:$0xff]  ;;  %s4893_s1 = smov 112  }
 0x796   : > { %3693 = vmatpush3.msra.mxu1 %v940_v17  ;;  %v4586_v18 = vld [vmem:[%s843_s30] sm:$0xff]  ;;  %s4896_s30 = smov 80  }
 0x797   : > { %v1737_v19 = vsel %vm946_vm2, %v1734_v16, -inf  ;;  %3821 = vmatprep.subr.bf16.mxu1 %v4089_v0 }
 0x798   : > { %1738 = vmax.xlane.f32.xlu0 %v1737_v19 }
 0x7ae   : > { %1748 = vrot.lane.b32.xlu0 %v4394_v11, %s4102_s29  ;;  %s825_s29 = sand.u32 1, %s4077_s2  }
 0x7af   : > { %s4755_s27 = scalar_lea.sflag [#allocation4], %s825_s29 }
 0x825   : > { %v1739_v20 = vpop.xlane.xlu0 %1738 }
 0x826   : > { %v1740_v21 = vsub.f32 %v1734_v16, %v1739_v20 }
 0x828   : > { %v1741_v22 = vmul.f32 1.442695, %v1740_v21 }
 0x829   : > { %v1749_v23 = vpop.permute.xlu0 %1748 }
 0x82a   : > { %3933 = vpow2.f32 %v1741_v22  ;;  %3688 = vmatpush3.msra.mxu0 %v1749_v23 }
 0x82b   : > { %3815 = vmatprep.subr.bf16.mxu0 %v4089_v0 }
 0x834   : > { %v3934_v24 = vpop.eup %3933 }
 0x835   : > { %v1743_v25 = vsel %vm946_vm2, %v3934_v24, 0.0 }
 0x836   : > { %1744 = vadd.xlane.f32.xlu1 %v1743_v25 }
 0x864   : > { %v1654_v11 = vpop.f32.mrb[10].mxu0 }
 0x865   : > { %v1658_v26 = vadd.f32 %v1654_v11, %v4461_v55  ;;  %v3681_v27 = vpop.f32.mrb[11].mxu0  ;;  %v3819_v55 = vpack.c.bf16 %v1939_v54, %v1938_v53 }
 0x8c3   : > { %v1745_v28 = vpop.xlane.xlu1 %1744 }
 0x8c4   : > { %3935 = vrcp.f32 %v1745_v28 }
 0x8ce   : > { %v3936_v29 = vpop.eup %3935 }
 0x8cf   : > { %v1747_v30 = vmul.f32 %v3936_v29, %v3934_v24 }
 0x8d1   : > { %3690 = vmatmul.mubr.msk.f32.vlgmr.msra.gmra.mrb[12].mxu0 %vm946_vm2, %v1747_v30 }
 0x8d2   : > { %3705 = vmatprep.mubr.msk.f32.mxu0 %vm4090_vm0, %v4091_v1  ;;  %3817 = vmatpush3.bf16.msra.mxu0 %v3816_v49 }
 0x8d3   : > { %3818 = vmatprep.subr.bf16.mxu0 %v4089_v0 }
 0x8d6   : > { %3820 = vmatpush3.bf16.msra.mxu0 %v3819_v55 }
 0x8d7   : > { %3719 = vmatprep.subr.mxu0 %v4091_v1 }
 0x9a4   : > { %v1820_v31 = vpop.f32.mrb[12].mxu0 }
 0x9a5   : > { %v3691_v32 = vpop.f32.mrb[13].mxu0  ;;  %3695 = vmatmul.mubr.msk.f32.vlgmr.msra.gmra.mrb[10].mxu1 %vm946_vm2, %v1820_v31 }
 0x9a6   : > { %3716 = vmatprep.mubr.msk.f32.mxu1 %vm4090_vm0, %v4091_v1 }
 0xa78   : > { %v1893_v34 = vpop.f32.mrb[10].mxu1 }
 0xa79   : > { %v1897_v35 = vadd.f32 %v1893_v34, %v1658_v26  ;;  %v3696_v36 = vpop.f32.mrb[11].mxu1 }
 0xa7b   : > { %v1904_v37 = vadd.f32 %v3508_v33, %v1897_v35 }
 0xa7d   : > { %v1905_v38 = vadd.f32 %v1904_v37, %v4384_v8  ;;  %v3822_v8 = vpack.c.bf16 %v2021_v46, %v2020_v45 }
 0xa7f   : > { %v1908_v39 = vsel %vm863_vm1, %v1905_v38, 0.0  ;;  %3823 = vmatpush3.bf16.msra.mxu1 %v3822_v8 }
 0xa80   : > { %1909 = vadd.xlane.f32.xlu1 %v1908_v39  ;;  %3824 = vmatprep.subr.bf16.mxu1 %v4089_v0 }
 0xa83   : > { %3826 = vmatpush3.bf16.msra.mxu1 %v3825_v52 }
 0xa84   : > { %3724 = vmatprep.subr.mxu1 %v4091_v1 }
 0xa86   : > { %3717 = vmatmul.mubr.msk.f32.vlgmr.msra.gmra.mrb[12].mxu1 %vm863_vm1, %v849_v56 }
 0xa87   : > { %3726 = vmatprep.mubr.msk.f32.mxu1 %vm4090_vm0, %v4091_v1 }
 0xb0d   : > { %v1910_v40 = vpop.xlane.xlu1 %1909 }
 0xb0e   : > { %v1912_v41 = vmul.f32 0.03125, %v1910_v40 }
 0xb10   : > { %v1913_v42 = vsub.f32 %v1905_v38, %v1912_v41 }
 0xb12   : > { %v1914_v43 = vmul.f32 %v1913_v42, %v1913_v42 }
 0xb14   : > { %v1915_v44 = vsel %vm863_vm1, %v1914_v43, 0.0  ;;  %v2104_v43 = vld [vmem:[%s4813_s12] sm:$0xff] }
 0xb15   : > { %1916 = vadd.xlane.f32.xlu1 %v1915_v44  ;;  %v2105_v44 = vld [vmem:[%s4813_s12 + $0x8] sm:$0xff] }
 0xb59   : > { %v2100_v5 = vpop.f32.mrb[12].mxu1 }
 0xb5a   : > { %v4559_v6 = vadd.f32 %v3513_v4, %v2100_v5  ;;  %v3718_v7 = vpop.f32.mrb[13].mxu1 }
 0xb5c   : > { %2275 = vrot.lane.b32.xlu1 %v4559_v6, %s4889_s8 }
 0xba2   : > { %v1917_v57 = vpop.xlane.xlu1 %1916 }
 0xba3   : > { %v1918_v58 = vmul.f32 0.03125, %v1917_v57 }
 0xba5   : > { %v1919_v59 = vadd.f32 1e-05, %v1918_v58 }
 0xba7   : > { %3937 = vrsqrt.f32 %v1919_v59 }
 0xbb1   : > { %v3938_v60 = vpop.eup %3937 }
 0xbb2   : > { %v1921_v62 = vmul.f32 %v3938_v60, %v1913_v42 }
 0xbb4   : > { %v1928_v2 = vmul.f32 %v3509_v61, %v1921_v62 }
 0xbb6   : > { %v4550_v3 = vadd.f32 %v3510_v63, %v1928_v2 }
 0xbb8   : > { %3706 = vmatmul.mubr.msk.f32.vlgmr.msra.gmra.mrb[14].mxu0 %vm863_vm1, %v4550_v3 }
 0xbb9   : > { %3721 = vmatprep.mubr.msk.f32.mxu0 %vm4090_vm0, %v4091_v1  ;;  %3720 = vmatpush3.xpose.msk.msra.mxu0 %vm946_vm2, %v4559_v6 }
 0xbba   : > { %3729 = vmatprep.subr.mxu0 %v4091_v1 }
 0xbce   : > { %v2276_v15 = vpop.permute.xlu1 %2275 }
 0xc8b   : > { %v2016_v10 = vpop.f32.mrb[14].mxu0 }
 0xc8c   : > { %v2017_v12 = vadd.f32 %v3511_v9, %v2016_v10  ;;  %v3707_v13 = vpop.f32.mrb[15].mxu0 }
 0xc8e   : > { %v4569_v14 = vmul.f32 0.35355338, %v2017_v12  ;;  %v2106_v12 = vld [vmem:[%s4813_s12 + $0x10] sm:$0xff] }
 0xc90   : > { %2273 = vrot.lane.b32.xlu0 %v4569_v14, %s4889_s8  ;;  %3722 = vmatmul.mubr.msk.f32.vlgmr.msra.gmra.mrb[16].mxu0 %vm946_vm2, %v4569_v14  ;;  %s3484_s8 = sshll.u32 %s825_s29, 5 }
 0xc91   : > { %3730 = vmatpush3.xpose.msk.msra.mxu0 %vm946_vm2, %v2276_v15  ;;  %3731 = vmatprep.mubr.msk.f32.mxu0 %vm4090_vm0, %v4091_v1  ;;  %s4605_s28 = scalar_lea.vmem [#allocation7], %s3484_s8 }
 0xc92   : > { %3739 = vmatprep.subr.mxu0 %v4091_v1 }
 0xd02   : > { %v2274_v16 = vpop.permute.xlu0 %2273 }
 0xd03   : > { %3732 = vmatmul.mubr.msk.f32.vlgmr.msra.gmra.mrb[18].mxu0 %vm946_vm2, %v2274_v16 }
 0xd04   : > { %3741 = vmatprep.mubr.msk.f32.mxu0 %vm4090_vm0, %v4091_v1  ;;  %3740 = vmatpush3.msra.mxu0 %v2105_v44  ;;  %v3100_v44 = vld [vmem:[%s4815_s14 + $0x8] sm:$0xff] }
 0xd05   : > { %3749 = vmatprep.subr.mxu0 %v4091_v1 }
 0xd63   : > { %v2182_v19 = vpop.f32.mrb[16].mxu0 }
 0xd64   : > { %v2183_v20 = vadd.f32 %v2182_v19, %v4586_v18  ;;  %v3723_v21 = vpop.f32.mrb[17].mxu0 }
 0xd66   : > { %v2186_v22 = vsel %vm946_vm2, %v2183_v20, -inf }
 0xd67   : > { %2187 = vmax.xlane.f32.xlu0 %v2186_v22 }
 0xdd6   : > { %v2347_v23 = vpop.f32.mrb[18].mxu0 }
 0xdd7   : > { %v2348_v24 = vadd.f32 %v2347_v23, %v4586_v18  ;;  %v3733_v25 = vpop.f32.mrb[19].mxu0 }
 0xdd9   : > { %v2351_v17 = vsel %vm946_vm2, %v2348_v24, -inf }
 0xdda   : > { %2352 = vmax.xlane.f32.xlu1 %v2351_v17 }
 0xdeb   : > { %2362 = vrot.lane.b32.xlu1 %v4559_v6, %s4892_s23  ;;  %s3332_s23 = sshll.u32 %s4605_s28, 4  ;;  %s4751_s23 = int_to_ptr.vmem [resolvable:$true] %s3332_s23 }
 0xdec   : > { %s4015_s6 = scalar_lea.vmem %s4751_s23, 512 }
 0xded   : > { %p4016_p12 = scmp.ne.s32.totalorder %s4751_s23, %s4015_s6 }
 0xdef   : > { %2586 = vrot.lane.b32.xlu1 %v4559_v6, %s4893_s1  ;;  %p4017_p2 = pnand %p4016_p12, %p4898_p1 }
 0xdf1   : > { %p4018_p3 = pneg %p4017_p2 }
 0xdf4   : > { %v2188_v11 = vpop.xlane.xlu0 %2187 }
 0xdf5   : > { %v2189_v26 = vsub.f32 %v2183_v20, %v2188_v11 }
 0xdf7   : > { %v2190_v27 = vmul.f32 1.442695, %v2189_v26 }
 0xdf9   : > { %3939 = vpow2.f32 %v2190_v27 }
 0xe03   : > { %v3940_v28 = vpop.eup %3939 }
 0xe04   : > { %v2192_v29 = vsel %vm946_vm2, %v3940_v28, 0.0 }
 0xe05   : > { %2193 = vadd.xlane.f32.xlu0 %v2192_v29 }
 0xe67   : > { %v2353_v30 = vpop.xlane.xlu1 %2352 }
 0xe68   : > { %v2354_v31 = vsub.f32 %v2348_v24, %v2353_v30 }
 0xe6a   : > { %v2355_v32 = vmul.f32 1.442695, %v2354_v31 }
 0xe6b   : > { %v2363_v40 = vpop.permute.xlu1 %2362 }
 0xe6c   : > { %3941 = vpow2.f32 %v2355_v32  ;;  %v3531_v32 = vld [vmem:[%s4814_s13] ss:$0 sm:$0xff] }
 0xe6f   : > { %v2587_v47 = vpop.permute.xlu1 %2586 }
 0xe76   : > { %v3942_v33 = vpop.eup %3941 }
 0xe77   : > { %v2357_v34 = vsel %vm946_vm2, %v3942_v33, 0.0 }
 0xe78   : > { %2358 = vadd.xlane.f32.xlu0 %v2357_v34 }
 0xe8e   : > { %2197 = vrot.lane.b32.xlu0 %v4559_v6, %s4894_s0  ;;  %s4897_s0 = smov 72  }
 0xe92   : > { %v2194_v35 = vpop.xlane.xlu0 %2193  ;;  %2584 = vrot.lane.b32.xlu0 %v4569_v14, %s4893_s1 }
 0xe93   : > { %3943 = vrcp.f32 %v2194_v35 }
 0xe9d   : > { %v3944_v36 = vpop.eup %3943 }
 0xe9e   : > { %v2196_v37 = vmul.f32 %v3944_v36, %v3940_v28 }
 0xea0   : > { %3304 = vst.msk [vmem:[%s4605_s28] sm:$0xff] %vm946_vm2, %v2196_v37 }
 0xf05   : > { %v2359_v38 = vpop.xlane.xlu0 %2358 }
 0xf06   : > { %3945 = vrcp.f32 %v2359_v38 }
 0xf09   : > { %v2198_v39 = vpop.permute.xlu0 %2197 }
 0xf0a   : > { %3725 = vmatpush3.msra.mxu1 %v2198_v39 }
 0xf0b   : > { %3727 = vmatmul.mubr.msk.f32.vlgmr.msra.gmra.mrb[14].mxu1 %vm946_vm2, %v2196_v37  ;;  %3734 = vmatprep.subr.mxu1 %v4091_v1 }
 0xf0c   : > { %3735 = vmatpush3.msra.mxu1 %v2363_v40  ;;  %3736 = vmatprep.mubr.msk.f32.mxu1 %vm4090_vm0, %v4091_v1 }
 0xf0d   : > { %3744 = vmatprep.subr.mxu1 %v4091_v1  ;;  %v2585_v49 = vpop.permute.xlu0 %2584 }
 0xf10   : > { %v3946_v41 = vpop.eup %3945 }
 0xf11   : > { %v2361_v42 = vmul.f32 %v3946_v41, %v3942_v33 }
 0xf13   : > { %3540 = vst.msk [vmem:[%s4605_s28 + $0x8] sm:$0xff] %vm946_vm2, %v2361_v42  ;;  %3737 = vmatmul.mubr.msk.f32.vlgmr.msra.gmra.mrb[16].mxu1 %vm946_vm2, %v2361_v42 }
 0xf14   : > { %3746 = vmatprep.mubr.msk.f32.mxu1 %vm4090_vm0, %v4091_v1  ;;  %3745 = vmatpush3.msra.mxu1 %v2104_v43 }
 0xf15   : > { %3754 = vmatprep.subr.mxu1 %v4091_v1 }
 0xfde   : > { %v2269_v45 = vpop.f32.mrb[14].mxu1 }
 0xfdf   : > { %v3728_v46 = vpop.f32.mrb[15].mxu1  ;;  %3747 = vmatmul.mubr.msk.f32.vlgmr.msra.gmra.mrb[18].mxu1 %vm946_vm2, %v2269_v45 }
 0xfe0   : > { %3756 = vmatprep.mubr.msk.f32.mxu1 %vm4090_vm0, %v4091_v1  ;;  %v3102_v46 = vld [vmem:[%s4815_s14 + $0x18] sm:$0xff] }
 0xfe6   : > { %v2434_v8 = vpop.f32.mrb[16].mxu1 }
 0xfe7   : > { %v3738_v48 = vpop.f32.mrb[17].mxu1  ;;  %3742 = vmatmul.mubr.msk.f32.vlgmr.msra.gmra.mrb[20].mxu0 %vm946_vm2, %v2434_v8 }
 0xfe8   : > { %3750 = vmatpush3.xpose.msk.msra.mxu0 %vm946_vm2, %v2587_v47  ;;  %3751 = vmatprep.mubr.msk.f32.mxu0 %vm4090_vm0, %v4091_v1  ;;  %v3184_v47 = vld [vmem:[%s4817_s16] sm:$0xff]  ;;  %v3185_v48 = vld [vmem:[%s4817_s16 + $0x8] sm:$0xff] }
 0xfe9   : > { %3759 = vmatprep.subr.mxu0 %v4091_v1 }
 0xfeb   : > { %3752 = vmatmul.mubr.msk.f32.vlgmr.msra.gmra.mrb[22].mxu0 %vm946_vm2, %v2585_v49  ;;  %v3186_v49 = vld [vmem:[%s4817_s16 + $0x10] sm:$0xff] }
 0xfec   : > { %3761 = vmatprep.mubr.msk.f32.mxu0 %vm4090_vm0, %v4091_v1  ;;  %3760 = vmatpush3.msra.mxu0 %v2106_v12 }
 0xfed   : > { %3769 = vmatprep.subr.mxu0 %v4091_v1 }
0x10b2   : > { %v2580_v50 = vpop.f32.mrb[18].mxu1 }
0x10b3   : > { %v3748_v51 = vpop.f32.mrb[19].mxu1 }
0x10b4   : > { %v3187_v51 = vld [vmem:[%s4817_s16 + $0x18] sm:$0xff] }
0x10ba   : > { %v2507_v52 = vpop.f32.mrb[20].mxu0 }
0x10bb   : > { %v2581_v53 = vadd.f32 %v2580_v50, %v2507_v52  ;;  %v3743_v54 = vpop.f32.mrb[21].mxu0  ;;  %v3834_v50 = vpack.c.bf16 %v3185_v48, %v3184_v47  ;;  %v3837_v52 = vpack.c.bf16 %v3187_v51, %v3186_v49 }
0x10bc   : > { %v3189_v54 = vld [vmem:[%s4817_s16 + $0x28] sm:$0xff] }
0x10be   : > { %v2658_v55 = vpop.f32.mrb[22].mxu0 }
0x10bf   : > { %v2659_v56 = vadd.f32 %v2658_v55, %v4586_v18  ;;  %v3753_v57 = vpop.f32.mrb[23].mxu0 }
0x10c1   : > { %v2662_v58 = vsel %vm946_vm2, %v2659_v56, -inf }
0x10c2   : > { %2663 = vmax.xlane.f32.xlu1 %v2662_v58 }
0x10d3   : > { %2825 = vrot.lane.b32.xlu1 %v4559_v6, %s4895_s22 }
0x10d7   : > { %2823 = vrot.lane.b32.xlu1 %v4569_v14, %s4895_s22 }
0x114f   : > { %v2664_v59 = vpop.xlane.xlu1 %2663 }
0x1150   : > { %v2665_v60 = vsub.f32 %v2659_v56, %v2664_v59 }
0x1152   : > { %v2666_v61 = vmul.f32 1.442695, %v2665_v60  ;;  %v3532_v60 = vld [vmem:[%s4821_s20] ss:$0 sm:$0xff] }
0x1153   : > { %v2826_v7 = vpop.permute.xlu1 %2825 }
0x1154   : > { %3947 = vpow2.f32 %v2666_v61 }
0x1157   : > { %v2824_v10 = vpop.permute.xlu1 %2823 }
0x115e   : > { %v3948_v62 = vpop.eup %3947 }
0x115f   : > { %v2668_v63 = vsel %vm946_vm2, %v3948_v62, 0.0 }
0x1160   : > { %2669 = vadd.xlane.f32.xlu0 %v2668_v63 }
0x1176   : > { %2673 = vrot.lane.b32.xlu0 %v4559_v6, %s4896_s30  ;;  %s3548_s30 = sshll.u32 %s4257_s7, 9  ;;  %s4103_s7 = smov [#allocation7]  }
0x1177   : > { %s4749_s8 = scalar_lea.hbm %s4826_s25, %s3548_s30 }
0x11ed   : > { %v2670_v2 = vpop.xlane.xlu0 %2669 }
0x11ee   : > { %3949 = vrcp.f32 %v2670_v2 }
0x11f1   : > { %v2674_v4 = vpop.permute.xlu0 %2673 }
0x11f2   : > { %3755 = vmatpush3.msra.mxu1 %v2674_v4  ;;  %v3191_v4 = vld [vmem:[%s4817_s16 + $0x38] sm:$0xff] }
0x11f3   : > { %3764 = vmatprep.subr.mxu1 %v4091_v1 }
0x11f8   : > { %v3950_v5 = vpop.eup %3949 }
0x11f9   : > { %v2672_v9 = vmul.f32 %v3950_v5, %v3948_v62  ;;  %v3533_v62 = vld [vmem:[%s4822_s21] ss:$0 sm:$0xff] }
0x11fb   : > { %3541 = vst.msk [vmem:[%s4605_s28 + $0x10] sm:$0xff] %vm946_vm2, %v2672_v9  ;;  %3757 = vmatmul.mubr.msk.f32.vlgmr.msra.gmra.mrb[20].mxu1 %vm946_vm2, %v2672_v9 }
0x11fc   : > { %3765 = vmatpush3.xpose.msk.msra.mxu1 %vm946_vm2, %v2826_v7  ;;  %3766 = vmatprep.mubr.msk.f32.mxu1 %vm4090_vm0, %v4091_v1  ;;  %v3534_v7 = vld [vmem:[%s4816_s15] ss:$0 sm:$0xff] }
0x11fd   : > { %3774 = vmatprep.subr.mxu1 %v4091_v1 }
0x11ff   : > { %3767 = vmatmul.mubr.msk.f32.vlgmr.msra.gmra.mrb[22].mxu1 %vm946_vm2, %v2824_v10 }
0x1200   : > { %3776 = vmatprep.mubr.msk.f32.mxu1 %vm4090_vm0, %v4091_v1 }
0x12ce   : > { %v2745_v13 = vpop.f32.mrb[20].mxu1 }
0x12cf   : > { %v3758_v14 = vpop.f32.mrb[21].mxu1  ;;  %3762 = vmatmul.mubr.msk.f32.vlgmr.msra.gmra.mrb[24].mxu0 %vm946_vm2, %v2745_v13 }
0x12d0   : > { %3771 = vmatprep.mubr.msk.f32.mxu0 %vm4090_vm0, %v4091_v1  ;;  %v3536_v14 = vld [vmem:[%s4818_s17] ss:$0 sm:$0xff] }
0x12d2   : > { %v2897_v15 = vpop.f32.mrb[22].mxu1 }
0x12d3   : > { %v2898_v16 = vadd.f32 %v2897_v15, %v4586_v18  ;;  %v3768_v19 = vpop.f32.mrb[23].mxu1  ;;  %v2107_v18 = vld [vmem:[%s4813_s12 + $0x18] sm:$0xff] }
0x12d4   : > { %3775 = vmatpush3.msra.mxu1 %v2107_v18 }
0x12d5   : > { %v2901_v20 = vsel %vm946_vm2, %v2898_v16, -inf  ;;  %3833 = vmatprep.subr.bf16.mxu1 %v4089_v0 }
0x12d6   : > { %2902 = vmax.xlane.f32.xlu0 %v2901_v20 }
0x12ec   : > { %2912 = vrot.lane.b32.xlu0 %v4559_v6, %s4897_s0 }
0x1363   : > { %v2903_v21 = vpop.xlane.xlu0 %2902 }
0x1364   : > { %v2904_v22 = vsub.f32 %v2898_v16, %v2903_v21 }
0x1366   : > { %v2905_v23 = vmul.f32 1.442695, %v2904_v22 }
0x1367   : > { %v2913_v24 = vpop.permute.xlu0 %2912 }
0x1368   : > { %3951 = vpow2.f32 %v2905_v23  ;;  %3770 = vmatpush3.msra.mxu0 %v2913_v24 }
0x1369   : > { %3827 = vmatprep.subr.bf16.mxu0 %v4089_v0 }
0x1372   : > { %v3952_v25 = vpop.eup %3951 }
0x1373   : > { %v2907_v17 = vsel %vm946_vm2, %v3952_v25, 0.0 }
0x1374   : > { %2908 = vadd.xlane.f32.xlu1 %v2907_v17 }
0x13a2   : > { %v2818_v6 = vpop.f32.mrb[24].mxu0 }
0x13a3   : > { %v2822_v11 = vadd.f32 %v2818_v6, %v2581_v53  ;;  %v3763_v26 = vpop.f32.mrb[25].mxu0  ;;  %v3188_v53 = vld [vmem:[%s4817_s16 + $0x20] sm:$0xff] }
0x13a4   : > { %v3840_v55 = vpack.c.bf16 %v3189_v54, %v3188_v53 }
0x1401   : > { %v2909_v27 = vpop.xlane.xlu1 %2908 }
0x1402   : > { %3953 = vrcp.f32 %v2909_v27 }
0x140c   : > { %v3954_v28 = vpop.eup %3953 }
0x140d   : > { %v2911_v29 = vmul.f32 %v3954_v28, %v3952_v25 }
0x140f   : > { %3542 = vst.msk [vmem:[%s4605_s28 + $0x18] sm:$0xff] %vm946_vm2, %v2911_v29  ;;  %3772 = vmatmul.mubr.msk.f32.vlgmr.msra.gmra.mrb[26].mxu0 %vm946_vm2, %v2911_v29  ;;  %s4019_s28 = sshll.u32 %s4103_s7, 4  ;;  %s4020_s28 = int_to_ptr.vmem [resolvable:$false] %s4019_s28 }
0x1410   : > { %3787 = vmatprep.mubr.msk.f32.mxu0 %vm4090_vm0, %v4091_v1  ;;  %s4021_s5 = scalar_lea.vmem %s4020_s28, 1024  ;;  %p4022_p4 = scmp.lt.s32.totalorder %s4751_s23, %s4020_s28 }
0x1411   : > { %p4023_p7 = scmp.lt.s32.totalorder %s4021_s5, %s4015_s6 }
0x1413   : > { %p4024_p8 = por %p4023_p7, %p4022_p4 }
0x1415   : > { %p4025_p11 = pnand %p4024_p8, %p4018_p3 }
0x14e2   : > { %v2984_v30 = vpop.f32.mrb[26].mxu0 }
0x14e3   : > { %v3773_v31 = vpop.f32.mrb[27].mxu0  ;;  %3777 = vmatmul.mubr.msk.f32.vlgmr.msra.gmra.mrb[24].mxu1 %vm946_vm2, %v2984_v30 }
0x14e4   : > { %3806 = vmatprep.mubr.msk.f32.mxu1 %vm4090_vm0, %v4091_v1  ;;  %v3099_v1 = vld [vmem:[%s4815_s14] sm:$0xff]  ;;  %3835 = vmatpush3.bf16.msra.mxu1 %v3834_v50 }
0x14e5   : > { %v3828_v45 = vpack.c.bf16 %v3100_v44, %v3099_v1  ;;  %3836 = vmatprep.subr.bf16.mxu1 %v4089_v0 }
0x14e7   : > { %3829 = vmatpush3.bf16.msra.mxu0 %v3828_v45 }
0x14e8   : > { %3830 = vmatprep.subr.bf16.mxu0 %v4089_v0  ;;  %3838 = vmatpush3.bf16.msra.mxu1 %v3837_v52 }
0x14e9   : > { %3839 = vmatprep.subr.bf16.mxu1 %v4089_v0 }
0x14ec   : > { %3841 = vmatpush3.bf16.msra.mxu1 %v3840_v55 }
0x14ed   : > { %3842 = vmatprep.subr.bf16.mxu1 %v4089_v0  ;;  %v3190_v0 = vld [vmem:[%s4817_s16 + $0x30] sm:$0xff] }
0x14ee   : > { %v3843_v5 = vpack.c.bf16 %v3191_v4, %v3190_v0 }
0x14f0   : > { %3844 = vmatpush3.bf16.msra.mxu1 %v3843_v5 }
0x15b6   : > { %v3057_v33 = vpop.f32.mrb[24].mxu1 }
0x15b7   : > { %v3061_v34 = vadd.f32 %v3057_v33, %v2822_v11  ;;  %v3778_v35 = vpop.f32.mrb[25].mxu1 }
0x15b9   : > { %v3068_v36 = vadd.f32 %v3531_v32, %v3061_v34 }
0x15bb   : > { %v3069_v37 = vadd.f32 %v3068_v36, %v4550_v3  ;;  %v3101_v3 = vld [vmem:[%s4815_s14 + $0x10] sm:$0xff] }
0x15bc   : > { %v3831_v8 = vpack.c.bf16 %v3102_v46, %v3101_v3 }
0x15bd   : > { %v3072_v38 = vsel %vm863_vm1, %v3069_v37, 0.0 }
0x15be   : > { %3073 = vadd.xlane.f32.xlu1 %v3072_v38  ;;  %3832 = vmatpush3.bf16.msra.mxu0 %v3831_v8 }
0x164b   : > { %v3074_v39 = vpop.xlane.xlu1 %3073 }
0x164c   : > { %v3075_v40 = vmul.f32 0.03125, %v3074_v39 }
0x164e   : > { %v3076_v41 = vsub.f32 %v3069_v37, %v3075_v40 }
0x1650   : > { %v3077_v42 = vmul.f32 %v3076_v41, %v3076_v41 }
0x1652   : > { %v3078_v43 = vsel %vm863_vm1, %v3077_v42, 0.0 }
0x1653   : > { %3079 = vadd.xlane.f32.xlu1 %v3078_v43 }
0x16e0   : > { %v3080_v56 = vpop.xlane.xlu1 %3079 }
0x16e1   : > { %v3081_v57 = vmul.f32 0.03125, %v3080_v56 }
0x16e3   : > { %v3082_v58 = vadd.f32 1e-05, %v3081_v57 }
0x16e5   : > { %3955 = vrsqrt.f32 %v3082_v58 }
0x16ef   : > { %v3956_v59 = vpop.eup %3955 }
0x16f0   : > { %v3084_v61 = vmul.f32 %v3956_v59, %v3076_v41 }
0x16f2   : > { %v3091_v63 = vmul.f32 %v3532_v60, %v3084_v61 }
0x16f4   : > { %v3098_v2 = vadd.f32 %v3533_v62, %v3091_v63 }
0x16f6   : > { %3788 = vmatmul.mubr.msk.f32.vlgmr.msra.gmra.mrb[28].mxu0 %vm863_vm1, %v3098_v2 }
0x17c9   : > { %v3179_v9 = vpop.f32.mrb[28].mxu0 }
0x17ca   : > { %v3180_v10 = vadd.f32 %v3534_v7, %v3179_v9  ;;  %v3789_v12 = vpop.f32.mrb[29].mxu0 }
0x17cc   : > { %v3183_v13 = vmax.f32 %v3180_v10, 0.0 }
0x17ce   : > { %3807 = vmatmul.mubr.msk.f32.vlgmr.msra.gmra.mrb[26].mxu1 %vm3199_vm3, %v3183_v13 }
0x18a1   : > { %v3269_v15 = vpop.f32.mrb[26].mxu1 }
0x18a2   : > { %v3270_v16 = vadd.f32 %v3536_v14, %v3269_v15  ;;  %v3808_v19 = vpop.f32.mrb[27].mxu1 }
0x18a4   : > { %v3273_v20 = vadd.f32 %v3270_v16, %v3098_v2 }
0x18a6   : > { %v3276_v21 = vsel %vm863_vm1, %v3273_v20, 0.0 }
0x18a7   : > { %3277 = vadd.xlane.f32.xlu1 %v3276_v21 }
0x1934   : > { %v3278_v22 = vpop.xlane.xlu1 %3277 }
0x1935   : > { %v3279_v23 = vmul.f32 0.03125, %v3278_v22 }
0x1937   : > { %v3280_v24 = vsub.f32 %v3273_v20, %v3279_v23 }
0x1939   : > { %v3281_v25 = vmul.f32 %v3280_v24, %v3280_v24 }
0x193b   : > { %v3282_v17 = vsel %vm863_vm1, %v3281_v25, 0.0 }
0x193c   : > { %3283 = vadd.xlane.f32.xlu1 %v3282_v17 }
0x193d   : > { %4028 = shalt.err (!%p4025_p11)
}
0x193e   : > { %s4029_s29 = scalar_lea.hbm %s4749_s8, 512  ;;  %s4033_s30 = scalar_lea.hbm %s4826_s25, 1024 }
0x193f   : > { %p4030_p13 = scmp.ne.s32.totalorder %s4749_s8, %s4029_s29  ;;  %p4034_p5 = scmp.lt.u32.totalorder %s4749_s8, %s4826_s25 }
0x1940   : > { %p4035_p9 = scmp.lt.u32.totalorder %s4033_s30, %s4029_s29  ;;  %p4037_p12 = scmp.lt.u32.totalorder %s4029_s29, %s4749_s8 }
0x1941   : > { %p4031_p0 = pnand %p4030_p13, %p4898_p1 }
0x1942   : > { %p4036_p10 = por %p4035_p9, %p4034_p5 }
0x1943   : > { %p4032_p6 = pneg %p4031_p0 }
0x1944   : > { %p4038_p2 = por %p4037_p12, %p4036_p10 }
0x1946   : > { %p4039_p3 = pnand %p4038_p2, %p4032_p6 }
0x1948   : > { %4042 = shalt.err (!%p4039_p3)
}
0x1949   : > { %s4104_s6 = smov 128   ;;  %s4105_s7 = smov 8   ;;  %v3538_v27 = vld [vmem:[#allocation2] ss:$0 sm:$0xff]  ;;  %v3539_v29 = vld [vmem:[#allocation5] ss:$0 sm:$0xff] }
0x194a   : > { %3853 = dma.vmem_to_hbm [thread:$0]  (%p4898_p1), %s4751_s23, 512, %s4749_s8, %s4755_s27, %s4104_s6, %s4104_s6, %s4105_s7  }
0x194b   : > { %s4899_s29 = sld [smem:[#allocation29_spill]] }
0x1951   : > { %s847_s9 = scalar_lea.vmem %s4899_s29, %s4377_s24 }
0x19c9   : > { %v3284_v18 = vpop.xlane.xlu1 %3283 }
0x19ca   : > { %v3285_v6 = vmul.f32 0.03125, %v3284_v18 }
0x19cc   : > { %v3286_v11 = vadd.f32 1e-05, %v3285_v6 }
0x19ce   : > { %3957 = vrsqrt.f32 %v3286_v11 }
0x19d8   : > { %v3958_v26 = vpop.eup %3957 }
0x19d9   : > { %v3288_v28 = vmul.f32 %v3958_v26, %v3280_v24 }
0x19db   : > { %v3295_v30 = vmul.f32 %v3538_v27, %v3288_v28 }
0x19dd   : > { %v3302_v31 = vadd.f32 %v3539_v29, %v3295_v30 }
0x19df   : > { %3303 = vst.msk [vmem:[%s847_s9] sm:$0xff] %vm863_vm1, %v3302_v31 }
0x19e0 PF: > { %s4900_s22 = sld [smem:[#allocation13_spill]]  ;;  %s4901_s4 = sld [smem:[#allocation11_spill]] }
0x19e1   : > { %s4902_s23 = sld [smem:[#allocation16_spill]] }
0x19e6   : > { %p3870_p1 = scmp.ge.s32.totalorder %s4900_s22, 2  ;;  %s3354_s8 = sand.u32 1, %s4901_s4  }
0x19e7   : > { %p4903_p4 = scmp.ne.s32.totalorder %s4902_s23, 0  ;;  %s3355_s27 = scalar_lea.sflag [#allocation4], %s3354_s8 }
0x19e9   : > { %p3863_p7 = pnand %p3870_p1, %p4903_p4 }
0x19eb   : > { %4068 = dma.done.wait (!%p3863_p7), %s3355_s27, 512  }
0x19ec   : > { %4070 = vsyncadd (!%p3863_p7), %s3355_s27, 4294966784  ;;  %s4904_s30 = sld [smem:[#allocation14_spill]]  ;;  %s4905_s1 = sld [smem:[#allocation12_spill]] }
0x19ed   : > { %s4906_s6 = sld [smem:[#allocation15_spill]]  ;;  %s4907_s29 = smov %s4077_s2 }
0x19f2   : > { %p38_p8 = scmp.ge.s32.totalorder %s4904_s30, 4   ;;  %s4908_s2 = smov %s4905_s1 }
0x19f4   :  { %40 = sbr.rel (!%p38_p8) target bundleno = 19 (0x13), region = 184 }
0x19fb   :  { %3360 = vsyncpa [#allocation3], 1 }
0x19fc   :  { %3362 = vsyncpa [#allocation3 + $0x1], 1 }
0x19fd   :  { %3363 = vsyncpa [#allocation6], 1 }
0x19fe   :  { %3364 = vsyncpa [#allocation4], 1 }
0x19ff   :  { %3366 = vsyncpa [#allocation4 + $0x1], 1 }

// kernel: decoder_forward.3
= control target key start
LH: loop header
LB: loop body
LE: loop exit
PB: predicated region body
PF: predicated region fallthrough
CT: control target
= control target key end

     0   :  { %s4288_s0 = inlined_call_operand.vmem [shape: f32[2,8,32], index: 0, kind: input, shape index: {}]   ;;  %s4289_s1 = inlined_call_operand.vmem [shape: f32[2,8,32], index: 1, kind: input, shape index: {}]   ;;  %s4290_s2 = inlined_call_operand.vmem [shape: f32[2,8,8], index: 2, kind: input, shape index: {}]   ;;  %s4291_s3 = inlined_call_operand.vmem [shape: f32[2,8,8], index: 3, kind: input, shape index: {}]   ;;  %s4292_s4 = inlined_call_operand.vmem [shape: f32[32,96], index: 4, kind: input, shape index: {}]   ;;  %s4293_s5 = inlined_call_operand.vmem [shape: f32[1,96], index: 5, kind: input, shape index: {}]   ;;  %s4294_s6 = inlined_call_operand.vmem [shape: f32[32,32], index: 6, kind: input, shape index: {}]   ;;  %s4295_s7 = inlined_call_operand.vmem [shape: f32[1,32], index: 7, kind: input, shape index: {}]   ;;  %s4296_s8 = inlined_call_operand.vmem [shape: f32[32,32], index: 8, kind: input, shape index: {}]   ;;  %s4297_s9 = inlined_call_operand.vmem [shape: f32[1,32], index: 9, kind: input, shape index: {}]   ;;  %s4298_s10 = inlined_call_operand.vmem [shape: f32[32,64], index: 10, kind: input, shape index: {}]   ;;  %s4299_s11 = inlined_call_operand.vmem [shape: f32[1,64], index: 11, kind: input, shape index: {}]   ;;  %s4300_s12 = inlined_call_operand.vmem [shape: f32[32,32], index: 12, kind: input, shape index: {}]   ;;  %s4301_s13 = inlined_call_operand.vmem [shape: f32[1,32], index: 13, kind: input, shape index: {}]   ;;  %s4302_s14 = inlined_call_operand.vmem [shape: f32[32,64], index: 14, kind: input, shape index: {}]   ;;  %s4303_s15 = inlined_call_operand.vmem [shape: f32[1,64], index: 15, kind: input, shape index: {}]   ;;  %s4304_s16 = inlined_call_operand.vmem [shape: f32[64,32], index: 16, kind: input, shape index: {}]   ;;  %s4305_s17 = inlined_call_operand.vmem [shape: f32[1,32], index: 17, kind: input, shape index: {}]   ;;  %s4306_s18 = inlined_call_operand.vmem [shape: f32[1,32], index: 18, kind: input, shape index: {}]   ;;  %s4307_s19 = inlined_call_operand.vmem [shape: f32[1,32], index: 19, kind: input, shape index: {}]   ;;  %s4308_s20 = inlined_call_operand.vmem [shape: f32[1,32], index: 20, kind: input, shape index: {}]   ;;  %s4309_s21 = inlined_call_operand.vmem [shape: f32[1,32], index: 21, kind: input, shape index: {}]   ;;  %s4310_s22 = inlined_call_operand.vmem [shape: f32[1,32], index: 22, kind: input, shape index: {}]   ;;  %s4311_s23 = inlined_call_operand.vmem [shape: f32[1,32], index: 23, kind: input, shape index: {}]   ;;  %s4312_s24 = inlined_call_operand.vmem [shape: f32[2,8,32], index: 24, kind: output, shape index: {}]  }
   0x1   :  { %4328 = sst [smem:[#allocation2_spill]] %s4288_s0 }
   0x2   :  { %4329 = sst [smem:[#allocation3_spill]] %s4289_s1 }
   0x3   :  { %4330 = sst [smem:[#allocation4_spill]] %s4290_s2 }
   0x4   :  { %4331 = sst [smem:[#allocation5_spill]] %s4291_s3 }
   0x5   :  { %4332 = sst [smem:[#allocation6_spill]] %s4292_s4 }
   0x6   :  { %4333 = sst [smem:[#allocation7_spill]] %s4293_s5  ;;  %s3894_s5 = smov 0  }
   0x7   :  { %4334 = sst [smem:[#allocation8_spill]] %s4294_s6 }
   0x8   :  { %4335 = sst [smem:[#allocation9_spill]] %s4295_s7 }
   0x9   :  { %4336 = sst [smem:[#allocation10_spill]] %s4296_s8 }
   0xa LB: > { %s3329_s26 = sadd.s32 4294967295, %s3753_s5   ;;  %p3333_p0 = scmp.ge.s32.totalorder %s3753_s5, 1  ;;  %s3753_s5 = sphi %s3894_s5, %s34_s5  }
   0xb   : > { %p688_p1 = scmp.lt.s32.totalorder %s3753_s5, 3 }
   0xd   : > { %p689_p2 = pnand %p3333_p0, %p688_p1 }
   0xe   : > { %s4337_s6 = sld [smem:[#allocation6_spill]] (!%p689_p2)  ;;  %v3755_v3 = vmov (!%p689_p2), 0.0|0.0   ;;  %vm3756_vm0 = vmmov (!%p689_p2), 0   ;;  %v3757_v6 = vmov (!%p689_p2), 0.0   ;;  %p764_p3 = scmp.lt.s32.totalorder (!%p689_p2), %s3329_s26, 1  ;;  %vm799_vm1 = vcmask (!%p689_p2), 261120  }
   0xf   : > { %692 = sbr.rel (%p689_p2) target bundleno = 6537 (0x1989), region = 116  ;;  %3651 = vmatprep.subr.bf16.mxu0 (!%p689_p2), %v3755_v3  ;;  %3476 = vmatprep.mubr.msk.f32.mxu0 (!%p689_p2), %vm3756_vm0, %v3757_v6  ;;  %s4338_s1 = sld [smem:[#allocation2_spill]] (!%p689_p2)  ;;  %vm882_vm2 = vcmask (!%p689_p2), 64512   ;;  %vm3135_vm3 = vcmask (!%p689_p2), 523264  }
  0x10   : > { %3484 = vmatprep.subr.mxu1 (!%p689_p2), %v3757_v6  ;;  %3486 = vmatprep.mubr.msk.f32.mxu1 (!%p689_p2), %vm3756_vm0, %v3757_v6  ;;  %s4339_s2 = sld [smem:[#allocation7_spill]] (!%p689_p2)  ;;  %s4320_s29 = smov (!%p689_p2), 96  }
  0x11   : > { %s4324_s0 = smov (!%p689_p2), 120   ;;  %s4323_s7 = smov (!%p689_p2), 88  }
  0x12   : > { %s4340_s8 = sld [smem:[#allocation4_spill]] (!%p689_p2)  ;;  %s4317_s28 = smov (!%p689_p2), 80  }
  0x13   : > { %s4341_s3 = sld [smem:[#allocation8_spill]] (!%p689_p2) }
  0x14   : > { %v788_v0 = vld [vmem:[%s4337_s6] sm:$0xff] (!%p689_p2)  ;;  %v789_v1 = vld [vmem:[%s4337_s6 + $0x8] sm:$0xff] (!%p689_p2)  ;;  %v790_v2 = vld [vmem:[%s4337_s6 + $0x10] sm:$0xff] (!%p689_p2) }
  0x15   : > { %v3652_v4 = vpack.c.bf16 (!%p689_p2), %v789_v1, %v788_v0  ;;  %v791_v5 = vld [vmem:[%s4337_s6 + $0x18] sm:$0xff] (!%p689_p2) }
  0x16   : > { %v3655_v7 = vpack.c.bf16 %v791_v5, %v790_v2  ;;  %s4354_s26 = smov (!%p764_p3, %s3329_s26), 1  ;;  %v3339_v9 = vld [vmem:[%s4339_s2] ss:$0 sm:$0xff]  ;;  %s3767_s2 = smov 48  }
  0x17   : > { %3653 = vmatpush3.bf16.msra.mxu0 %v3652_v4  ;;  %s3921_s25 = sshll.u32 %s4354_s26, 3  ;;  %s4321_s26 = smov 112  }
  0x18   : > { %3654 = vmatprep.subr.bf16.mxu0 %v3755_v3  ;;  %s767_s27 = scalar_lea.vmem %s4338_s1, %s3921_s25  ;;  %s775_s4 = scalar_lea.vmem %s4340_s8, %s3921_s25 }
  0x19   : > { %v3927_v8 = vld [vmem:[%s767_s27] sm:$0xff]  ;;  %s3761_s1 = smov 56   ;;  %s3762_s27 = smov 64   ;;  %v874_v36 = vld [vmem:[%s4341_s3 + $0x8] sm:$0xff] }
  0x1a   : > { %v3963_v17 = vld [vmem:[%s775_s4] sm:$0xff]  ;;  %s3768_s4 = smov 40  }
  0x1b   : > { %3656 = vmatpush3.bf16.msra.mxu0 %v3655_v7  ;;  %v873_v45 = vld [vmem:[%s4341_s3] sm:$0xff] }
  0x1c   : > { %3479 = vmatprep.subr.mxu0 %v3757_v6 }
  0x1e   : > { %3477 = vmatmul.mubr.msk.f32.vlgmr.msra.gmra.mrb[0].mxu0 %vm799_vm1, %v3927_v8 }
  0x1f   : > { %3481 = vmatprep.mubr.msk.f32.mxu0 %vm3756_vm0, %v3757_v6 }
  0xf1   : > { %v869_v10 = vpop.f32.mrb[0].mxu0 }
  0xf2   : > { %v3937_v11 = vadd.f32 %v3339_v9, %v869_v10  ;;  %v3478_v12 = vpop.f32.mrb[1].mxu0 }
  0xf3   : > { %v875_v12 = vld [vmem:[%s4341_s3 + $0x10] sm:$0xff] }
  0xf4   : > { %880 = vrot.lane.b32.xlu0 %v3937_v11, %s4320_s29  ;;  %v3942_v13 = vmul.f32 0.35355338, %v3937_v11  ;;  %s4351_s29 = smov 80  }
  0xf6   : > { %1045 = vrot.lane.b32.xlu1 %v3942_v13, %s4324_s0 }
  0xf8   : > { %1047 = vrot.lane.b32.xlu0 %v3937_v11, %s4323_s7  ;;  %s4347_s7 = smov 88  }
 0x166   : > { %v881_v14 = vpop.permute.xlu0 %880 }
 0x167   : > { %3480 = vmatpush3.xpose.msk.msra.mxu0 %vm882_vm2, %v881_v14 }
 0x168   : > { %3489 = vmatprep.subr.mxu0 %v3757_v6  ;;  %v1046_v16 = vpop.permute.xlu1 %1045 }
 0x16a   : > { %v1048_v15 = vpop.permute.xlu0 %1047  ;;  %3482 = vmatmul.mubr.msk.f32.vlgmr.msra.gmra.mrb[2].mxu0 %vm882_vm2, %v3942_v13 }
 0x16b   : > { %3490 = vmatpush3.xpose.msk.msra.mxu0 %vm882_vm2, %v1048_v15  ;;  %3491 = vmatprep.mubr.msk.f32.mxu0 %vm3756_vm0, %v3757_v6 }
 0x16c   : > { %3499 = vmatprep.subr.mxu0 %v3757_v6 }
 0x16e   : > { %3492 = vmatmul.mubr.msk.f32.vlgmr.msra.gmra.mrb[4].mxu0 %vm882_vm2, %v1046_v16 }
 0x16f   : > { %3501 = vmatprep.mubr.msk.f32.mxu0 %vm3756_vm0, %v3757_v6  ;;  %3500 = vmatpush3.msra.mxu0 %v874_v36 }
 0x170   : > { %3509 = vmatprep.subr.mxu0 %v3757_v6 }
 0x23d   : > { %v954_v18 = vpop.f32.mrb[2].mxu0 }
 0x23e   : > { %v955_v19 = vadd.f32 %v954_v18, %v3963_v17  ;;  %v3483_v20 = vpop.f32.mrb[3].mxu0 }
 0x240   : > { %v958_v21 = vsel %vm882_vm2, %v955_v19, -inf }
 0x241   : > { %959 = vmax.xlane.f32.xlu1 %v958_v21  ;;  %v1119_v22 = vpop.f32.mrb[4].mxu0 }
 0x242   : > { %v1120_v23 = vadd.f32 %v1119_v22, %v3963_v17  ;;  %v3493_v24 = vpop.f32.mrb[5].mxu0 }
 0x244   : > { %v1123_v25 = vsel %vm882_vm2, %v1120_v23, -inf }
 0x245   : > { %1124 = vmax.xlane.f32.xlu0 %v1123_v25 }
 0x2ce   : > { %v960_v26 = vpop.xlane.xlu1 %959 }
 0x2cf   : > { %v961_v27 = vsub.f32 %v955_v19, %v960_v26 }
 0x2d1   : > { %v962_v28 = vmul.f32 1.442695, %v961_v27 }
 0x2d2   : > { %v1125_v29 = vpop.xlane.xlu0 %1124 }
 0x2d3   : > { %3709 = vpow2.f32 %v962_v28  ;;  %v1126_v30 = vsub.f32 %v1120_v23, %v1125_v29 }
 0x2d5   : > { %v1127_v31 = vmul.f32 1.442695, %v1126_v30 }
 0x2d7   : > { %3711 = vpow2.f32 %v1127_v31 }
 0x2dd   : > { %v3710_v32 = vpop.eup %3709 }
 0x2de   : > { %v964_v33 = vsel %vm882_vm2, %v3710_v32, 0.0 }
 0x2df   : > { %965 = vadd.xlane.f32.xlu0 %v964_v33 }
 0x2e1   : > { %v3712_v34 = vpop.eup %3711 }
 0x2e2   : > { %v1129_v35 = vsel %vm882_vm2, %v3712_v34, 0.0 }
 0x2e3   : > { %1130 = vadd.xlane.f32.xlu1 %v1129_v35 }
 0x2f4   : > { %1134 = vrot.lane.b32.xlu1 %v3937_v11, %s3761_s1  ;;  %s4316_s1 = smov 72  }
 0x2f5   : > { %969 = vrot.lane.b32.xlu0 %v3937_v11, %s3762_s27  ;;  %s4318_s27 = smov 104  }
 0x2f8   : > { %1358 = vrot.lane.b32.xlu1 %v3937_v11, %s4317_s28  ;;  %s783_s28 = scalar_lea.vmem %s4312_s24, %s3921_s25 }
 0x2f9   : > { %1356 = vrot.lane.b32.xlu0 %v3942_v13, %s4321_s26 }
 0x36c   : > { %v966_v37 = vpop.xlane.xlu0 %965 }
 0x36d   : > { %3713 = vrcp.f32 %v966_v37 }
 0x370   : > { %v1131_v38 = vpop.xlane.xlu1 %1130  ;;  %v970_v39 = vpop.permute.xlu0 %969 }
 0x371   : > { %3715 = vrcp.f32 %v1131_v38  ;;  %3485 = vmatpush3.msra.mxu1 %v970_v39 }
 0x372   : > { %3494 = vmatprep.subr.mxu1 %v3757_v6 }
 0x374   : > { %v1135_v42 = vpop.permute.xlu1 %1134  ;;  %v1357_v51 = vpop.permute.xlu0 %1356 }
 0x377   : > { %v3714_v40 = vpop.eup %3713 }
 0x378   : > { %v968_v41 = vmul.f32 %v3714_v40, %v3710_v32  ;;  %v1359_v49 = vpop.permute.xlu1 %1358 }
 0x37a   : > { %3487 = vmatmul.mubr.msk.f32.vlgmr.msra.gmra.mrb[0].mxu1 %vm882_vm2, %v968_v41 }
 0x37b   : > { %v3716_v43 = vpop.eup %3715  ;;  %3495 = vmatpush3.msra.mxu1 %v1135_v42  ;;  %3496 = vmatprep.mubr.msk.f32.mxu1 %vm3756_vm0, %v3757_v6 }
 0x37c   : > { %v1133_v44 = vmul.f32 %v3716_v43, %v3712_v34  ;;  %3504 = vmatprep.subr.mxu1 %v3757_v6 }
 0x37e   : > { %3497 = vmatmul.mubr.msk.f32.vlgmr.msra.gmra.mrb[2].mxu1 %vm882_vm2, %v1133_v44 }
 0x37f   : > { %3506 = vmatprep.mubr.msk.f32.mxu1 %vm3756_vm0, %v3757_v6  ;;  %3505 = vmatpush3.msra.mxu1 %v873_v45  ;;  %v1956_v45 = vld [vmem:[%s4298_s10] sm:$0xff] }
 0x380   : > { %3514 = vmatprep.subr.mxu1 %v3757_v6 }
 0x44d   : > { %v1041_v46 = vpop.f32.mrb[0].mxu1 }
 0x44e   : > { %v3488_v47 = vpop.f32.mrb[1].mxu1  ;;  %3507 = vmatmul.mubr.msk.f32.vlgmr.msra.gmra.mrb[4].mxu1 %vm882_vm2, %v1041_v46  ;;  %v1957_v46 = vld [vmem:[%s4298_s10 + $0x8] sm:$0xff] }
 0x44f   : > { %3516 = vmatprep.mubr.msk.f32.mxu1 %vm3756_vm0, %v3757_v6 }
 0x451   : > { %v1206_v48 = vpop.f32.mrb[2].mxu1 }
 0x452   : > { %v3498_v50 = vpop.f32.mrb[3].mxu1  ;;  %3502 = vmatmul.mubr.msk.f32.vlgmr.msra.gmra.mrb[6].mxu0 %vm882_vm2, %v1206_v48 }
 0x453   : > { %3510 = vmatpush3.xpose.msk.msra.mxu0 %vm882_vm2, %v1359_v49  ;;  %3511 = vmatprep.mubr.msk.f32.mxu0 %vm3756_vm0, %v3757_v6  ;;  %v1958_v50 = vld [vmem:[%s4298_s10 + $0x10] sm:$0xff] }
 0x454   : > { %3519 = vmatprep.subr.mxu0 %v3757_v6 }
 0x456   : > { %3512 = vmatmul.mubr.msk.f32.vlgmr.msra.gmra.mrb[8].mxu0 %vm882_vm2, %v1357_v51  ;;  %v1959_v51 = vld [vmem:[%s4298_s10 + $0x18] sm:$0xff] }
 0x457   : > { %3521 = vmatprep.mubr.msk.f32.mxu0 %vm3756_vm0, %v3757_v6  ;;  %3520 = vmatpush3.msra.mxu0 %v875_v12 }
 0x458   : > { %3529 = vmatprep.subr.mxu0 %v3757_v6 }
 0x521   : > { %v1352_v52 = vpop.f32.mrb[4].mxu1 }
 0x522   : > { %v3508_v53 = vpop.f32.mrb[5].mxu1 }
 0x525   : > { %v1279_v54 = vpop.f32.mrb[6].mxu0 }
 0x526   : > { %v4004_v55 = vadd.f32 %v1352_v52, %v1279_v54  ;;  %v3503_v56 = vpop.f32.mrb[7].mxu0  ;;  %v3667_v52 = vpack.c.bf16 %v1959_v51, %v1958_v50 }
 0x529   : > { %v1430_v57 = vpop.f32.mrb[8].mxu0 }
 0x52a   : > { %v1431_v58 = vadd.f32 %v1430_v57, %v3963_v17  ;;  %v3513_v59 = vpop.f32.mrb[9].mxu0 }
 0x52c   : > { %v1434_v60 = vsel %vm882_vm2, %v1431_v58, -inf }
 0x52d   : > { %1435 = vmax.xlane.f32.xlu1 %v1434_v60 }
 0x53e   : > { %1597 = vrot.lane.b32.xlu1 %v3937_v11, %s4316_s1  ;;  %s4350_s1 = smov 104  }
 0x542   : > { %1595 = vrot.lane.b32.xlu1 %v3942_v13, %s4318_s27  ;;  %s4343_s27 = sld [smem:[#allocation10_spill]] }
 0x548   : > { %v1872_v47 = vld [vmem:[%s4343_s27] sm:$0xff]  ;;  %v1873_v48 = vld [vmem:[%s4343_s27 + $0x8] sm:$0xff]  ;;  %v1874_v53 = vld [vmem:[%s4343_s27 + $0x10] sm:$0xff] }
 0x549   : > { %v3658_v49 = vpack.c.bf16 %v1873_v48, %v1872_v47  ;;  %v1875_v54 = vld [vmem:[%s4343_s27 + $0x18] sm:$0xff] }
 0x5ba   : > { %v1436_v61 = vpop.xlane.xlu1 %1435 }
 0x5bb   : > { %v1437_v62 = vsub.f32 %v1431_v58, %v1436_v61  ;;  %v3358_v61 = vld [vmem:[%s4306_s18] ss:$0 sm:$0xff] }
 0x5bd   : > { %v1438_v63 = vmul.f32 1.442695, %v1437_v62 }
 0x5be   : > { %v1598_v7 = vpop.permute.xlu1 %1597 }
 0x5bf   : > { %3717 = vpow2.f32 %v1438_v63  ;;  %v3359_v63 = vld [vmem:[%s4307_s19] ss:$0 sm:$0xff] }
 0x5c2   : > { %v1596_v10 = vpop.permute.xlu1 %1595 }
 0x5c9   : > { %v3718_v0 = vpop.eup %3717 }
 0x5ca   : > { %v1440_v1 = vsel %vm882_vm2, %v3718_v0, 0.0 }
 0x5cb   : > { %1441 = vadd.xlane.f32.xlu0 %v1440_v1 }
 0x5e1   : > { %1445 = vrot.lane.b32.xlu0 %v3937_v11, %s3767_s2  ;;  %s4342_s2 = sld [smem:[#allocation9_spill]] }
 0x5e7   : > { %v3357_v33 = vld [vmem:[%s4342_s2] ss:$0 sm:$0xff]  ;;  %s4346_s2 = sld [smem:[#allocation5_spill]] }
 0x5ed   : > { %s779_s0 = scalar_lea.vmem %s4346_s2, %s3921_s25 }
 0x658   : > { %v1442_v2 = vpop.xlane.xlu0 %1441 }
 0x659   : > { %3719 = vrcp.f32 %v1442_v2  ;;  %v3362_v2 = vld [vmem:[%s4299_s11] ss:$0 sm:$0xff] }
 0x65c   : > { %v1446_v4 = vpop.permute.xlu0 %1445 }
 0x65d   : > { %3515 = vmatpush3.msra.mxu1 %v1446_v4 }
 0x65e   : > { %3524 = vmatprep.subr.mxu1 %v3757_v6 }
 0x663   : > { %v3720_v5 = vpop.eup %3719 }
 0x664   : > { %v1444_v9 = vmul.f32 %v3720_v5, %v3718_v0 }
 0x666   : > { %3517 = vmatmul.mubr.msk.f32.vlgmr.msra.gmra.mrb[6].mxu1 %vm882_vm2, %v1444_v9  ;;  %v3360_v9 = vld [vmem:[%s4297_s9] ss:$0 sm:$0xff] }
 0x667   : > { %3525 = vmatpush3.xpose.msk.msra.mxu1 %vm882_vm2, %v1598_v7  ;;  %3526 = vmatprep.mubr.msk.f32.mxu1 %vm3756_vm0, %v3757_v6 }
 0x668   : > { %3534 = vmatprep.subr.mxu1 %v3757_v6 }
 0x66a   : > { %3527 = vmatmul.mubr.msk.f32.vlgmr.msra.gmra.mrb[8].mxu1 %vm882_vm2, %v1596_v10 }
 0x66b   : > { %3536 = vmatprep.mubr.msk.f32.mxu1 %vm3756_vm0, %v3757_v6 }
 0x739   : > { %v1517_v13 = vpop.f32.mrb[6].mxu1 }
 0x73a   : > { %v3518_v14 = vpop.f32.mrb[7].mxu1  ;;  %3522 = vmatmul.mubr.msk.f32.vlgmr.msra.gmra.mrb[10].mxu0 %vm882_vm2, %v1517_v13 }
 0x73b   : > { %3531 = vmatprep.mubr.msk.f32.mxu0 %vm3756_vm0, %v3757_v6 }
 0x73d   : > { %v1669_v15 = vpop.f32.mrb[8].mxu1 }
 0x73e   : > { %v1670_v16 = vadd.f32 %v1669_v15, %v3963_v17  ;;  %v3528_v18 = vpop.f32.mrb[9].mxu1  ;;  %v876_v17 = vld [vmem:[%s4341_s3 + $0x18] sm:$0xff]  ;;  %s4344_s3 = sld [smem:[#allocation3_spill]] }
 0x73f   : > { %3535 = vmatpush3.msra.mxu1 %v876_v17  ;;  %v4129_v18 = vld [vmem:[%s779_s0] sm:$0xff]  ;;  %s4352_s0 = smov 72  }
 0x740   : > { %v1673_v19 = vsel %vm882_vm2, %v1670_v16, -inf  ;;  %3663 = vmatprep.subr.bf16.mxu1 %v3755_v3 }
 0x741   : > { %1674 = vmax.xlane.f32.xlu0 %v1673_v19 }
 0x744   : > { %s771_s6 = scalar_lea.vmem %s4344_s3, %s3921_s25  ;;  %s4349_s3 = smov 96  }
 0x745   : > { %v785_v56 = vld [vmem:[%s771_s6] sm:$0xff]  ;;  %s4348_s6 = smov 112  }
 0x757   : > { %1684 = vrot.lane.b32.xlu0 %v3937_v11, %s3768_s4  ;;  %s4345_s4 = smov 120  }
 0x7ce   : > { %v1675_v20 = vpop.xlane.xlu0 %1674 }
 0x7cf   : > { %v1676_v21 = vsub.f32 %v1670_v16, %v1675_v20 }
 0x7d1   : > { %v1677_v22 = vmul.f32 1.442695, %v1676_v21 }
 0x7d2   : > { %v1685_v23 = vpop.permute.xlu0 %1684 }
 0x7d3   : > { %3721 = vpow2.f32 %v1677_v22  ;;  %3530 = vmatpush3.msra.mxu0 %v1685_v23 }
 0x7d4   : > { %3657 = vmatprep.subr.bf16.mxu0 %v3755_v3 }
 0x7dd   : > { %v3722_v24 = vpop.eup %3721 }
 0x7de   : > { %v1679_v25 = vsel %vm882_vm2, %v3722_v24, 0.0 }
 0x7df   : > { %1680 = vadd.xlane.f32.xlu1 %v1679_v25 }
 0x80d   : > { %v1590_v11 = vpop.f32.mrb[10].mxu0 }
 0x80e   : > { %v1594_v26 = vadd.f32 %v1590_v11, %v4004_v55  ;;  %v3523_v27 = vpop.f32.mrb[11].mxu0  ;;  %v3661_v55 = vpack.c.bf16 %v1875_v54, %v1874_v53 }
 0x86c   : > { %v1681_v28 = vpop.xlane.xlu1 %1680 }
 0x86d   : > { %3723 = vrcp.f32 %v1681_v28 }
 0x877   : > { %v3724_v29 = vpop.eup %3723 }
 0x878   : > { %v1683_v30 = vmul.f32 %v3724_v29, %v3722_v24 }
 0x87a   : > { %3532 = vmatmul.mubr.msk.f32.vlgmr.msra.gmra.mrb[12].mxu0 %vm882_vm2, %v1683_v30 }
 0x87b   : > { %3547 = vmatprep.mubr.msk.f32.mxu0 %vm3756_vm0, %v3757_v6  ;;  %3659 = vmatpush3.bf16.msra.mxu0 %v3658_v49 }
 0x87c   : > { %3660 = vmatprep.subr.bf16.mxu0 %v3755_v3 }
 0x87f   : > { %3662 = vmatpush3.bf16.msra.mxu0 %v3661_v55 }
 0x880   : > { %3561 = vmatprep.subr.mxu0 %v3757_v6 }
 0x94d   : > { %v1756_v31 = vpop.f32.mrb[12].mxu0 }
 0x94e   : > { %v3533_v32 = vpop.f32.mrb[13].mxu0  ;;  %3537 = vmatmul.mubr.msk.f32.vlgmr.msra.gmra.mrb[10].mxu1 %vm882_vm2, %v1756_v31 }
 0x94f   : > { %3558 = vmatprep.mubr.msk.f32.mxu1 %vm3756_vm0, %v3757_v6 }
 0xa21   : > { %v1829_v34 = vpop.f32.mrb[10].mxu1 }
 0xa22   : > { %v1833_v35 = vadd.f32 %v1829_v34, %v1594_v26  ;;  %v3538_v36 = vpop.f32.mrb[11].mxu1 }
 0xa24   : > { %v1840_v37 = vadd.f32 %v3357_v33, %v1833_v35 }
 0xa26   : > { %v1841_v38 = vadd.f32 %v1840_v37, %v3927_v8  ;;  %v3664_v8 = vpack.c.bf16 %v1957_v46, %v1956_v45 }
 0xa28   : > { %v1844_v39 = vsel %vm799_vm1, %v1841_v38, 0.0  ;;  %3665 = vmatpush3.bf16.msra.mxu1 %v3664_v8 }
 0xa29   : > { %1845 = vadd.xlane.f32.xlu1 %v1844_v39  ;;  %3666 = vmatprep.subr.bf16.mxu1 %v3755_v3 }
 0xa2c   : > { %3668 = vmatpush3.bf16.msra.mxu1 %v3667_v52 }
 0xa2d   : > { %3566 = vmatprep.subr.mxu1 %v3757_v6 }
 0xa2f   : > { %3559 = vmatmul.mubr.msk.f32.vlgmr.msra.gmra.mrb[12].mxu1 %vm799_vm1, %v785_v56 }
 0xa30   : > { %3568 = vmatprep.mubr.msk.f32.mxu1 %vm3756_vm0, %v3757_v6 }
 0xab6   : > { %v1846_v40 = vpop.xlane.xlu1 %1845 }
 0xab7   : > { %v1848_v41 = vmul.f32 0.03125, %v1846_v40 }
 0xab9   : > { %v1849_v42 = vsub.f32 %v1841_v38, %v1848_v41 }
 0xabb   : > { %v1850_v43 = vmul.f32 %v1849_v42, %v1849_v42 }
 0xabd   : > { %v1851_v44 = vsel %vm799_vm1, %v1850_v43, 0.0  ;;  %v2040_v43 = vld [vmem:[%s4300_s12] sm:$0xff] }
 0xabe   : > { %1852 = vadd.xlane.f32.xlu1 %v1851_v44  ;;  %v2041_v44 = vld [vmem:[%s4300_s12 + $0x8] sm:$0xff] }
 0xb02   : > { %v2036_v4 = vpop.f32.mrb[12].mxu1 }
 0xb03   : > { %v4102_v5 = vadd.f32 %v3362_v2, %v2036_v4  ;;  %v3560_v7 = vpop.f32.mrb[13].mxu1 }
 0xb05   : > { %2211 = vrot.lane.b32.xlu1 %v4102_v5, %s4345_s4 }
 0xb4b   : > { %v1853_v57 = vpop.xlane.xlu1 %1852 }
 0xb4c   : > { %v1854_v58 = vmul.f32 0.03125, %v1853_v57 }
 0xb4e   : > { %v1855_v59 = vadd.f32 1e-05, %v1854_v58 }
 0xb50   : > { %3725 = vrsqrt.f32 %v1855_v59 }
 0xb5a   : > { %v3726_v60 = vpop.eup %3725 }
 0xb5b   : > { %v1857_v62 = vmul.f32 %v3726_v60, %v1849_v42 }
 0xb5d   : > { %v1864_v0 = vmul.f32 %v3358_v61, %v1857_v62 }
 0xb5f   : > { %v4093_v1 = vadd.f32 %v3359_v63, %v1864_v0 }
 0xb61   : > { %3548 = vmatmul.mubr.msk.f32.vlgmr.msra.gmra.mrb[14].mxu0 %vm799_vm1, %v4093_v1 }
 0xb62   : > { %3563 = vmatprep.mubr.msk.f32.mxu0 %vm3756_vm0, %v3757_v6  ;;  %3562 = vmatpush3.xpose.msk.msra.mxu0 %vm882_vm2, %v4102_v5 }
 0xb63   : > { %3571 = vmatprep.subr.mxu0 %v3757_v6 }
 0xb77   : > { %v2212_v15 = vpop.permute.xlu1 %2211 }
 0xc34   : > { %v1952_v10 = vpop.f32.mrb[14].mxu0 }
 0xc35   : > { %v1953_v12 = vadd.f32 %v3360_v9, %v1952_v10  ;;  %v3549_v13 = vpop.f32.mrb[15].mxu0 }
 0xc37   : > { %v4112_v14 = vmul.f32 0.35355338, %v1953_v12  ;;  %v2042_v12 = vld [vmem:[%s4300_s12 + $0x10] sm:$0xff] }
 0xc39   : > { %2209 = vrot.lane.b32.xlu0 %v4112_v14, %s4345_s4  ;;  %3564 = vmatmul.mubr.msk.f32.vlgmr.msra.gmra.mrb[16].mxu0 %vm882_vm2, %v4112_v14 }
 0xc3a   : > { %3572 = vmatpush3.xpose.msk.msra.mxu0 %vm882_vm2, %v2212_v15  ;;  %3573 = vmatprep.mubr.msk.f32.mxu0 %vm3756_vm0, %v3757_v6 }
 0xc3b   : > { %3581 = vmatprep.subr.mxu0 %v3757_v6 }
 0xcab   : > { %v2210_v16 = vpop.permute.xlu0 %2209 }
 0xcac   : > { %3574 = vmatmul.mubr.msk.f32.vlgmr.msra.gmra.mrb[18].mxu0 %vm882_vm2, %v2210_v16 }
 0xcad   : > { %3583 = vmatprep.mubr.msk.f32.mxu0 %vm3756_vm0, %v3757_v6  ;;  %3582 = vmatpush3.msra.mxu0 %v2041_v44  ;;  %v3036_v44 = vld [vmem:[%s4302_s14 + $0x8] sm:$0xff] }
 0xcae   : > { %3591 = vmatprep.subr.mxu0 %v3757_v6 }
 0xd0c   : > { %v2118_v19 = vpop.f32.mrb[16].mxu0 }
 0xd0d   : > { %v2119_v20 = vadd.f32 %v2118_v19, %v4129_v18  ;;  %v3565_v21 = vpop.f32.mrb[17].mxu0 }
 0xd0f   : > { %v2122_v22 = vsel %vm882_vm2, %v2119_v20, -inf }
 0xd10   : > { %2123 = vmax.xlane.f32.xlu0 %v2122_v22 }
 0xd7f   : > { %v2283_v23 = vpop.f32.mrb[18].mxu0 }
 0xd80   : > { %v2284_v24 = vadd.f32 %v2283_v23, %v4129_v18  ;;  %v3575_v25 = vpop.f32.mrb[19].mxu0 }
 0xd82   : > { %v2287_v17 = vsel %vm882_vm2, %v2284_v24, -inf }
 0xd83   : > { %2288 = vmax.xlane.f32.xlu1 %v2287_v17 }
 0xd94   : > { %2298 = vrot.lane.b32.xlu1 %v4102_v5, %s4347_s7 }
 0xd98   : > { %2522 = vrot.lane.b32.xlu1 %v4102_v5, %s4348_s6 }
 0xd9d   : > { %v2124_v11 = vpop.xlane.xlu0 %2123 }
 0xd9e   : > { %v2125_v26 = vsub.f32 %v2119_v20, %v2124_v11 }
 0xda0   : > { %v2126_v27 = vmul.f32 1.442695, %v2125_v26 }
 0xda2   : > { %3727 = vpow2.f32 %v2126_v27 }
 0xdac   : > { %v3728_v28 = vpop.eup %3727 }
 0xdad   : > { %v2128_v29 = vsel %vm882_vm2, %v3728_v28, 0.0 }
 0xdae   : > { %2129 = vadd.xlane.f32.xlu0 %v2128_v29 }
 0xe10   : > { %v2289_v30 = vpop.xlane.xlu1 %2288 }
 0xe11   : > { %v2290_v31 = vsub.f32 %v2284_v24, %v2289_v30 }
 0xe13   : > { %v2291_v32 = vmul.f32 1.442695, %v2290_v31 }
 0xe14   : > { %v2299_v40 = vpop.permute.xlu1 %2298 }
 0xe15   : > { %3729 = vpow2.f32 %v2291_v32  ;;  %v3380_v32 = vld [vmem:[%s4301_s13] ss:$0 sm:$0xff] }
 0xe18   : > { %v2523_v47 = vpop.permute.xlu1 %2522 }
 0xe1f   : > { %v3730_v33 = vpop.eup %3729 }
 0xe20   : > { %v2293_v34 = vsel %vm882_vm2, %v3730_v33, 0.0 }
 0xe21   : > { %2294 = vadd.xlane.f32.xlu0 %v2293_v34 }
 0xe37   : > { %2133 = vrot.lane.b32.xlu0 %v4102_v5, %s4349_s3 }
 0xe3b   : > { %2520 = vrot.lane.b32.xlu0 %v4112_v14, %s4348_s6  ;;  %v2130_v35 = vpop.xlane.xlu0 %2129 }
 0xe3c   : > { %3731 = vrcp.f32 %v2130_v35 }
 0xe46   : > { %v3732_v37 = vpop.eup %3731 }
 0xe47   : > { %v2132_v38 = vmul.f32 %v3732_v37, %v3728_v28 }
 0xeae   : > { %v2295_v36 = vpop.xlane.xlu0 %2294 }
 0xeaf   : > { %3733 = vrcp.f32 %v2295_v36 }
 0xeb2   : > { %v2134_v39 = vpop.permute.xlu0 %2133 }
 0xeb3   : > { %3567 = vmatpush3.msra.mxu1 %v2134_v39 }
 0xeb4   : > { %3569 = vmatmul.mubr.msk.f32.vlgmr.msra.gmra.mrb[14].mxu1 %vm882_vm2, %v2132_v38  ;;  %3576 = vmatprep.subr.mxu1 %v3757_v6 }
 0xeb5   : > { %3577 = vmatpush3.msra.mxu1 %v2299_v40  ;;  %3578 = vmatprep.mubr.msk.f32.mxu1 %vm3756_vm0, %v3757_v6 }
 0xeb6   : > { %3586 = vmatprep.subr.mxu1 %v3757_v6  ;;  %v2521_v49 = vpop.permute.xlu0 %2520 }
 0xeb9   : > { %v3734_v41 = vpop.eup %3733 }
 0xeba   : > { %v2297_v42 = vmul.f32 %v3734_v41, %v3730_v33 }
 0xebc   : > { %3579 = vmatmul.mubr.msk.f32.vlgmr.msra.gmra.mrb[16].mxu1 %vm882_vm2, %v2297_v42 }
 0xebd   : > { %3588 = vmatprep.mubr.msk.f32.mxu1 %vm3756_vm0, %v3757_v6  ;;  %3587 = vmatpush3.msra.mxu1 %v2040_v43 }
 0xebe   : > { %3596 = vmatprep.subr.mxu1 %v3757_v6 }
 0xf87   : > { %v2205_v45 = vpop.f32.mrb[14].mxu1 }
 0xf88   : > { %v3570_v46 = vpop.f32.mrb[15].mxu1  ;;  %3589 = vmatmul.mubr.msk.f32.vlgmr.msra.gmra.mrb[18].mxu1 %vm882_vm2, %v2205_v45 }
 0xf89   : > { %3598 = vmatprep.mubr.msk.f32.mxu1 %vm3756_vm0, %v3757_v6  ;;  %v3038_v46 = vld [vmem:[%s4302_s14 + $0x18] sm:$0xff] }
 0xf8f   : > { %v2370_v8 = vpop.f32.mrb[16].mxu1 }
 0xf90   : > { %v3580_v48 = vpop.f32.mrb[17].mxu1  ;;  %3584 = vmatmul.mubr.msk.f32.vlgmr.msra.gmra.mrb[20].mxu0 %vm882_vm2, %v2370_v8 }
 0xf91   : > { %3592 = vmatpush3.xpose.msk.msra.mxu0 %vm882_vm2, %v2523_v47  ;;  %3593 = vmatprep.mubr.msk.f32.mxu0 %vm3756_vm0, %v3757_v6  ;;  %v3120_v47 = vld [vmem:[%s4304_s16] sm:$0xff]  ;;  %v3121_v48 = vld [vmem:[%s4304_s16 + $0x8] sm:$0xff] }
 0xf92   : > { %3601 = vmatprep.subr.mxu0 %v3757_v6 }
 0xf94   : > { %3594 = vmatmul.mubr.msk.f32.vlgmr.msra.gmra.mrb[22].mxu0 %vm882_vm2, %v2521_v49  ;;  %v3122_v49 = vld [vmem:[%s4304_s16 + $0x10] sm:$0xff] }
 0xf95   : > { %3603 = vmatprep.mubr.msk.f32.mxu0 %vm3756_vm0, %v3757_v6  ;;  %3602 = vmatpush3.msra.mxu0 %v2042_v12 }
 0xf96   : > { %3611 = vmatprep.subr.mxu0 %v3757_v6 }
0x105b   : > { %v2516_v50 = vpop.f32.mrb[18].mxu1 }
0x105c   : > { %v3590_v51 = vpop.f32.mrb[19].mxu1 }
0x105d   : > { %v3123_v51 = vld [vmem:[%s4304_s16 + $0x18] sm:$0xff] }
0x1063   : > { %v2443_v52 = vpop.f32.mrb[20].mxu0 }
0x1064   : > { %v2517_v53 = vadd.f32 %v2516_v50, %v2443_v52  ;;  %v3585_v54 = vpop.f32.mrb[21].mxu0  ;;  %v3676_v50 = vpack.c.bf16 %v3121_v48, %v3120_v47  ;;  %v3679_v52 = vpack.c.bf16 %v3123_v51, %v3122_v49 }
0x1065   : > { %v3125_v54 = vld [vmem:[%s4304_s16 + $0x28] sm:$0xff] }
0x1067   : > { %v2594_v55 = vpop.f32.mrb[22].mxu0 }
0x1068   : > { %v2595_v56 = vadd.f32 %v2594_v55, %v4129_v18  ;;  %v3595_v57 = vpop.f32.mrb[23].mxu0 }
0x106a   : > { %v2598_v58 = vsel %vm882_vm2, %v2595_v56, -inf }
0x106b   : > { %2599 = vmax.xlane.f32.xlu1 %v2598_v58 }
0x107c   : > { %2761 = vrot.lane.b32.xlu1 %v4102_v5, %s4350_s1 }
0x1080   : > { %2759 = vrot.lane.b32.xlu1 %v4112_v14, %s4350_s1 }
0x10f8   : > { %v2600_v59 = vpop.xlane.xlu1 %2599 }
0x10f9   : > { %v2601_v60 = vsub.f32 %v2595_v56, %v2600_v59 }
0x10fb   : > { %v2602_v61 = vmul.f32 1.442695, %v2601_v60  ;;  %v3381_v60 = vld [vmem:[%s4308_s20] ss:$0 sm:$0xff] }
0x10fc   : > { %v2762_v7 = vpop.permute.xlu1 %2761 }
0x10fd   : > { %3735 = vpow2.f32 %v2602_v61 }
0x1100   : > { %v2760_v10 = vpop.permute.xlu1 %2759 }
0x1107   : > { %v3736_v62 = vpop.eup %3735 }
0x1108   : > { %v2604_v63 = vsel %vm882_vm2, %v3736_v62, 0.0 }
0x1109   : > { %2605 = vadd.xlane.f32.xlu0 %v2604_v63 }
0x111f   : > { %2609 = vrot.lane.b32.xlu0 %v4102_v5, %s4351_s29 }
0x1196   : > { %v2606_v0 = vpop.xlane.xlu0 %2605 }
0x1197   : > { %3737 = vrcp.f32 %v2606_v0 }
0x119a   : > { %v2610_v2 = vpop.permute.xlu0 %2609 }
0x119b   : > { %3597 = vmatpush3.msra.mxu1 %v2610_v2  ;;  %v3127_v2 = vld [vmem:[%s4304_s16 + $0x38] sm:$0xff] }
0x119c   : > { %3606 = vmatprep.subr.mxu1 %v3757_v6 }
0x11a1   : > { %v3738_v4 = vpop.eup %3737 }
0x11a2   : > { %v2608_v9 = vmul.f32 %v3738_v4, %v3736_v62  ;;  %v3382_v62 = vld [vmem:[%s4309_s21] ss:$0 sm:$0xff] }
0x11a4   : > { %3599 = vmatmul.mubr.msk.f32.vlgmr.msra.gmra.mrb[20].mxu1 %vm882_vm2, %v2608_v9 }
0x11a5   : > { %3607 = vmatpush3.xpose.msk.msra.mxu1 %vm882_vm2, %v2762_v7  ;;  %3608 = vmatprep.mubr.msk.f32.mxu1 %vm3756_vm0, %v3757_v6  ;;  %v3383_v7 = vld [vmem:[%s4303_s15] ss:$0 sm:$0xff] }
0x11a6   : > { %3616 = vmatprep.subr.mxu1 %v3757_v6 }
0x11a8   : > { %3609 = vmatmul.mubr.msk.f32.vlgmr.msra.gmra.mrb[22].mxu1 %vm882_vm2, %v2760_v10 }
0x11a9   : > { %3618 = vmatprep.mubr.msk.f32.mxu1 %vm3756_vm0, %v3757_v6 }
0x1277   : > { %v2681_v13 = vpop.f32.mrb[20].mxu1 }
0x1278   : > { %v3600_v14 = vpop.f32.mrb[21].mxu1  ;;  %3604 = vmatmul.mubr.msk.f32.vlgmr.msra.gmra.mrb[24].mxu0 %vm882_vm2, %v2681_v13 }
0x1279   : > { %3613 = vmatprep.mubr.msk.f32.mxu0 %vm3756_vm0, %v3757_v6  ;;  %v3385_v14 = vld [vmem:[%s4305_s17] ss:$0 sm:$0xff] }
0x127b   : > { %v2833_v15 = vpop.f32.mrb[22].mxu1 }
0x127c   : > { %v2834_v16 = vadd.f32 %v2833_v15, %v4129_v18  ;;  %v3610_v19 = vpop.f32.mrb[23].mxu1  ;;  %v2043_v18 = vld [vmem:[%s4300_s12 + $0x18] sm:$0xff] }
0x127d   : > { %3617 = vmatpush3.msra.mxu1 %v2043_v18 }
0x127e   : > { %v2837_v20 = vsel %vm882_vm2, %v2834_v16, -inf  ;;  %3675 = vmatprep.subr.bf16.mxu1 %v3755_v3 }
0x127f   : > { %2838 = vmax.xlane.f32.xlu0 %v2837_v20 }
0x1295   : > { %2848 = vrot.lane.b32.xlu0 %v4102_v5, %s4352_s0 }
0x130c   : > { %v2839_v21 = vpop.xlane.xlu0 %2838 }
0x130d   : > { %v2840_v22 = vsub.f32 %v2834_v16, %v2839_v21 }
0x130f   : > { %v2841_v23 = vmul.f32 1.442695, %v2840_v22 }
0x1310   : > { %v2849_v24 = vpop.permute.xlu0 %2848 }
0x1311   : > { %3739 = vpow2.f32 %v2841_v23  ;;  %3612 = vmatpush3.msra.mxu0 %v2849_v24 }
0x1312   : > { %3669 = vmatprep.subr.bf16.mxu0 %v3755_v3 }
0x131b   : > { %v3740_v25 = vpop.eup %3739 }
0x131c   : > { %v2843_v17 = vsel %vm882_vm2, %v3740_v25, 0.0 }
0x131d   : > { %2844 = vadd.xlane.f32.xlu1 %v2843_v17 }
0x134b   : > { %v2754_v5 = vpop.f32.mrb[24].mxu0 }
0x134c   : > { %v2758_v11 = vadd.f32 %v2754_v5, %v2517_v53  ;;  %v3605_v26 = vpop.f32.mrb[25].mxu0  ;;  %v3124_v53 = vld [vmem:[%s4304_s16 + $0x20] sm:$0xff] }
0x134d   : > { %v3682_v55 = vpack.c.bf16 %v3125_v54, %v3124_v53 }
0x13aa   : > { %v2845_v27 = vpop.xlane.xlu1 %2844 }
0x13ab   : > { %3741 = vrcp.f32 %v2845_v27  ;;  %v3387_v27 = vld [vmem:[%s4310_s22] ss:$0 sm:$0xff] }
0x13b5   : > { %v3742_v28 = vpop.eup %3741 }
0x13b6   : > { %v2847_v29 = vmul.f32 %v3742_v28, %v3740_v25 }
0x13b8   : > { %3614 = vmatmul.mubr.msk.f32.vlgmr.msra.gmra.mrb[26].mxu0 %vm882_vm2, %v2847_v29  ;;  %v3388_v29 = vld [vmem:[%s4311_s23] ss:$0 sm:$0xff] }
0x13b9   : > { %3629 = vmatprep.mubr.msk.f32.mxu0 %vm3756_vm0, %v3757_v6 }
0x148b   : > { %v2920_v30 = vpop.f32.mrb[26].mxu0 }
0x148c   : > { %v3615_v31 = vpop.f32.mrb[27].mxu0  ;;  %3619 = vmatmul.mubr.msk.f32.vlgmr.msra.gmra.mrb[24].mxu1 %vm882_vm2, %v2920_v30 }
0x148d   : > { %3648 = vmatprep.mubr.msk.f32.mxu1 %vm3756_vm0, %v3757_v6  ;;  %v3035_v6 = vld [vmem:[%s4302_s14] sm:$0xff]  ;;  %3677 = vmatpush3.bf16.msra.mxu1 %v3676_v50 }
0x148e   : > { %v3670_v45 = vpack.c.bf16 %v3036_v44, %v3035_v6  ;;  %3678 = vmatprep.subr.bf16.mxu1 %v3755_v3 }
0x1490   : > { %3671 = vmatpush3.bf16.msra.mxu0 %v3670_v45 }
0x1491   : > { %3672 = vmatprep.subr.bf16.mxu0 %v3755_v3  ;;  %3680 = vmatpush3.bf16.msra.mxu1 %v3679_v52 }
0x1492   : > { %3681 = vmatprep.subr.bf16.mxu1 %v3755_v3 }
0x1495   : > { %3683 = vmatpush3.bf16.msra.mxu1 %v3682_v55 }
0x1496   : > { %3684 = vmatprep.subr.bf16.mxu1 %v3755_v3  ;;  %v3126_v3 = vld [vmem:[%s4304_s16 + $0x30] sm:$0xff] }
0x1497   : > { %v3685_v4 = vpack.c.bf16 %v3127_v2, %v3126_v3 }
0x1499   : > { %3686 = vmatpush3.bf16.msra.mxu1 %v3685_v4 }
0x155f   : > { %v2993_v33 = vpop.f32.mrb[24].mxu1 }
0x1560   : > { %v2997_v34 = vadd.f32 %v2993_v33, %v2758_v11  ;;  %v3620_v35 = vpop.f32.mrb[25].mxu1 }
0x1562   : > { %v3004_v36 = vadd.f32 %v3380_v32, %v2997_v34 }
0x1564   : > { %v3005_v37 = vadd.f32 %v3004_v36, %v4093_v1  ;;  %v3037_v1 = vld [vmem:[%s4302_s14 + $0x10] sm:$0xff] }
0x1565   : > { %v3673_v8 = vpack.c.bf16 %v3038_v46, %v3037_v1 }
0x1566   : > { %v3008_v38 = vsel %vm799_vm1, %v3005_v37, 0.0 }
0x1567   : > { %3009 = vadd.xlane.f32.xlu1 %v3008_v38  ;;  %3674 = vmatpush3.bf16.msra.mxu0 %v3673_v8 }
0x15f4   : > { %v3010_v39 = vpop.xlane.xlu1 %3009 }
0x15f5   : > { %v3011_v40 = vmul.f32 0.03125, %v3010_v39 }
0x15f7   : > { %v3012_v41 = vsub.f32 %v3005_v37, %v3011_v40 }
0x15f9   : > { %v3013_v42 = vmul.f32 %v3012_v41, %v3012_v41 }
0x15fb   : > { %v3014_v43 = vsel %vm799_vm1, %v3013_v42, 0.0 }
0x15fc   : > { %3015 = vadd.xlane.f32.xlu1 %v3014_v43 }
0x1689   : > { %v3016_v56 = vpop.xlane.xlu1 %3015 }
0x168a   : > { %v3017_v57 = vmul.f32 0.03125, %v3016_v56 }
0x168c   : > { %v3018_v58 = vadd.f32 1e-05, %v3017_v57 }
0x168e   : > { %3743 = vrsqrt.f32 %v3018_v58 }
0x1698   : > { %v3744_v59 = vpop.eup %3743 }
0x1699   : > { %v3020_v61 = vmul.f32 %v3744_v59, %v3012_v41 }
0x169b   : > { %v3027_v63 = vmul.f32 %v3381_v60, %v3020_v61 }
0x169d   : > { %v3034_v0 = vadd.f32 %v3382_v62, %v3027_v63 }
0x169f   : > { %3630 = vmatmul.mubr.msk.f32.vlgmr.msra.gmra.mrb[28].mxu0 %vm799_vm1, %v3034_v0 }
0x1772   : > { %v3115_v9 = vpop.f32.mrb[28].mxu0 }
0x1773   : > { %v3116_v10 = vadd.f32 %v3383_v7, %v3115_v9  ;;  %v3631_v12 = vpop.f32.mrb[29].mxu0 }
0x1775   : > { %v3119_v13 = vmax.f32 %v3116_v10, 0.0 }
0x1777   : > { %3649 = vmatmul.mubr.msk.f32.vlgmr.msra.gmra.mrb[26].mxu1 %vm3135_vm3, %v3119_v13 }
0x184a   : > { %v3205_v15 = vpop.f32.mrb[26].mxu1 }
0x184b   : > { %v3206_v16 = vadd.f32 %v3385_v14, %v3205_v15  ;;  %v3650_v19 = vpop.f32.mrb[27].mxu1 }
0x184d   : > { %v3209_v20 = vadd.f32 %v3206_v16, %v3034_v0 }
0x184f   : > { %v3212_v21 = vsel %vm799_vm1, %v3209_v20, 0.0 }
0x1850   : > { %3213 = vadd.xlane.f32.xlu1 %v3212_v21 }
0x18dd   : > { %v3214_v22 = vpop.xlane.xlu1 %3213 }
0x18de   : > { %v3215_v23 = vmul.f32 0.03125, %v3214_v22 }
0x18e0   : > { %v3216_v24 = vsub.f32 %v3209_v20, %v3215_v23 }
0x18e2   : > { %v3217_v25 = vmul.f32 %v3216_v24, %v3216_v24 }
0x18e4   : > { %v3218_v17 = vsel %vm799_vm1, %v3217_v25, 0.0 }
0x18e5   : > { %3219 = vadd.xlane.f32.xlu1 %v3218_v17 }
0x1972   : > { %v3220_v18 = vpop.xlane.xlu1 %3219 }
0x1973   : > { %v3221_v5 = vmul.f32 0.03125, %v3220_v18 }
0x1975   : > { %v3222_v11 = vadd.f32 1e-05, %v3221_v5 }
0x1977   : > { %3745 = vrsqrt.f32 %v3222_v11 }
0x1981   : > { %v3746_v26 = vpop.eup %3745 }
0x1982   : > { %v3224_v28 = vmul.f32 %v3746_v26, %v3216_v24 }
0x1984   : > { %v3231_v30 = vmul.f32 %v3387_v27, %v3224_v28 }
0x1986   : > { %v3238_v31 = vadd.f32 %v3388_v29, %v3231_v30 }
0x1988   : > { %3239 = vst.msk [vmem:[%s783_s28] sm:$0xff] %vm799_vm1, %v3238_v31 }
0x1989 PF: > { %s34_s5 = sadd.s32 1, %s3753_s5  }
0x198a   : > { %p31_p4 = scmp.ge.s32.totalorder %s34_s5, 4  }
0x198c   :  { %33 = sbr.rel (!%p31_p4) target bundleno = 10 (0xa), region = 155 }

</bundles_post_ra>
